<compile_context>
chip_gen: v6e
topology: v6e:2x2x1
jax: 0.10.0
libtpu: 0.0.40
codegen_flags: <defaults>
</compile_context>

<pallas_src>
import jax
import jax.numpy as jnp
from jax.experimental import pallas as pl
from jax.experimental.pallas import tpu as pltpu

F_POSE = 24 * 3        # 72 raw pose features
FP = 128               # lane-padded feature width
CHUNK = 8              # batch rows per grid step (= f32 sublane count)


def make_kernel(T, H, T_out):
    """Fused encoder + autoregressive-decoder stacked-LSTM kernel (2 layers)."""
    G = 4 * H          # per-layer gate width (128 for H=32)

    def kernel(lengths_ref, x_ref, mean_ref, std_ref, inv_std_ref,
               w_ih1_ref, w_dec_ref, b0_ref, b1_ref, lin_w_ref, lin_b_ref,
               out_ref):
        # ---- hoisted loads / broadcasts (outside the recurrent loops) ----
        mean3 = mean_ref[...].reshape(1, 1, FP)
        inv_std3 = inv_std_ref[...].reshape(1, 1, FP)
        mean_b = jnp.broadcast_to(mean_ref[...], (CHUNK, FP))
        std_b = jnp.broadcast_to(std_ref[...], (CHUNK, FP))
        b0_b = jnp.broadcast_to(b0_ref[...], (CHUNK, G))
        b1_b = jnp.broadcast_to(b1_ref[...], (CHUNK, G))
        lin_b_b = jnp.broadcast_to(lin_b_ref[...], (CHUNK, FP))
        w_dec = w_dec_ref[...]            # (FP+2H, 2G) bf16 combined decoder weight
        w_ih0 = w_dec[:FP, :G]            # (FP, G)  layer-0 input projection
        w_rec = w_dec[FP:, :]             # (2H, 2G) block-diag [w_hh0 ; w_hh1]
        w_ih1 = w_ih1_ref[...]            # (H, G)   bf16
        lin_w = lin_w_ref[...]            # (H, FP)  bf16 (cols >= 72 are zero)
        lm1 = lengths_ref[...] - 1        # (CHUNK, 1) int32 == lengths - 1

        # ---- normalize input ONCE; layer-0 projection (+ b0) as one batched dot ----
        x_norm = (x_ref[...] - mean3) * inv_std3                           # (T,CHUNK,FP) f32
        x2 = x_norm.reshape(T * CHUNK, FP).astype(jnp.bfloat16)
        inp0 = (jnp.dot(x2, w_ih0, preferred_element_type=jnp.float32)
                + b0_ref[...])                                             # (T*CHUNK, G)

        def cell(gates, c_prev):
            # single whole-vreg sigmoid; g-gate pre-activation was pre-scaled by 2
            # in the wrapper so g = 2*sigmoid(2x)-1 == tanh(x) (one FMA, no tanh).
            sg = jax.nn.sigmoid(gates)
            i = sg[:, 0:H]
            f = sg[:, H:2 * H]
            g = 2.0 * sg[:, 2 * H:3 * H] - 1.0
            o = sg[:, 3 * H:G]
            c_new = f * c_prev + i * g
            h_new = o * jnp.tanh(c_new)
            return h_new, c_new

        h_pack = jnp.zeros((CHUNK, 2 * H), jnp.float32)   # [h0 | h1]
        c_pack = jnp.zeros((CHUNK, 2 * H), jnp.float32)   # [c0 | c1]
        fb = jnp.zeros((CHUNK, FP), jnp.float32)

        # ---- encoder over the packed (lengths-1)-frame prefixes; fully unrolled ----
        for t in range(T):
            rec = jnp.dot(h_pack.astype(jnp.bfloat16), w_rec,
                          preferred_element_type=jnp.float32)              # (CHUNK, 2G)
            gates0 = inp0[t * CHUNK:(t + 1) * CHUNK, :] + rec[:, :G]       # b0 folded
            h0n, c0n = cell(gates0, c_pack[:, :H])
            gates1 = (jnp.dot(h0n.astype(jnp.bfloat16), w_ih1,
                              preferred_element_type=jnp.float32)
                      + rec[:, G:] + b1_b)
            h1n, c1n = cell(gates1, c_pack[:, H:])
            valid = lm1 > t                                                # (CHUNK, 1)
            h_pack = jnp.where(valid, jnp.concatenate([h0n, h1n], axis=1), h_pack)
            c_pack = jnp.where(valid, jnp.concatenate([c0n, c1n], axis=1), c_pack)
            # feedback frame = normalized batch[lengths-1, b, :]
            fb = jnp.where(lm1 == t, x_norm[t], fb)

        # ---- autoregressive decoder: one stacked-LSTM step + linear residual ----
        for t in range(T_out):
            packed = jnp.concatenate([fb, h_pack], axis=1).astype(jnp.bfloat16)  # (CHUNK, FP+2H)
            comb = jnp.dot(packed, w_dec, preferred_element_type=jnp.float32)    # (CHUNK, 2G)
            gates0 = comb[:, :G] + b0_b
            h0n, c0n = cell(gates0, c_pack[:, :H])
            gates1 = (jnp.dot(h0n.astype(jnp.bfloat16), w_ih1,
                              preferred_element_type=jnp.float32)
                      + comb[:, G:] + b1_b)
            h1n, c1n = cell(gates1, c_pack[:, H:])
            h_pack = jnp.concatenate([h0n, h1n], axis=1)
            c_pack = jnp.concatenate([c0n, c1n], axis=1)
            change = (jnp.dot(h1n.astype(jnp.bfloat16), lin_w,
                              preferred_element_type=jnp.float32) + lin_b_b)
            fb = fb + change
            # CHUNK=8 -> this is a full, unmasked (8,128) tile store per frame
            out_ref[t] = fb * std_b + mean_b

    return kernel


def forward_pallas(batch_u, lengths, output_length, params, data_mean, data_std):
    T, B, F = batch_u.shape
    assert len(params["layers"]) == 2, "kernel is specialized to the 2-layer config"
    H = params["layers"][0]["w_hh_t"].shape[0]
    G = 4 * H
    pad_f = FP - F
    BP = -(-B // CHUNK) * CHUNK            # batch padded to full sublanes
    K_dec = FP + 2 * H

    # ---- one-time host-side packing / padding (tiny) ----
    x_p = jnp.pad(batch_u.astype(jnp.float32),
                  ((0, 0), (0, BP - B), (0, pad_f)))                   # (T, BP, FP)
    mean_p = jnp.pad(data_mean.reshape(1, F).astype(jnp.float32), ((0, 0), (0, pad_f)))
    std_p = jnp.pad(data_std.reshape(1, F).astype(jnp.float32), ((0, 0), (0, pad_f)),
                    constant_values=1.0)    # pad with 1 so 1/std stays finite
    inv_std_p = 1.0 / std_p
    lengths_p = jnp.pad(lengths.astype(jnp.int32), (0, BP - B),
                        constant_values=1)  # padded rows never update state
    lengths_2d = lengths_p.reshape(BP, 1)

    # ---- weight prep: g-gate pre-scale by 2 (tanh -> sigmoid identity), pad,
    #      build combined decoder weight, cast MXU operands to bf16 ----
    gscale = jnp.ones((G,), jnp.float32).at[2 * H:3 * H].set(2.0)
    l0, l1 = params["layers"]
    w_ih0 = l0["w_ih_t"] * gscale                                     # (F, G)
    w_hh0 = l0["w_hh_t"] * gscale                                     # (H, G)
    w_ih1 = l1["w_ih_t"] * gscale                                     # (H, G)
    w_hh1 = l1["w_hh_t"] * gscale                                     # (H, G)
    b0 = l0["b"] * gscale                                             # (1, G)
    b1 = l1["b"] * gscale                                             # (1, G)
    w_ih0_p = jnp.pad(w_ih0, ((0, pad_f), (0, 0)))                    # (FP, G), zero rows
    w_dec = jnp.zeros((K_dec, 2 * G), jnp.float32)
    w_dec = w_dec.at[:FP, :G].set(w_ih0_p)
    w_dec = w_dec.at[FP:FP + H, :G].set(w_hh0)
    w_dec = w_dec.at[FP + H:, G:].set(w_hh1)
    w_dec_bf = w_dec.astype(jnp.bfloat16)
    w_ih1_bf = w_ih1.astype(jnp.bfloat16)
    lin_w_bf = jnp.pad(params["lin_w_t"], ((0, 0), (0, pad_f))).astype(jnp.bfloat16)
    lin_b_p = jnp.pad(params["lin_b"], ((0, 0), (0, pad_f)))          # (1, FP)

    full = lambda shape: pl.BlockSpec(shape, lambda b: tuple(0 for _ in shape))
    out_p = pl.pallas_call(
        make_kernel(T, H, output_length),
        out_shape=jax.ShapeDtypeStruct((output_length, BP, FP), jnp.float32),
        grid=(BP // CHUNK,),
        in_specs=[
            pl.BlockSpec((CHUNK, 1), lambda b: (b, 0)),               # lengths
            pl.BlockSpec((T, CHUNK, FP), lambda b: (0, b, 0)),        # x
            full((1, FP)),                                            # mean
            full((1, FP)),                                            # std
            full((1, FP)),                                            # inv_std
            full((H, G)),                                             # w_ih1
            full((K_dec, 2 * G)),                                     # w_dec
            full((1, G)),                                             # b0
            full((1, G)),                                             # b1
            full((H, FP)),                                            # lin_w
            full((1, FP)),                                            # lin_b
        ],
        out_specs=pl.BlockSpec((output_length, CHUNK, FP), lambda b: (0, b, 0)),
        compiler_params=pltpu.CompilerParams(dimension_semantics=("parallel",)),
    )(lengths_2d, x_p, mean_p, std_p, inv_std_p,
      w_ih1_bf, w_dec_bf, b0, b1, lin_w_bf, lin_b_p)

    return out_p[:, :B, :F]                  # strip batch/lane padding


def init_params(key, F, H, L):
    """Deterministic synthetic parameters (PyTorch uniform(-1/sqrt(H), 1/sqrt(H)) style)."""
    scale = 1.0 / (H ** 0.5)
    keys = iter(jax.random.split(key, 4 * L + 2))
    layers = []
    for l in range(L):
        in_dim = F if l == 0 else H
        w_ih = jax.random.uniform(next(keys), (4 * H, in_dim), jnp.float32, -scale, scale)
        w_hh = jax.random.uniform(next(keys), (4 * H, H), jnp.float32, -scale, scale)
        b_ih = jax.random.uniform(next(keys), (4 * H,), jnp.float32, -scale, scale)
        b_hh = jax.random.uniform(next(keys), (4 * H,), jnp.float32, -scale, scale)
        layers.append({
            "w_ih_t": w_ih.T,                       # (in_dim, 4H)
            "w_hh_t": w_hh.T,                       # (H, 4H)
            "b": (b_ih + b_hh).reshape(1, 4 * H),   # biases are always summed
        })
    lin_w = jax.random.uniform(next(keys), (F, H), jnp.float32, -scale, scale)
    lin_b = jax.random.uniform(next(keys), (F,), jnp.float32, -scale, scale)
    return {"layers": layers, "lin_w_t": lin_w.T, "lin_b": lin_b.reshape(1, F)}


def reference_forward(batch_u, lengths, output_length, params, mean, std):
    """Pure-JAX (f32) replica of SingleMotionPredictor.forward (eval mode)."""
    T, B, F = batch_u.shape
    L = len(params["layers"])
    H = params["layers"][0]["w_hh_t"].shape[0]
    x = (batch_u - mean) / std
    h = [jnp.zeros((B, H), jnp.float32) for _ in range(L)]
    c = [jnp.zeros((B, H), jnp.float32) for _ in range(L)]

    def step(h, c, inp):
        layer_in = inp
        nh, nc = [], []
        for l in range(L):
            p = params["layers"][l]
            gates = layer_in @ p["w_ih_t"] + h[l] @ p["w_hh_t"] + p["b"]
            i = jax.nn.sigmoid(gates[:, :H])
            f = jax.nn.sigmoid(gates[:, H:2 * H])
            g = jnp.tanh(gates[:, 2 * H:3 * H])
            o = jax.nn.sigmoid(gates[:, 3 * H:])
            c_new = f * c[l] + i * g
            h_new = o * jnp.tanh(c_new)
            nh.append(h_new)
            nc.append(c_new)
            layer_in = h_new
        return nh, nc

    for t in range(T):  # masked update == pack_padded_sequence(batch, lengths - 1)
        nh, nc = step(h, c, x[t])
        valid = (t < (lengths - 1))[:, None]
        h = [jnp.where(valid, nh[l], h[l]) for l in range(L)]
        c = [jnp.where(valid, nc[l], c[l]) for l in range(L)]

    fb = x[lengths - 1, jnp.arange(B), :]
    outs = []
    for _ in range(output_length):
        h, c = step(h, c, fb)
        change = h[-1] @ params["lin_w_t"] + params["lin_b"]
        fb = fb + change
        outs.append(fb)
    return jnp.stack(outs, axis=0) * std + mean


if __name__ == "__main__":
    T, B, F, H, L, T_out = 8, 2, F_POSE, 32, 2, 4

    key = jax.random.PRNGKey(0)
    k_x, k_p = jax.random.split(key)
    batch_u = jax.random.normal(k_x, (T, B, F), jnp.float32)
    lengths = jnp.array([8, 6], dtype=jnp.int32)   # sorted descending, 2 <= len <= T

    # data_mean / data_std buffers (set_mean_and_std with non-trivial values)
    data_mean = jnp.full((1, 1, F), 0.1, jnp.float32)
    data_std = jnp.full((1, 1, F), 1.5, jnp.float32)

    params = init_params(k_p, F, H, L)

    out = forward_pallas(batch_u, lengths, T_out, params, data_mean, data_std)
    out = jax.block_until_ready(out)

    ref = reference_forward(batch_u, lengths, T_out, params, data_mean, data_std)
    assert out.shape == (T_out, B, F)
    err = float(jnp.max(jnp.abs(out - ref)))
    # bf16 MXU operands (f32 accumulation / f32 reference) limit agreement to ~1e-2
    # absolute at this output scale; real semantic bugs show up at >1e-1.
    if err > 4e-2:
        raise AssertionError(f"Pallas kernel mismatch vs reference: max abs err = {err}")

    print("KERNEL_OK")
</pallas_src>

<mosaic_0001>
module attributes {stable_mosaic.version = 11 : i64} {
  func.func @kernel(%arg0: i32, %arg1: memref<8x1xi32, #tpu.memory_space<vmem>>, %arg2: memref<8x8x128xf32, #tpu.memory_space<vmem>>, %arg3: memref<1x128xf32, #tpu.memory_space<vmem>>, %arg4: memref<1x128xf32, #tpu.memory_space<vmem>>, %arg5: memref<1x128xf32, #tpu.memory_space<vmem>>, %arg6: memref<32x128xbf16, #tpu.memory_space<vmem>>, %arg7: memref<192x256xbf16, #tpu.memory_space<vmem>>, %arg8: memref<1x128xf32, #tpu.memory_space<vmem>>, %arg9: memref<1x128xf32, #tpu.memory_space<vmem>>, %arg10: memref<32x128xbf16, #tpu.memory_space<vmem>>, %arg11: memref<1x128xf32, #tpu.memory_space<vmem>>, %arg12: memref<4x8x128xf32, #tpu.memory_space<vmem>>) attributes {dimension_semantics = [#tpu.dimension_semantics<parallel>], iteration_bounds = array<i64: 1>, scalar_prefetch = 0 : i64, scratch_operands = 0 : i64, tpu.core_type = #tpu.core_type<tc>, window_params = [{transform_indices = @transform_0, window_bounds = array<i64: 8, 1>}, {transform_indices = @transform_1, window_bounds = array<i64: 8, 8, 128>}, {pipeline_mode = #tpu.pipeline_mode<synchronous>, transform_indices = @transform_2, window_bounds = array<i64: 1, 128>}, {pipeline_mode = #tpu.pipeline_mode<synchronous>, transform_indices = @transform_3, window_bounds = array<i64: 1, 128>}, {pipeline_mode = #tpu.pipeline_mode<synchronous>, transform_indices = @transform_4, window_bounds = array<i64: 1, 128>}, {pipeline_mode = #tpu.pipeline_mode<synchronous>, transform_indices = @transform_5, window_bounds = array<i64: 32, 128>}, {pipeline_mode = #tpu.pipeline_mode<synchronous>, transform_indices = @transform_6, window_bounds = array<i64: 192, 256>}, {pipeline_mode = #tpu.pipeline_mode<synchronous>, transform_indices = @transform_7, window_bounds = array<i64: 1, 128>}, {pipeline_mode = #tpu.pipeline_mode<synchronous>, transform_indices = @transform_8, window_bounds = array<i64: 1, 128>}, {pipeline_mode = #tpu.pipeline_mode<synchronous>, transform_indices = @transform_9, window_bounds = array<i64: 32, 128>}, {pipeline_mode = #tpu.pipeline_mode<synchronous>, transform_indices = @transform_10, window_bounds = array<i64: 1, 128>}, {transform_indices = @transform_11, window_bounds = array<i64: 4, 8, 128>}]} {
    %c0 = arith.constant 0 : index
    %c0_0 = arith.constant 0 : index
    %0 = vector.load %arg3[%c0, %c0_0] : memref<1x128xf32, #tpu.memory_space<vmem>>, vector<1x128xf32>
    %1 = vector.shape_cast %0 : vector<1x128xf32> to vector<1x1x128xf32>
    %c0_1 = arith.constant 0 : index
    %c0_2 = arith.constant 0 : index
    %2 = vector.load %arg5[%c0_1, %c0_2] : memref<1x128xf32, #tpu.memory_space<vmem>>, vector<1x128xf32>
    %3 = vector.shape_cast %2 : vector<1x128xf32> to vector<1x1x128xf32>
    %c0_3 = arith.constant 0 : index
    %c0_4 = arith.constant 0 : index
    %4 = vector.load %arg3[%c0_3, %c0_4] : memref<1x128xf32, #tpu.memory_space<vmem>>, vector<1x128xf32>
    %5 = vector.shape_cast %4 : vector<1x128xf32> to vector<1x128xf32>
    %6 = vector.broadcast %5 : vector<1x128xf32> to vector<8x128xf32>
    %c0_5 = arith.constant 0 : index
    %c0_6 = arith.constant 0 : index
    %7 = vector.load %arg4[%c0_5, %c0_6] : memref<1x128xf32, #tpu.memory_space<vmem>>, vector<1x128xf32>
    %8 = vector.shape_cast %7 : vector<1x128xf32> to vector<1x128xf32>
    %9 = vector.broadcast %8 : vector<1x128xf32> to vector<8x128xf32>
    %c0_7 = arith.constant 0 : index
    %c0_8 = arith.constant 0 : index
    %10 = vector.load %arg8[%c0_7, %c0_8] : memref<1x128xf32, #tpu.memory_space<vmem>>, vector<1x128xf32>
    %11 = vector.shape_cast %10 : vector<1x128xf32> to vector<1x128xf32>
    %12 = vector.broadcast %11 : vector<1x128xf32> to vector<8x128xf32>
    %c0_9 = arith.constant 0 : index
    %c0_10 = arith.constant 0 : index
    %13 = vector.load %arg9[%c0_9, %c0_10] : memref<1x128xf32, #tpu.memory_space<vmem>>, vector<1x128xf32>
    %14 = vector.shape_cast %13 : vector<1x128xf32> to vector<1x128xf32>
    %15 = vector.broadcast %14 : vector<1x128xf32> to vector<8x128xf32>
    %c0_11 = arith.constant 0 : index
    %c0_12 = arith.constant 0 : index
    %16 = vector.load %arg11[%c0_11, %c0_12] : memref<1x128xf32, #tpu.memory_space<vmem>>, vector<1x128xf32>
    %17 = vector.shape_cast %16 : vector<1x128xf32> to vector<1x128xf32>
    %18 = vector.broadcast %17 : vector<1x128xf32> to vector<8x128xf32>
    %c0_13 = arith.constant 0 : index
    %c0_14 = arith.constant 0 : index
    %19 = vector.load %arg7[%c0_13, %c0_14] : memref<192x256xbf16, #tpu.memory_space<vmem>>, vector<192x256xbf16>
    %20 = vector.extract_strided_slice %19 {offsets = [0, 0], sizes = [128, 128], strides = [1, 1]} : vector<192x256xbf16> to vector<128x128xbf16>
    %21 = vector.extract_strided_slice %19 {offsets = [128, 0], sizes = [64, 256], strides = [1, 1]} : vector<192x256xbf16> to vector<64x256xbf16>
    %c0_15 = arith.constant 0 : index
    %c0_16 = arith.constant 0 : index
    %22 = vector.load %arg6[%c0_15, %c0_16] : memref<32x128xbf16, #tpu.memory_space<vmem>>, vector<32x128xbf16>
    %c0_17 = arith.constant 0 : index
    %c0_18 = arith.constant 0 : index
    %23 = vector.load %arg10[%c0_17, %c0_18] : memref<32x128xbf16, #tpu.memory_space<vmem>>, vector<32x128xbf16>
    %c0_19 = arith.constant 0 : index
    %c0_20 = arith.constant 0 : index
    %24 = vector.load %arg1[%c0_19, %c0_20] : memref<8x1xi32, #tpu.memory_space<vmem>>, vector<8x1xi32>
    %c1_i32 = arith.constant 1 : i32
    %25 = vector.broadcast %c1_i32 : i32 to vector<8x1xi32>
    %26 = arith.subi %24, %25 : vector<8x1xi32>
    %c0_21 = arith.constant 0 : index
    %c0_22 = arith.constant 0 : index
    %c0_23 = arith.constant 0 : index
    %27 = vector.load %arg2[%c0_21, %c0_22, %c0_23] : memref<8x8x128xf32, #tpu.memory_space<vmem>>, vector<8x8x128xf32>
    %28 = vector.broadcast %1 : vector<1x1x128xf32> to vector<8x8x128xf32>
    %29 = arith.subf %27, %28 : vector<8x8x128xf32>
    %30 = vector.broadcast %3 : vector<1x1x128xf32> to vector<8x8x128xf32>
    %31 = arith.mulf %29, %30 : vector<8x8x128xf32>
    %32 = vector.shape_cast %31 : vector<8x8x128xf32> to vector<64x128xf32>
    %33 = arith.truncf %32 : vector<64x128xf32> to vector<64x128xbf16>
    %cst = arith.constant dense<0.000000e+00> : vector<64x128xf32>
    %34 = tpu.matmul %33, %20, %cst {dimension_numbers = #tpu.dot_dimension_numbers<[1], [0], [0], [1], [0, 0, 1, 1], [], []>} : vector<64x128xbf16>, vector<128x128xbf16>, vector<64x128xf32> -> vector<64x128xf32>
    %c0_24 = arith.constant 0 : index
    %c0_25 = arith.constant 0 : index
    %35 = vector.load %arg8[%c0_24, %c0_25] : memref<1x128xf32, #tpu.memory_space<vmem>>, vector<1x128xf32>
    %36 = vector.broadcast %35 : vector<1x128xf32> to vector<64x128xf32>
    %37 = arith.addf %34, %36 : vector<64x128xf32>
    %cst_26 = arith.constant 0.000000e+00 : f32
    %38 = vector.broadcast %cst_26 : f32 to vector<8x64xf32>
    %cst_27 = arith.constant 0.000000e+00 : f32
    %39 = vector.broadcast %cst_27 : f32 to vector<8x64xf32>
    %cst_28 = arith.constant 0.000000e+00 : f32
    %40 = vector.broadcast %cst_28 : f32 to vector<8x128xf32>
    %41 = arith.truncf %38 : vector<8x64xf32> to vector<8x64xbf16>
    %cst_29 = arith.constant dense<0.000000e+00> : vector<8x256xf32>
    %42 = tpu.matmul %41, %21, %cst_29 {dimension_numbers = #tpu.dot_dimension_numbers<[1], [0], [0], [1], [0, 0, 1, 1], [], []>} : vector<8x64xbf16>, vector<64x256xbf16>, vector<8x256xf32> -> vector<8x256xf32>
    %43 = vector.extract_strided_slice %37 {offsets = [0, 0], sizes = [8, 128], strides = [1, 1]} : vector<64x128xf32> to vector<8x128xf32>
    %44 = vector.extract_strided_slice %42 {offsets = [0, 0], sizes = [8, 128], strides = [1, 1]} : vector<8x256xf32> to vector<8x128xf32>
    %45 = arith.addf %43, %44 : vector<8x128xf32>
    %46 = vector.extract_strided_slice %39 {offsets = [0, 0], sizes = [8, 32], strides = [1, 1]} : vector<8x64xf32> to vector<8x32xf32>
    %47 = arith.negf %45 : vector<8x128xf32>
    %48 = math.exp %47 : vector<8x128xf32>
    %cst_30 = arith.constant 1.000000e+00 : f32
    %49 = vector.broadcast %cst_30 : f32 to vector<8x128xf32>
    %50 = arith.addf %49, %48 : vector<8x128xf32>
    %51 = arith.divf %49, %50 : vector<8x128xf32>
    %52 = vector.extract_strided_slice %51 {offsets = [0, 0], sizes = [8, 32], strides = [1, 1]} : vector<8x128xf32> to vector<8x32xf32>
    %53 = vector.extract_strided_slice %51 {offsets = [0, 32], sizes = [8, 32], strides = [1, 1]} : vector<8x128xf32> to vector<8x32xf32>
    %54 = vector.extract_strided_slice %51 {offsets = [0, 64], sizes = [8, 32], strides = [1, 1]} : vector<8x128xf32> to vector<8x32xf32>
    %cst_31 = arith.constant 2.000000e+00 : f32
    %55 = vector.broadcast %cst_31 : f32 to vector<8x32xf32>
    %56 = arith.mulf %55, %54 : vector<8x32xf32>
    %cst_32 = arith.constant 1.000000e+00 : f32
    %57 = vector.broadcast %cst_32 : f32 to vector<8x32xf32>
    %58 = arith.subf %56, %57 : vector<8x32xf32>
    %59 = vector.extract_strided_slice %51 {offsets = [0, 96], sizes = [8, 32], strides = [1, 1]} : vector<8x128xf32> to vector<8x32xf32>
    %60 = arith.mulf %53, %46 : vector<8x32xf32>
    %61 = arith.mulf %52, %58 : vector<8x32xf32>
    %62 = arith.addf %60, %61 : vector<8x32xf32>
    %63 = math.tanh %62 : vector<8x32xf32>
    %64 = arith.mulf %59, %63 : vector<8x32xf32>
    %65 = arith.truncf %64 : vector<8x32xf32> to vector<8x32xbf16>
    %cst_33 = arith.constant dense<0.000000e+00> : vector<8x128xf32>
    %66 = tpu.matmul %65, %22, %cst_33 {dimension_numbers = #tpu.dot_dimension_numbers<[1], [0], [0], [1], [0, 0, 1, 1], [], []>} : vector<8x32xbf16>, vector<32x128xbf16>, vector<8x128xf32> -> vector<8x128xf32>
    %67 = vector.extract_strided_slice %42 {offsets = [0, 128], sizes = [8, 128], strides = [1, 1]} : vector<8x256xf32> to vector<8x128xf32>
    %68 = arith.addf %66, %67 : vector<8x128xf32>
    %69 = arith.addf %68, %15 : vector<8x128xf32>
    %70 = vector.extract_strided_slice %39 {offsets = [0, 32], sizes = [8, 32], strides = [1, 1]} : vector<8x64xf32> to vector<8x32xf32>
    %71 = arith.negf %69 : vector<8x128xf32>
    %72 = math.exp %71 : vector<8x128xf32>
    %cst_34 = arith.constant 1.000000e+00 : f32
    %73 = vector.broadcast %cst_34 : f32 to vector<8x128xf32>
    %74 = arith.addf %73, %72 : vector<8x128xf32>
    %75 = arith.divf %73, %74 : vector<8x128xf32>
    %76 = vector.extract_strided_slice %75 {offsets = [0, 0], sizes = [8, 32], strides = [1, 1]} : vector<8x128xf32> to vector<8x32xf32>
    %77 = vector.extract_strided_slice %75 {offsets = [0, 32], sizes = [8, 32], strides = [1, 1]} : vector<8x128xf32> to vector<8x32xf32>
    %78 = vector.extract_strided_slice %75 {offsets = [0, 64], sizes = [8, 32], strides = [1, 1]} : vector<8x128xf32> to vector<8x32xf32>
    %cst_35 = arith.constant 2.000000e+00 : f32
    %79 = vector.broadcast %cst_35 : f32 to vector<8x32xf32>
    %80 = arith.mulf %79, %78 : vector<8x32xf32>
    %cst_36 = arith.constant 1.000000e+00 : f32
    %81 = vector.broadcast %cst_36 : f32 to vector<8x32xf32>
    %82 = arith.subf %80, %81 : vector<8x32xf32>
    %83 = vector.extract_strided_slice %75 {offsets = [0, 96], sizes = [8, 32], strides = [1, 1]} : vector<8x128xf32> to vector<8x32xf32>
    %84 = arith.mulf %77, %70 : vector<8x32xf32>
    %85 = arith.mulf %76, %82 : vector<8x32xf32>
    %86 = arith.addf %84, %85 : vector<8x32xf32>
    %87 = math.tanh %86 : vector<8x32xf32>
    %88 = arith.mulf %83, %87 : vector<8x32xf32>
    %c0_i32 = arith.constant 0 : i32
    %89 = vector.broadcast %c0_i32 : i32 to vector<8x1xi32>
    %90 = arith.cmpi sgt, %26, %89 : vector<8x1xi32>
    %91 = tpu.concatenate %64, %88 in 1 : vector<8x32xf32>, vector<8x32xf32> -> vector<8x64xf32>
    %92 = vector.shape_cast %90 : vector<8x1xi1> to vector<8x1xi1>
    %93 = vector.broadcast %92 : vector<8x1xi1> to vector<8x64xi1>
    %94 = arith.select %93, %91, %38 : vector<8x64xi1>, vector<8x64xf32>
    %95 = tpu.concatenate %62, %86 in 1 : vector<8x32xf32>, vector<8x32xf32> -> vector<8x64xf32>
    %96 = vector.shape_cast %90 : vector<8x1xi1> to vector<8x1xi1>
    %97 = vector.broadcast %96 : vector<8x1xi1> to vector<8x64xi1>
    %98 = arith.select %97, %95, %39 : vector<8x64xi1>, vector<8x64xf32>
    %c0_i32_37 = arith.constant 0 : i32
    %99 = vector.broadcast %c0_i32_37 : i32 to vector<8x1xi32>
    %100 = arith.cmpi eq, %26, %99 : vector<8x1xi32>
    %101 = vector.extract_strided_slice %31 {offsets = [0, 0, 0], sizes = [1, 8, 128], strides = [1, 1, 1]} : vector<8x8x128xf32> to vector<1x8x128xf32>
    %102 = vector.shape_cast %101 : vector<1x8x128xf32> to vector<8x128xf32>
    %103 = vector.shape_cast %100 : vector<8x1xi1> to vector<8x1xi1>
    %104 = vector.broadcast %103 : vector<8x1xi1> to vector<8x128xi1>
    %105 = arith.select %104, %102, %40 : vector<8x128xi1>, vector<8x128xf32>
    %106 = arith.truncf %94 : vector<8x64xf32> to vector<8x64xbf16>
    %cst_38 = arith.constant dense<0.000000e+00> : vector<8x256xf32>
    %107 = tpu.matmul %106, %21, %cst_38 {dimension_numbers = #tpu.dot_dimension_numbers<[1], [0], [0], [1], [0, 0, 1, 1], [], []>} : vector<8x64xbf16>, vector<64x256xbf16>, vector<8x256xf32> -> vector<8x256xf32>
    %108 = vector.extract_strided_slice %37 {offsets = [8, 0], sizes = [8, 128], strides = [1, 1]} : vector<64x128xf32> to vector<8x128xf32>
    %109 = vector.extract_strided_slice %107 {offsets = [0, 0], sizes = [8, 128], strides = [1, 1]} : vector<8x256xf32> to vector<8x128xf32>
    %110 = arith.addf %108, %109 : vector<8x128xf32>
    %111 = vector.extract_strided_slice %98 {offsets = [0, 0], sizes = [8, 32], strides = [1, 1]} : vector<8x64xf32> to vector<8x32xf32>
    %112 = arith.negf %110 : vector<8x128xf32>
    %113 = math.exp %112 : vector<8x128xf32>
    %cst_39 = arith.constant 1.000000e+00 : f32
    %114 = vector.broadcast %cst_39 : f32 to vector<8x128xf32>
    %115 = arith.addf %114, %113 : vector<8x128xf32>
    %116 = arith.divf %114, %115 : vector<8x128xf32>
    %117 = vector.extract_strided_slice %116 {offsets = [0, 0], sizes = [8, 32], strides = [1, 1]} : vector<8x128xf32> to vector<8x32xf32>
    %118 = vector.extract_strided_slice %116 {offsets = [0, 32], sizes = [8, 32], strides = [1, 1]} : vector<8x128xf32> to vector<8x32xf32>
    %119 = vector.extract_strided_slice %116 {offsets = [0, 64], sizes = [8, 32], strides = [1, 1]} : vector<8x128xf32> to vector<8x32xf32>
    %cst_40 = arith.constant 2.000000e+00 : f32
    %120 = vector.broadcast %cst_40 : f32 to vector<8x32xf32>
    %121 = arith.mulf %120, %119 : vector<8x32xf32>
    %cst_41 = arith.constant 1.000000e+00 : f32
    %122 = vector.broadcast %cst_41 : f32 to vector<8x32xf32>
    %123 = arith.subf %121, %122 : vector<8x32xf32>
    %124 = vector.extract_strided_slice %116 {offsets = [0, 96], sizes = [8, 32], strides = [1, 1]} : vector<8x128xf32> to vector<8x32xf32>
    %125 = arith.mulf %118, %111 : vector<8x32xf32>
    %126 = arith.mulf %117, %123 : vector<8x32xf32>
    %127 = arith.addf %125, %126 : vector<8x32xf32>
    %128 = math.tanh %127 : vector<8x32xf32>
    %129 = arith.mulf %124, %128 : vector<8x32xf32>
    %130 = arith.truncf %129 : vector<8x32xf32> to vector<8x32xbf16>
    %cst_42 = arith.constant dense<0.000000e+00> : vector<8x128xf32>
    %131 = tpu.matmul %130, %22, %cst_42 {dimension_numbers = #tpu.dot_dimension_numbers<[1], [0], [0], [1], [0, 0, 1, 1], [], []>} : vector<8x32xbf16>, vector<32x128xbf16>, vector<8x128xf32> -> vector<8x128xf32>
    %132 = vector.extract_strided_slice %107 {offsets = [0, 128], sizes = [8, 128], strides = [1, 1]} : vector<8x256xf32> to vector<8x128xf32>
    %133 = arith.addf %131, %132 : vector<8x128xf32>
    %134 = arith.addf %133, %15 : vector<8x128xf32>
    %135 = vector.extract_strided_slice %98 {offsets = [0, 32], sizes = [8, 32], strides = [1, 1]} : vector<8x64xf32> to vector<8x32xf32>
    %136 = arith.negf %134 : vector<8x128xf32>
    %137 = math.exp %136 : vector<8x128xf32>
    %cst_43 = arith.constant 1.000000e+00 : f32
    %138 = vector.broadcast %cst_43 : f32 to vector<8x128xf32>
    %139 = arith.addf %138, %137 : vector<8x128xf32>
    %140 = arith.divf %138, %139 : vector<8x128xf32>
    %141 = vector.extract_strided_slice %140 {offsets = [0, 0], sizes = [8, 32], strides = [1, 1]} : vector<8x128xf32> to vector<8x32xf32>
    %142 = vector.extract_strided_slice %140 {offsets = [0, 32], sizes = [8, 32], strides = [1, 1]} : vector<8x128xf32> to vector<8x32xf32>
    %143 = vector.extract_strided_slice %140 {offsets = [0, 64], sizes = [8, 32], strides = [1, 1]} : vector<8x128xf32> to vector<8x32xf32>
    %cst_44 = arith.constant 2.000000e+00 : f32
    %144 = vector.broadcast %cst_44 : f32 to vector<8x32xf32>
    %145 = arith.mulf %144, %143 : vector<8x32xf32>
    %cst_45 = arith.constant 1.000000e+00 : f32
    %146 = vector.broadcast %cst_45 : f32 to vector<8x32xf32>
    %147 = arith.subf %145, %146 : vector<8x32xf32>
    %148 = vector.extract_strided_slice %140 {offsets = [0, 96], sizes = [8, 32], strides = [1, 1]} : vector<8x128xf32> to vector<8x32xf32>
    %149 = arith.mulf %142, %135 : vector<8x32xf32>
    %150 = arith.mulf %141, %147 : vector<8x32xf32>
    %151 = arith.addf %149, %150 : vector<8x32xf32>
    %152 = math.tanh %151 : vector<8x32xf32>
    %153 = arith.mulf %148, %152 : vector<8x32xf32>
    %c1_i32_46 = arith.constant 1 : i32
    %154 = vector.broadcast %c1_i32_46 : i32 to vector<8x1xi32>
    %155 = arith.cmpi sgt, %26, %154 : vector<8x1xi32>
    %156 = tpu.concatenate %129, %153 in 1 : vector<8x32xf32>, vector<8x32xf32> -> vector<8x64xf32>
    %157 = vector.shape_cast %155 : vector<8x1xi1> to vector<8x1xi1>
    %158 = vector.broadcast %157 : vector<8x1xi1> to vector<8x64xi1>
    %159 = arith.select %158, %156, %94 : vector<8x64xi1>, vector<8x64xf32>
    %160 = tpu.concatenate %127, %151 in 1 : vector<8x32xf32>, vector<8x32xf32> -> vector<8x64xf32>
    %161 = vector.shape_cast %155 : vector<8x1xi1> to vector<8x1xi1>
    %162 = vector.broadcast %161 : vector<8x1xi1> to vector<8x64xi1>
    %163 = arith.select %162, %160, %98 : vector<8x64xi1>, vector<8x64xf32>
    %c1_i32_47 = arith.constant 1 : i32
    %164 = vector.broadcast %c1_i32_47 : i32 to vector<8x1xi32>
    %165 = arith.cmpi eq, %26, %164 : vector<8x1xi32>
    %166 = vector.extract_strided_slice %31 {offsets = [1, 0, 0], sizes = [1, 8, 128], strides = [1, 1, 1]} : vector<8x8x128xf32> to vector<1x8x128xf32>
    %167 = vector.shape_cast %166 : vector<1x8x128xf32> to vector<8x128xf32>
    %168 = vector.shape_cast %165 : vector<8x1xi1> to vector<8x1xi1>
    %169 = vector.broadcast %168 : vector<8x1xi1> to vector<8x128xi1>
    %170 = arith.select %169, %167, %105 : vector<8x128xi1>, vector<8x128xf32>
    %171 = arith.truncf %159 : vector<8x64xf32> to vector<8x64xbf16>
    %cst_48 = arith.constant dense<0.000000e+00> : vector<8x256xf32>
    %172 = tpu.matmul %171, %21, %cst_48 {dimension_numbers = #tpu.dot_dimension_numbers<[1], [0], [0], [1], [0, 0, 1, 1], [], []>} : vector<8x64xbf16>, vector<64x256xbf16>, vector<8x256xf32> -> vector<8x256xf32>
    %173 = vector.extract_strided_slice %37 {offsets = [16, 0], sizes = [8, 128], strides = [1, 1]} : vector<64x128xf32> to vector<8x128xf32>
    %174 = vector.extract_strided_slice %172 {offsets = [0, 0], sizes = [8, 128], strides = [1, 1]} : vector<8x256xf32> to vector<8x128xf32>
    %175 = arith.addf %173, %174 : vector<8x128xf32>
    %176 = vector.extract_strided_slice %163 {offsets = [0, 0], sizes = [8, 32], strides = [1, 1]} : vector<8x64xf32> to vector<8x32xf32>
    %177 = arith.negf %175 : vector<8x128xf32>
    %178 = math.exp %177 : vector<8x128xf32>
    %cst_49 = arith.constant 1.000000e+00 : f32
    %179 = vector.broadcast %cst_49 : f32 to vector<8x128xf32>
    %180 = arith.addf %179, %178 : vector<8x128xf32>
    %181 = arith.divf %179, %180 : vector<8x128xf32>
    %182 = vector.extract_strided_slice %181 {offsets = [0, 0], sizes = [8, 32], strides = [1, 1]} : vector<8x128xf32> to vector<8x32xf32>
    %183 = vector.extract_strided_slice %181 {offsets = [0, 32], sizes = [8, 32], strides = [1, 1]} : vector<8x128xf32> to vector<8x32xf32>
    %184 = vector.extract_strided_slice %181 {offsets = [0, 64], sizes = [8, 32], strides = [1, 1]} : vector<8x128xf32> to vector<8x32xf32>
    %cst_50 = arith.constant 2.000000e+00 : f32
    %185 = vector.broadcast %cst_50 : f32 to vector<8x32xf32>
    %186 = arith.mulf %185, %184 : vector<8x32xf32>
    %cst_51 = arith.constant 1.000000e+00 : f32
    %187 = vector.broadcast %cst_51 : f32 to vector<8x32xf32>
    %188 = arith.subf %186, %187 : vector<8x32xf32>
    %189 = vector.extract_strided_slice %181 {offsets = [0, 96], sizes = [8, 32], strides = [1, 1]} : vector<8x128xf32> to vector<8x32xf32>
    %190 = arith.mulf %183, %176 : vector<8x32xf32>
    %191 = arith.mulf %182, %188 : vector<8x32xf32>
    %192 = arith.addf %190, %191 : vector<8x32xf32>
    %193 = math.tanh %192 : vector<8x32xf32>
    %194 = arith.mulf %189, %193 : vector<8x32xf32>
    %195 = arith.truncf %194 : vector<8x32xf32> to vector<8x32xbf16>
    %cst_52 = arith.constant dense<0.000000e+00> : vector<8x128xf32>
    %196 = tpu.matmul %195, %22, %cst_52 {dimension_numbers = #tpu.dot_dimension_numbers<[1], [0], [0], [1], [0, 0, 1, 1], [], []>} : vector<8x32xbf16>, vector<32x128xbf16>, vector<8x128xf32> -> vector<8x128xf32>
    %197 = vector.extract_strided_slice %172 {offsets = [0, 128], sizes = [8, 128], strides = [1, 1]} : vector<8x256xf32> to vector<8x128xf32>
    %198 = arith.addf %196, %197 : vector<8x128xf32>
    %199 = arith.addf %198, %15 : vector<8x128xf32>
    %200 = vector.extract_strided_slice %163 {offsets = [0, 32], sizes = [8, 32], strides = [1, 1]} : vector<8x64xf32> to vector<8x32xf32>
    %201 = arith.negf %199 : vector<8x128xf32>
    %202 = math.exp %201 : vector<8x128xf32>
    %cst_53 = arith.constant 1.000000e+00 : f32
    %203 = vector.broadcast %cst_53 : f32 to vector<8x128xf32>
    %204 = arith.addf %203, %202 : vector<8x128xf32>
    %205 = arith.divf %203, %204 : vector<8x128xf32>
    %206 = vector.extract_strided_slice %205 {offsets = [0, 0], sizes = [8, 32], strides = [1, 1]} : vector<8x128xf32> to vector<8x32xf32>
    %207 = vector.extract_strided_slice %205 {offsets = [0, 32], sizes = [8, 32], strides = [1, 1]} : vector<8x128xf32> to vector<8x32xf32>
    %208 = vector.extract_strided_slice %205 {offsets = [0, 64], sizes = [8, 32], strides = [1, 1]} : vector<8x128xf32> to vector<8x32xf32>
    %cst_54 = arith.constant 2.000000e+00 : f32
    %209 = vector.broadcast %cst_54 : f32 to vector<8x32xf32>
    %210 = arith.mulf %209, %208 : vector<8x32xf32>
    %cst_55 = arith.constant 1.000000e+00 : f32
    %211 = vector.broadcast %cst_55 : f32 to vector<8x32xf32>
    %212 = arith.subf %210, %211 : vector<8x32xf32>
    %213 = vector.extract_strided_slice %205 {offsets = [0, 96], sizes = [8, 32], strides = [1, 1]} : vector<8x128xf32> to vector<8x32xf32>
    %214 = arith.mulf %207, %200 : vector<8x32xf32>
    %215 = arith.mulf %206, %212 : vector<8x32xf32>
    %216 = arith.addf %214, %215 : vector<8x32xf32>
    %217 = math.tanh %216 : vector<8x32xf32>
    %218 = arith.mulf %213, %217 : vector<8x32xf32>
    %c2_i32 = arith.constant 2 : i32
    %219 = vector.broadcast %c2_i32 : i32 to vector<8x1xi32>
    %220 = arith.cmpi sgt, %26, %219 : vector<8x1xi32>
    %221 = tpu.concatenate %194, %218 in 1 : vector<8x32xf32>, vector<8x32xf32> -> vector<8x64xf32>
    %222 = vector.shape_cast %220 : vector<8x1xi1> to vector<8x1xi1>
    %223 = vector.broadcast %222 : vector<8x1xi1> to vector<8x64xi1>
    %224 = arith.select %223, %221, %159 : vector<8x64xi1>, vector<8x64xf32>
    %225 = tpu.concatenate %192, %216 in 1 : vector<8x32xf32>, vector<8x32xf32> -> vector<8x64xf32>
    %226 = vector.shape_cast %220 : vector<8x1xi1> to vector<8x1xi1>
    %227 = vector.broadcast %226 : vector<8x1xi1> to vector<8x64xi1>
    %228 = arith.select %227, %225, %163 : vector<8x64xi1>, vector<8x64xf32>
    %c2_i32_56 = arith.constant 2 : i32
    %229 = vector.broadcast %c2_i32_56 : i32 to vector<8x1xi32>
    %230 = arith.cmpi eq, %26, %229 : vector<8x1xi32>
    %231 = vector.extract_strided_slice %31 {offsets = [2, 0, 0], sizes = [1, 8, 128], strides = [1, 1, 1]} : vector<8x8x128xf32> to vector<1x8x128xf32>
    %232 = vector.shape_cast %231 : vector<1x8x128xf32> to vector<8x128xf32>
    %233 = vector.shape_cast %230 : vector<8x1xi1> to vector<8x1xi1>
    %234 = vector.broadcast %233 : vector<8x1xi1> to vector<8x128xi1>
    %235 = arith.select %234, %232, %170 : vector<8x128xi1>, vector<8x128xf32>
    %236 = arith.truncf %224 : vector<8x64xf32> to vector<8x64xbf16>
    %cst_57 = arith.constant dense<0.000000e+00> : vector<8x256xf32>
    %237 = tpu.matmul %236, %21, %cst_57 {dimension_numbers = #tpu.dot_dimension_numbers<[1], [0], [0], [1], [0, 0, 1, 1], [], []>} : vector<8x64xbf16>, vector<64x256xbf16>, vector<8x256xf32> -> vector<8x256xf32>
    %238 = vector.extract_strided_slice %37 {offsets = [24, 0], sizes = [8, 128], strides = [1, 1]} : vector<64x128xf32> to vector<8x128xf32>
    %239 = vector.extract_strided_slice %237 {offsets = [0, 0], sizes = [8, 128], strides = [1, 1]} : vector<8x256xf32> to vector<8x128xf32>
    %240 = arith.addf %238, %239 : vector<8x128xf32>
    %241 = vector.extract_strided_slice %228 {offsets = [0, 0], sizes = [8, 32], strides = [1, 1]} : vector<8x64xf32> to vector<8x32xf32>
    %242 = arith.negf %240 : vector<8x128xf32>
    %243 = math.exp %242 : vector<8x128xf32>
    %cst_58 = arith.constant 1.000000e+00 : f32
    %244 = vector.broadcast %cst_58 : f32 to vector<8x128xf32>
    %245 = arith.addf %244, %243 : vector<8x128xf32>
    %246 = arith.divf %244, %245 : vector<8x128xf32>
    %247 = vector.extract_strided_slice %246 {offsets = [0, 0], sizes = [8, 32], strides = [1, 1]} : vector<8x128xf32> to vector<8x32xf32>
    %248 = vector.extract_strided_slice %246 {offsets = [0, 32], sizes = [8, 32], strides = [1, 1]} : vector<8x128xf32> to vector<8x32xf32>
    %249 = vector.extract_strided_slice %246 {offsets = [0, 64], sizes = [8, 32], strides = [1, 1]} : vector<8x128xf32> to vector<8x32xf32>
    %cst_59 = arith.constant 2.000000e+00 : f32
    %250 = vector.broadcast %cst_59 : f32 to vector<8x32xf32>
    %251 = arith.mulf %250, %249 : vector<8x32xf32>
    %cst_60 = arith.constant 1.000000e+00 : f32
    %252 = vector.broadcast %cst_60 : f32 to vector<8x32xf32>
    %253 = arith.subf %251, %252 : vector<8x32xf32>
    %254 = vector.extract_strided_slice %246 {offsets = [0, 96], sizes = [8, 32], strides = [1, 1]} : vector<8x128xf32> to vector<8x32xf32>
    %255 = arith.mulf %248, %241 : vector<8x32xf32>
    %256 = arith.mulf %247, %253 : vector<8x32xf32>
    %257 = arith.addf %255, %256 : vector<8x32xf32>
    %258 = math.tanh %257 : vector<8x32xf32>
    %259 = arith.mulf %254, %258 : vector<8x32xf32>
    %260 = arith.truncf %259 : vector<8x32xf32> to vector<8x32xbf16>
    %cst_61 = arith.constant dense<0.000000e+00> : vector<8x128xf32>
    %261 = tpu.matmul %260, %22, %cst_61 {dimension_numbers = #tpu.dot_dimension_numbers<[1], [0], [0], [1], [0, 0, 1, 1], [], []>} : vector<8x32xbf16>, vector<32x128xbf16>, vector<8x128xf32> -> vector<8x128xf32>
    %262 = vector.extract_strided_slice %237 {offsets = [0, 128], sizes = [8, 128], strides = [1, 1]} : vector<8x256xf32> to vector<8x128xf32>
    %263 = arith.addf %261, %262 : vector<8x128xf32>
    %264 = arith.addf %263, %15 : vector<8x128xf32>
    %265 = vector.extract_strided_slice %228 {offsets = [0, 32], sizes = [8, 32], strides = [1, 1]} : vector<8x64xf32> to vector<8x32xf32>
    %266 = arith.negf %264 : vector<8x128xf32>
    %267 = math.exp %266 : vector<8x128xf32>
    %cst_62 = arith.constant 1.000000e+00 : f32
    %268 = vector.broadcast %cst_62 : f32 to vector<8x128xf32>
    %269 = arith.addf %268, %267 : vector<8x128xf32>
    %270 = arith.divf %268, %269 : vector<8x128xf32>
    %271 = vector.extract_strided_slice %270 {offsets = [0, 0], sizes = [8, 32], strides = [1, 1]} : vector<8x128xf32> to vector<8x32xf32>
    %272 = vector.extract_strided_slice %270 {offsets = [0, 32], sizes = [8, 32], strides = [1, 1]} : vector<8x128xf32> to vector<8x32xf32>
    %273 = vector.extract_strided_slice %270 {offsets = [0, 64], sizes = [8, 32], strides = [1, 1]} : vector<8x128xf32> to vector<8x32xf32>
    %cst_63 = arith.constant 2.000000e+00 : f32
    %274 = vector.broadcast %cst_63 : f32 to vector<8x32xf32>
    %275 = arith.mulf %274, %273 : vector<8x32xf32>
    %cst_64 = arith.constant 1.000000e+00 : f32
    %276 = vector.broadcast %cst_64 : f32 to vector<8x32xf32>
    %277 = arith.subf %275, %276 : vector<8x32xf32>
    %278 = vector.extract_strided_slice %270 {offsets = [0, 96], sizes = [8, 32], strides = [1, 1]} : vector<8x128xf32> to vector<8x32xf32>
    %279 = arith.mulf %272, %265 : vector<8x32xf32>
    %280 = arith.mulf %271, %277 : vector<8x32xf32>
    %281 = arith.addf %279, %280 : vector<8x32xf32>
    %282 = math.tanh %281 : vector<8x32xf32>
    %283 = arith.mulf %278, %282 : vector<8x32xf32>
    %c3_i32 = arith.constant 3 : i32
    %284 = vector.broadcast %c3_i32 : i32 to vector<8x1xi32>
    %285 = arith.cmpi sgt, %26, %284 : vector<8x1xi32>
    %286 = tpu.concatenate %259, %283 in 1 : vector<8x32xf32>, vector<8x32xf32> -> vector<8x64xf32>
    %287 = vector.shape_cast %285 : vector<8x1xi1> to vector<8x1xi1>
    %288 = vector.broadcast %287 : vector<8x1xi1> to vector<8x64xi1>
    %289 = arith.select %288, %286, %224 : vector<8x64xi1>, vector<8x64xf32>
    %290 = tpu.concatenate %257, %281 in 1 : vector<8x32xf32>, vector<8x32xf32> -> vector<8x64xf32>
    %291 = vector.shape_cast %285 : vector<8x1xi1> to vector<8x1xi1>
    %292 = vector.broadcast %291 : vector<8x1xi1> to vector<8x64xi1>
    %293 = arith.select %292, %290, %228 : vector<8x64xi1>, vector<8x64xf32>
    %c3_i32_65 = arith.constant 3 : i32
    %294 = vector.broadcast %c3_i32_65 : i32 to vector<8x1xi32>
    %295 = arith.cmpi eq, %26, %294 : vector<8x1xi32>
    %296 = vector.extract_strided_slice %31 {offsets = [3, 0, 0], sizes = [1, 8, 128], strides = [1, 1, 1]} : vector<8x8x128xf32> to vector<1x8x128xf32>
    %297 = vector.shape_cast %296 : vector<1x8x128xf32> to vector<8x128xf32>
    %298 = vector.shape_cast %295 : vector<8x1xi1> to vector<8x1xi1>
    %299 = vector.broadcast %298 : vector<8x1xi1> to vector<8x128xi1>
    %300 = arith.select %299, %297, %235 : vector<8x128xi1>, vector<8x128xf32>
    %301 = arith.truncf %289 : vector<8x64xf32> to vector<8x64xbf16>
    %cst_66 = arith.constant dense<0.000000e+00> : vector<8x256xf32>
    %302 = tpu.matmul %301, %21, %cst_66 {dimension_numbers = #tpu.dot_dimension_numbers<[1], [0], [0], [1], [0, 0, 1, 1], [], []>} : vector<8x64xbf16>, vector<64x256xbf16>, vector<8x256xf32> -> vector<8x256xf32>
    %303 = vector.extract_strided_slice %37 {offsets = [32, 0], sizes = [8, 128], strides = [1, 1]} : vector<64x128xf32> to vector<8x128xf32>
    %304 = vector.extract_strided_slice %302 {offsets = [0, 0], sizes = [8, 128], strides = [1, 1]} : vector<8x256xf32> to vector<8x128xf32>
    %305 = arith.addf %303, %304 : vector<8x128xf32>
    %306 = vector.extract_strided_slice %293 {offsets = [0, 0], sizes = [8, 32], strides = [1, 1]} : vector<8x64xf32> to vector<8x32xf32>
    %307 = arith.negf %305 : vector<8x128xf32>
    %308 = math.exp %307 : vector<8x128xf32>
    %cst_67 = arith.constant 1.000000e+00 : f32
    %309 = vector.broadcast %cst_67 : f32 to vector<8x128xf32>
    %310 = arith.addf %309, %308 : vector<8x128xf32>
    %311 = arith.divf %309, %310 : vector<8x128xf32>
    %312 = vector.extract_strided_slice %311 {offsets = [0, 0], sizes = [8, 32], strides = [1, 1]} : vector<8x128xf32> to vector<8x32xf32>
    %313 = vector.extract_strided_slice %311 {offsets = [0, 32], sizes = [8, 32], strides = [1, 1]} : vector<8x128xf32> to vector<8x32xf32>
    %314 = vector.extract_strided_slice %311 {offsets = [0, 64], sizes = [8, 32], strides = [1, 1]} : vector<8x128xf32> to vector<8x32xf32>
    %cst_68 = arith.constant 2.000000e+00 : f32
    %315 = vector.broadcast %cst_68 : f32 to vector<8x32xf32>
    %316 = arith.mulf %315, %314 : vector<8x32xf32>
    %cst_69 = arith.constant 1.000000e+00 : f32
    %317 = vector.broadcast %cst_69 : f32 to vector<8x32xf32>
    %318 = arith.subf %316, %317 : vector<8x32xf32>
    %319 = vector.extract_strided_slice %311 {offsets = [0, 96], sizes = [8, 32], strides = [1, 1]} : vector<8x128xf32> to vector<8x32xf32>
    %320 = arith.mulf %313, %306 : vector<8x32xf32>
    %321 = arith.mulf %312, %318 : vector<8x32xf32>
    %322 = arith.addf %320, %321 : vector<8x32xf32>
    %323 = math.tanh %322 : vector<8x32xf32>
    %324 = arith.mulf %319, %323 : vector<8x32xf32>
    %325 = arith.truncf %324 : vector<8x32xf32> to vector<8x32xbf16>
    %cst_70 = arith.constant dense<0.000000e+00> : vector<8x128xf32>
    %326 = tpu.matmul %325, %22, %cst_70 {dimension_numbers = #tpu.dot_dimension_numbers<[1], [0], [0], [1], [0, 0, 1, 1], [], []>} : vector<8x32xbf16>, vector<32x128xbf16>, vector<8x128xf32> -> vector<8x128xf32>
    %327 = vector.extract_strided_slice %302 {offsets = [0, 128], sizes = [8, 128], strides = [1, 1]} : vector<8x256xf32> to vector<8x128xf32>
    %328 = arith.addf %326, %327 : vector<8x128xf32>
    %329 = arith.addf %328, %15 : vector<8x128xf32>
    %330 = vector.extract_strided_slice %293 {offsets = [0, 32], sizes = [8, 32], strides = [1, 1]} : vector<8x64xf32> to vector<8x32xf32>
    %331 = arith.negf %329 : vector<8x128xf32>
    %332 = math.exp %331 : vector<8x128xf32>
    %cst_71 = arith.constant 1.000000e+00 : f32
    %333 = vector.broadcast %cst_71 : f32 to vector<8x128xf32>
    %334 = arith.addf %333, %332 : vector<8x128xf32>
    %335 = arith.divf %333, %334 : vector<8x128xf32>
    %336 = vector.extract_strided_slice %335 {offsets = [0, 0], sizes = [8, 32], strides = [1, 1]} : vector<8x128xf32> to vector<8x32xf32>
    %337 = vector.extract_strided_slice %335 {offsets = [0, 32], sizes = [8, 32], strides = [1, 1]} : vector<8x128xf32> to vector<8x32xf32>
    %338 = vector.extract_strided_slice %335 {offsets = [0, 64], sizes = [8, 32], strides = [1, 1]} : vector<8x128xf32> to vector<8x32xf32>
    %cst_72 = arith.constant 2.000000e+00 : f32
    %339 = vector.broadcast %cst_72 : f32 to vector<8x32xf32>
    %340 = arith.mulf %339, %338 : vector<8x32xf32>
    %cst_73 = arith.constant 1.000000e+00 : f32
    %341 = vector.broadcast %cst_73 : f32 to vector<8x32xf32>
    %342 = arith.subf %340, %341 : vector<8x32xf32>
    %343 = vector.extract_strided_slice %335 {offsets = [0, 96], sizes = [8, 32], strides = [1, 1]} : vector<8x128xf32> to vector<8x32xf32>
    %344 = arith.mulf %337, %330 : vector<8x32xf32>
    %345 = arith.mulf %336, %342 : vector<8x32xf32>
    %346 = arith.addf %344, %345 : vector<8x32xf32>
    %347 = math.tanh %346 : vector<8x32xf32>
    %348 = arith.mulf %343, %347 : vector<8x32xf32>
    %c4_i32 = arith.constant 4 : i32
    %349 = vector.broadcast %c4_i32 : i32 to vector<8x1xi32>
    %350 = arith.cmpi sgt, %26, %349 : vector<8x1xi32>
    %351 = tpu.concatenate %324, %348 in 1 : vector<8x32xf32>, vector<8x32xf32> -> vector<8x64xf32>
    %352 = vector.shape_cast %350 : vector<8x1xi1> to vector<8x1xi1>
    %353 = vector.broadcast %352 : vector<8x1xi1> to vector<8x64xi1>
    %354 = arith.select %353, %351, %289 : vector<8x64xi1>, vector<8x64xf32>
    %355 = tpu.concatenate %322, %346 in 1 : vector<8x32xf32>, vector<8x32xf32> -> vector<8x64xf32>
    %356 = vector.shape_cast %350 : vector<8x1xi1> to vector<8x1xi1>
    %357 = vector.broadcast %356 : vector<8x1xi1> to vector<8x64xi1>
    %358 = arith.select %357, %355, %293 : vector<8x64xi1>, vector<8x64xf32>
    %c4_i32_74 = arith.constant 4 : i32
    %359 = vector.broadcast %c4_i32_74 : i32 to vector<8x1xi32>
    %360 = arith.cmpi eq, %26, %359 : vector<8x1xi32>
    %361 = vector.extract_strided_slice %31 {offsets = [4, 0, 0], sizes = [1, 8, 128], strides = [1, 1, 1]} : vector<8x8x128xf32> to vector<1x8x128xf32>
    %362 = vector.shape_cast %361 : vector<1x8x128xf32> to vector<8x128xf32>
    %363 = vector.shape_cast %360 : vector<8x1xi1> to vector<8x1xi1>
    %364 = vector.broadcast %363 : vector<8x1xi1> to vector<8x128xi1>
    %365 = arith.select %364, %362, %300 : vector<8x128xi1>, vector<8x128xf32>
    %366 = arith.truncf %354 : vector<8x64xf32> to vector<8x64xbf16>
    %cst_75 = arith.constant dense<0.000000e+00> : vector<8x256xf32>
    %367 = tpu.matmul %366, %21, %cst_75 {dimension_numbers = #tpu.dot_dimension_numbers<[1], [0], [0], [1], [0, 0, 1, 1], [], []>} : vector<8x64xbf16>, vector<64x256xbf16>, vector<8x256xf32> -> vector<8x256xf32>
    %368 = vector.extract_strided_slice %37 {offsets = [40, 0], sizes = [8, 128], strides = [1, 1]} : vector<64x128xf32> to vector<8x128xf32>
    %369 = vector.extract_strided_slice %367 {offsets = [0, 0], sizes = [8, 128], strides = [1, 1]} : vector<8x256xf32> to vector<8x128xf32>
    %370 = arith.addf %368, %369 : vector<8x128xf32>
    %371 = vector.extract_strided_slice %358 {offsets = [0, 0], sizes = [8, 32], strides = [1, 1]} : vector<8x64xf32> to vector<8x32xf32>
    %372 = arith.negf %370 : vector<8x128xf32>
    %373 = math.exp %372 : vector<8x128xf32>
    %cst_76 = arith.constant 1.000000e+00 : f32
    %374 = vector.broadcast %cst_76 : f32 to vector<8x128xf32>
    %375 = arith.addf %374, %373 : vector<8x128xf32>
    %376 = arith.divf %374, %375 : vector<8x128xf32>
    %377 = vector.extract_strided_slice %376 {offsets = [0, 0], sizes = [8, 32], strides = [1, 1]} : vector<8x128xf32> to vector<8x32xf32>
    %378 = vector.extract_strided_slice %376 {offsets = [0, 32], sizes = [8, 32], strides = [1, 1]} : vector<8x128xf32> to vector<8x32xf32>
    %379 = vector.extract_strided_slice %376 {offsets = [0, 64], sizes = [8, 32], strides = [1, 1]} : vector<8x128xf32> to vector<8x32xf32>
    %cst_77 = arith.constant 2.000000e+00 : f32
    %380 = vector.broadcast %cst_77 : f32 to vector<8x32xf32>
    %381 = arith.mulf %380, %379 : vector<8x32xf32>
    %cst_78 = arith.constant 1.000000e+00 : f32
    %382 = vector.broadcast %cst_78 : f32 to vector<8x32xf32>
    %383 = arith.subf %381, %382 : vector<8x32xf32>
    %384 = vector.extract_strided_slice %376 {offsets = [0, 96], sizes = [8, 32], strides = [1, 1]} : vector<8x128xf32> to vector<8x32xf32>
    %385 = arith.mulf %378, %371 : vector<8x32xf32>
    %386 = arith.mulf %377, %383 : vector<8x32xf32>
    %387 = arith.addf %385, %386 : vector<8x32xf32>
    %388 = math.tanh %387 : vector<8x32xf32>
    %389 = arith.mulf %384, %388 : vector<8x32xf32>
    %390 = arith.truncf %389 : vector<8x32xf32> to vector<8x32xbf16>
    %cst_79 = arith.constant dense<0.000000e+00> : vector<8x128xf32>
    %391 = tpu.matmul %390, %22, %cst_79 {dimension_numbers = #tpu.dot_dimension_numbers<[1], [0], [0], [1], [0, 0, 1, 1], [], []>} : vector<8x32xbf16>, vector<32x128xbf16>, vector<8x128xf32> -> vector<8x128xf32>
    %392 = vector.extract_strided_slice %367 {offsets = [0, 128], sizes = [8, 128], strides = [1, 1]} : vector<8x256xf32> to vector<8x128xf32>
    %393 = arith.addf %391, %392 : vector<8x128xf32>
    %394 = arith.addf %393, %15 : vector<8x128xf32>
    %395 = vector.extract_strided_slice %358 {offsets = [0, 32], sizes = [8, 32], strides = [1, 1]} : vector<8x64xf32> to vector<8x32xf32>
    %396 = arith.negf %394 : vector<8x128xf32>
    %397 = math.exp %396 : vector<8x128xf32>
    %cst_80 = arith.constant 1.000000e+00 : f32
    %398 = vector.broadcast %cst_80 : f32 to vector<8x128xf32>
    %399 = arith.addf %398, %397 : vector<8x128xf32>
    %400 = arith.divf %398, %399 : vector<8x128xf32>
    %401 = vector.extract_strided_slice %400 {offsets = [0, 0], sizes = [8, 32], strides = [1, 1]} : vector<8x128xf32> to vector<8x32xf32>
    %402 = vector.extract_strided_slice %400 {offsets = [0, 32], sizes = [8, 32], strides = [1, 1]} : vector<8x128xf32> to vector<8x32xf32>
    %403 = vector.extract_strided_slice %400 {offsets = [0, 64], sizes = [8, 32], strides = [1, 1]} : vector<8x128xf32> to vector<8x32xf32>
    %cst_81 = arith.constant 2.000000e+00 : f32
    %404 = vector.broadcast %cst_81 : f32 to vector<8x32xf32>
    %405 = arith.mulf %404, %403 : vector<8x32xf32>
    %cst_82 = arith.constant 1.000000e+00 : f32
    %406 = vector.broadcast %cst_82 : f32 to vector<8x32xf32>
    %407 = arith.subf %405, %406 : vector<8x32xf32>
    %408 = vector.extract_strided_slice %400 {offsets = [0, 96], sizes = [8, 32], strides = [1, 1]} : vector<8x128xf32> to vector<8x32xf32>
    %409 = arith.mulf %402, %395 : vector<8x32xf32>
    %410 = arith.mulf %401, %407 : vector<8x32xf32>
    %411 = arith.addf %409, %410 : vector<8x32xf32>
    %412 = math.tanh %411 : vector<8x32xf32>
    %413 = arith.mulf %408, %412 : vector<8x32xf32>
    %c5_i32 = arith.constant 5 : i32
    %414 = vector.broadcast %c5_i32 : i32 to vector<8x1xi32>
    %415 = arith.cmpi sgt, %26, %414 : vector<8x1xi32>
    %416 = tpu.concatenate %389, %413 in 1 : vector<8x32xf32>, vector<8x32xf32> -> vector<8x64xf32>
    %417 = vector.shape_cast %415 : vector<8x1xi1> to vector<8x1xi1>
    %418 = vector.broadcast %417 : vector<8x1xi1> to vector<8x64xi1>
    %419 = arith.select %418, %416, %354 : vector<8x64xi1>, vector<8x64xf32>
    %420 = tpu.concatenate %387, %411 in 1 : vector<8x32xf32>, vector<8x32xf32> -> vector<8x64xf32>
    %421 = vector.shape_cast %415 : vector<8x1xi1> to vector<8x1xi1>
    %422 = vector.broadcast %421 : vector<8x1xi1> to vector<8x64xi1>
    %423 = arith.select %422, %420, %358 : vector<8x64xi1>, vector<8x64xf32>
    %c5_i32_83 = arith.constant 5 : i32
    %424 = vector.broadcast %c5_i32_83 : i32 to vector<8x1xi32>
    %425 = arith.cmpi eq, %26, %424 : vector<8x1xi32>
    %426 = vector.extract_strided_slice %31 {offsets = [5, 0, 0], sizes = [1, 8, 128], strides = [1, 1, 1]} : vector<8x8x128xf32> to vector<1x8x128xf32>
    %427 = vector.shape_cast %426 : vector<1x8x128xf32> to vector<8x128xf32>
    %428 = vector.shape_cast %425 : vector<8x1xi1> to vector<8x1xi1>
    %429 = vector.broadcast %428 : vector<8x1xi1> to vector<8x128xi1>
    %430 = arith.select %429, %427, %365 : vector<8x128xi1>, vector<8x128xf32>
    %431 = arith.truncf %419 : vector<8x64xf32> to vector<8x64xbf16>
    %cst_84 = arith.constant dense<0.000000e+00> : vector<8x256xf32>
    %432 = tpu.matmul %431, %21, %cst_84 {dimension_numbers = #tpu.dot_dimension_numbers<[1], [0], [0], [1], [0, 0, 1, 1], [], []>} : vector<8x64xbf16>, vector<64x256xbf16>, vector<8x256xf32> -> vector<8x256xf32>
    %433 = vector.extract_strided_slice %37 {offsets = [48, 0], sizes = [8, 128], strides = [1, 1]} : vector<64x128xf32> to vector<8x128xf32>
    %434 = vector.extract_strided_slice %432 {offsets = [0, 0], sizes = [8, 128], strides = [1, 1]} : vector<8x256xf32> to vector<8x128xf32>
    %435 = arith.addf %433, %434 : vector<8x128xf32>
    %436 = vector.extract_strided_slice %423 {offsets = [0, 0], sizes = [8, 32], strides = [1, 1]} : vector<8x64xf32> to vector<8x32xf32>
    %437 = arith.negf %435 : vector<8x128xf32>
    %438 = math.exp %437 : vector<8x128xf32>
    %cst_85 = arith.constant 1.000000e+00 : f32
    %439 = vector.broadcast %cst_85 : f32 to vector<8x128xf32>
    %440 = arith.addf %439, %438 : vector<8x128xf32>
    %441 = arith.divf %439, %440 : vector<8x128xf32>
    %442 = vector.extract_strided_slice %441 {offsets = [0, 0], sizes = [8, 32], strides = [1, 1]} : vector<8x128xf32> to vector<8x32xf32>
    %443 = vector.extract_strided_slice %441 {offsets = [0, 32], sizes = [8, 32], strides = [1, 1]} : vector<8x128xf32> to vector<8x32xf32>
    %444 = vector.extract_strided_slice %441 {offsets = [0, 64], sizes = [8, 32], strides = [1, 1]} : vector<8x128xf32> to vector<8x32xf32>
    %cst_86 = arith.constant 2.000000e+00 : f32
    %445 = vector.broadcast %cst_86 : f32 to vector<8x32xf32>
    %446 = arith.mulf %445, %444 : vector<8x32xf32>
    %cst_87 = arith.constant 1.000000e+00 : f32
    %447 = vector.broadcast %cst_87 : f32 to vector<8x32xf32>
    %448 = arith.subf %446, %447 : vector<8x32xf32>
    %449 = vector.extract_strided_slice %441 {offsets = [0, 96], sizes = [8, 32], strides = [1, 1]} : vector<8x128xf32> to vector<8x32xf32>
    %450 = arith.mulf %443, %436 : vector<8x32xf32>
    %451 = arith.mulf %442, %448 : vector<8x32xf32>
    %452 = arith.addf %450, %451 : vector<8x32xf32>
    %453 = math.tanh %452 : vector<8x32xf32>
    %454 = arith.mulf %449, %453 : vector<8x32xf32>
    %455 = arith.truncf %454 : vector<8x32xf32> to vector<8x32xbf16>
    %cst_88 = arith.constant dense<0.000000e+00> : vector<8x128xf32>
    %456 = tpu.matmul %455, %22, %cst_88 {dimension_numbers = #tpu.dot_dimension_numbers<[1], [0], [0], [1], [0, 0, 1, 1], [], []>} : vector<8x32xbf16>, vector<32x128xbf16>, vector<8x128xf32> -> vector<8x128xf32>
    %457 = vector.extract_strided_slice %432 {offsets = [0, 128], sizes = [8, 128], strides = [1, 1]} : vector<8x256xf32> to vector<8x128xf32>
    %458 = arith.addf %456, %457 : vector<8x128xf32>
    %459 = arith.addf %458, %15 : vector<8x128xf32>
    %460 = vector.extract_strided_slice %423 {offsets = [0, 32], sizes = [8, 32], strides = [1, 1]} : vector<8x64xf32> to vector<8x32xf32>
    %461 = arith.negf %459 : vector<8x128xf32>
    %462 = math.exp %461 : vector<8x128xf32>
    %cst_89 = arith.constant 1.000000e+00 : f32
    %463 = vector.broadcast %cst_89 : f32 to vector<8x128xf32>
    %464 = arith.addf %463, %462 : vector<8x128xf32>
    %465 = arith.divf %463, %464 : vector<8x128xf32>
    %466 = vector.extract_strided_slice %465 {offsets = [0, 0], sizes = [8, 32], strides = [1, 1]} : vector<8x128xf32> to vector<8x32xf32>
    %467 = vector.extract_strided_slice %465 {offsets = [0, 32], sizes = [8, 32], strides = [1, 1]} : vector<8x128xf32> to vector<8x32xf32>
    %468 = vector.extract_strided_slice %465 {offsets = [0, 64], sizes = [8, 32], strides = [1, 1]} : vector<8x128xf32> to vector<8x32xf32>
    %cst_90 = arith.constant 2.000000e+00 : f32
    %469 = vector.broadcast %cst_90 : f32 to vector<8x32xf32>
    %470 = arith.mulf %469, %468 : vector<8x32xf32>
    %cst_91 = arith.constant 1.000000e+00 : f32
    %471 = vector.broadcast %cst_91 : f32 to vector<8x32xf32>
    %472 = arith.subf %470, %471 : vector<8x32xf32>
    %473 = vector.extract_strided_slice %465 {offsets = [0, 96], sizes = [8, 32], strides = [1, 1]} : vector<8x128xf32> to vector<8x32xf32>
    %474 = arith.mulf %467, %460 : vector<8x32xf32>
    %475 = arith.mulf %466, %472 : vector<8x32xf32>
    %476 = arith.addf %474, %475 : vector<8x32xf32>
    %477 = math.tanh %476 : vector<8x32xf32>
    %478 = arith.mulf %473, %477 : vector<8x32xf32>
    %c6_i32 = arith.constant 6 : i32
    %479 = vector.broadcast %c6_i32 : i32 to vector<8x1xi32>
    %480 = arith.cmpi sgt, %26, %479 : vector<8x1xi32>
    %481 = tpu.concatenate %454, %478 in 1 : vector<8x32xf32>, vector<8x32xf32> -> vector<8x64xf32>
    %482 = vector.shape_cast %480 : vector<8x1xi1> to vector<8x1xi1>
    %483 = vector.broadcast %482 : vector<8x1xi1> to vector<8x64xi1>
    %484 = arith.select %483, %481, %419 : vector<8x64xi1>, vector<8x64xf32>
    %485 = tpu.concatenate %452, %476 in 1 : vector<8x32xf32>, vector<8x32xf32> -> vector<8x64xf32>
    %486 = vector.shape_cast %480 : vector<8x1xi1> to vector<8x1xi1>
    %487 = vector.broadcast %486 : vector<8x1xi1> to vector<8x64xi1>
    %488 = arith.select %487, %485, %423 : vector<8x64xi1>, vector<8x64xf32>
    %c6_i32_92 = arith.constant 6 : i32
    %489 = vector.broadcast %c6_i32_92 : i32 to vector<8x1xi32>
    %490 = arith.cmpi eq, %26, %489 : vector<8x1xi32>
    %491 = vector.extract_strided_slice %31 {offsets = [6, 0, 0], sizes = [1, 8, 128], strides = [1, 1, 1]} : vector<8x8x128xf32> to vector<1x8x128xf32>
    %492 = vector.shape_cast %491 : vector<1x8x128xf32> to vector<8x128xf32>
    %493 = vector.shape_cast %490 : vector<8x1xi1> to vector<8x1xi1>
    %494 = vector.broadcast %493 : vector<8x1xi1> to vector<8x128xi1>
    %495 = arith.select %494, %492, %430 : vector<8x128xi1>, vector<8x128xf32>
    %496 = arith.truncf %484 : vector<8x64xf32> to vector<8x64xbf16>
    %cst_93 = arith.constant dense<0.000000e+00> : vector<8x256xf32>
    %497 = tpu.matmul %496, %21, %cst_93 {dimension_numbers = #tpu.dot_dimension_numbers<[1], [0], [0], [1], [0, 0, 1, 1], [], []>} : vector<8x64xbf16>, vector<64x256xbf16>, vector<8x256xf32> -> vector<8x256xf32>
    %498 = vector.extract_strided_slice %37 {offsets = [56, 0], sizes = [8, 128], strides = [1, 1]} : vector<64x128xf32> to vector<8x128xf32>
    %499 = vector.extract_strided_slice %497 {offsets = [0, 0], sizes = [8, 128], strides = [1, 1]} : vector<8x256xf32> to vector<8x128xf32>
    %500 = arith.addf %498, %499 : vector<8x128xf32>
    %501 = vector.extract_strided_slice %488 {offsets = [0, 0], sizes = [8, 32], strides = [1, 1]} : vector<8x64xf32> to vector<8x32xf32>
    %502 = arith.negf %500 : vector<8x128xf32>
    %503 = math.exp %502 : vector<8x128xf32>
    %cst_94 = arith.constant 1.000000e+00 : f32
    %504 = vector.broadcast %cst_94 : f32 to vector<8x128xf32>
    %505 = arith.addf %504, %503 : vector<8x128xf32>
    %506 = arith.divf %504, %505 : vector<8x128xf32>
    %507 = vector.extract_strided_slice %506 {offsets = [0, 0], sizes = [8, 32], strides = [1, 1]} : vector<8x128xf32> to vector<8x32xf32>
    %508 = vector.extract_strided_slice %506 {offsets = [0, 32], sizes = [8, 32], strides = [1, 1]} : vector<8x128xf32> to vector<8x32xf32>
    %509 = vector.extract_strided_slice %506 {offsets = [0, 64], sizes = [8, 32], strides = [1, 1]} : vector<8x128xf32> to vector<8x32xf32>
    %cst_95 = arith.constant 2.000000e+00 : f32
    %510 = vector.broadcast %cst_95 : f32 to vector<8x32xf32>
    %511 = arith.mulf %510, %509 : vector<8x32xf32>
    %cst_96 = arith.constant 1.000000e+00 : f32
    %512 = vector.broadcast %cst_96 : f32 to vector<8x32xf32>
    %513 = arith.subf %511, %512 : vector<8x32xf32>
    %514 = vector.extract_strided_slice %506 {offsets = [0, 96], sizes = [8, 32], strides = [1, 1]} : vector<8x128xf32> to vector<8x32xf32>
    %515 = arith.mulf %508, %501 : vector<8x32xf32>
    %516 = arith.mulf %507, %513 : vector<8x32xf32>
    %517 = arith.addf %515, %516 : vector<8x32xf32>
    %518 = math.tanh %517 : vector<8x32xf32>
    %519 = arith.mulf %514, %518 : vector<8x32xf32>
    %520 = arith.truncf %519 : vector<8x32xf32> to vector<8x32xbf16>
    %cst_97 = arith.constant dense<0.000000e+00> : vector<8x128xf32>
    %521 = tpu.matmul %520, %22, %cst_97 {dimension_numbers = #tpu.dot_dimension_numbers<[1], [0], [0], [1], [0, 0, 1, 1], [], []>} : vector<8x32xbf16>, vector<32x128xbf16>, vector<8x128xf32> -> vector<8x128xf32>
    %522 = vector.extract_strided_slice %497 {offsets = [0, 128], sizes = [8, 128], strides = [1, 1]} : vector<8x256xf32> to vector<8x128xf32>
    %523 = arith.addf %521, %522 : vector<8x128xf32>
    %524 = arith.addf %523, %15 : vector<8x128xf32>
    %525 = vector.extract_strided_slice %488 {offsets = [0, 32], sizes = [8, 32], strides = [1, 1]} : vector<8x64xf32> to vector<8x32xf32>
    %526 = arith.negf %524 : vector<8x128xf32>
    %527 = math.exp %526 : vector<8x128xf32>
    %cst_98 = arith.constant 1.000000e+00 : f32
    %528 = vector.broadcast %cst_98 : f32 to vector<8x128xf32>
    %529 = arith.addf %528, %527 : vector<8x128xf32>
    %530 = arith.divf %528, %529 : vector<8x128xf32>
    %531 = vector.extract_strided_slice %530 {offsets = [0, 0], sizes = [8, 32], strides = [1, 1]} : vector<8x128xf32> to vector<8x32xf32>
    %532 = vector.extract_strided_slice %530 {offsets = [0, 32], sizes = [8, 32], strides = [1, 1]} : vector<8x128xf32> to vector<8x32xf32>
    %533 = vector.extract_strided_slice %530 {offsets = [0, 64], sizes = [8, 32], strides = [1, 1]} : vector<8x128xf32> to vector<8x32xf32>
    %cst_99 = arith.constant 2.000000e+00 : f32
    %534 = vector.broadcast %cst_99 : f32 to vector<8x32xf32>
    %535 = arith.mulf %534, %533 : vector<8x32xf32>
    %cst_100 = arith.constant 1.000000e+00 : f32
    %536 = vector.broadcast %cst_100 : f32 to vector<8x32xf32>
    %537 = arith.subf %535, %536 : vector<8x32xf32>
    %538 = vector.extract_strided_slice %530 {offsets = [0, 96], sizes = [8, 32], strides = [1, 1]} : vector<8x128xf32> to vector<8x32xf32>
    %539 = arith.mulf %532, %525 : vector<8x32xf32>
    %540 = arith.mulf %531, %537 : vector<8x32xf32>
    %541 = arith.addf %539, %540 : vector<8x32xf32>
    %542 = math.tanh %541 : vector<8x32xf32>
    %543 = arith.mulf %538, %542 : vector<8x32xf32>
    %c7_i32 = arith.constant 7 : i32
    %544 = vector.broadcast %c7_i32 : i32 to vector<8x1xi32>
    %545 = arith.cmpi sgt, %26, %544 : vector<8x1xi32>
    %546 = tpu.concatenate %519, %543 in 1 : vector<8x32xf32>, vector<8x32xf32> -> vector<8x64xf32>
    %547 = vector.shape_cast %545 : vector<8x1xi1> to vector<8x1xi1>
    %548 = vector.broadcast %547 : vector<8x1xi1> to vector<8x64xi1>
    %549 = arith.select %548, %546, %484 : vector<8x64xi1>, vector<8x64xf32>
    %550 = tpu.concatenate %517, %541 in 1 : vector<8x32xf32>, vector<8x32xf32> -> vector<8x64xf32>
    %551 = vector.shape_cast %545 : vector<8x1xi1> to vector<8x1xi1>
    %552 = vector.broadcast %551 : vector<8x1xi1> to vector<8x64xi1>
    %553 = arith.select %552, %550, %488 : vector<8x64xi1>, vector<8x64xf32>
    %c7_i32_101 = arith.constant 7 : i32
    %554 = vector.broadcast %c7_i32_101 : i32 to vector<8x1xi32>
    %555 = arith.cmpi eq, %26, %554 : vector<8x1xi32>
    %556 = vector.extract_strided_slice %31 {offsets = [7, 0, 0], sizes = [1, 8, 128], strides = [1, 1, 1]} : vector<8x8x128xf32> to vector<1x8x128xf32>
    %557 = vector.shape_cast %556 : vector<1x8x128xf32> to vector<8x128xf32>
    %558 = vector.shape_cast %555 : vector<8x1xi1> to vector<8x1xi1>
    %559 = vector.broadcast %558 : vector<8x1xi1> to vector<8x128xi1>
    %560 = arith.select %559, %557, %495 : vector<8x128xi1>, vector<8x128xf32>
    %561 = tpu.concatenate %560, %549 in 1 : vector<8x128xf32>, vector<8x64xf32> -> vector<8x192xf32>
    %562 = arith.truncf %561 : vector<8x192xf32> to vector<8x192xbf16>
    %cst_102 = arith.constant dense<0.000000e+00> : vector<8x256xf32>
    %563 = tpu.matmul %562, %19, %cst_102 {dimension_numbers = #tpu.dot_dimension_numbers<[1], [0], [0], [1], [0, 0, 1, 1], [], []>} : vector<8x192xbf16>, vector<192x256xbf16>, vector<8x256xf32> -> vector<8x256xf32>
    %564 = vector.extract_strided_slice %563 {offsets = [0, 0], sizes = [8, 128], strides = [1, 1]} : vector<8x256xf32> to vector<8x128xf32>
    %565 = arith.addf %564, %12 : vector<8x128xf32>
    %566 = vector.extract_strided_slice %553 {offsets = [0, 0], sizes = [8, 32], strides = [1, 1]} : vector<8x64xf32> to vector<8x32xf32>
    %567 = arith.negf %565 : vector<8x128xf32>
    %568 = math.exp %567 : vector<8x128xf32>
    %cst_103 = arith.constant 1.000000e+00 : f32
    %569 = vector.broadcast %cst_103 : f32 to vector<8x128xf32>
    %570 = arith.addf %569, %568 : vector<8x128xf32>
    %571 = arith.divf %569, %570 : vector<8x128xf32>
    %572 = vector.extract_strided_slice %571 {offsets = [0, 0], sizes = [8, 32], strides = [1, 1]} : vector<8x128xf32> to vector<8x32xf32>
    %573 = vector.extract_strided_slice %571 {offsets = [0, 32], sizes = [8, 32], strides = [1, 1]} : vector<8x128xf32> to vector<8x32xf32>
    %574 = vector.extract_strided_slice %571 {offsets = [0, 64], sizes = [8, 32], strides = [1, 1]} : vector<8x128xf32> to vector<8x32xf32>
    %cst_104 = arith.constant 2.000000e+00 : f32
    %575 = vector.broadcast %cst_104 : f32 to vector<8x32xf32>
    %576 = arith.mulf %575, %574 : vector<8x32xf32>
    %cst_105 = arith.constant 1.000000e+00 : f32
    %577 = vector.broadcast %cst_105 : f32 to vector<8x32xf32>
    %578 = arith.subf %576, %577 : vector<8x32xf32>
    %579 = vector.extract_strided_slice %571 {offsets = [0, 96], sizes = [8, 32], strides = [1, 1]} : vector<8x128xf32> to vector<8x32xf32>
    %580 = arith.mulf %573, %566 : vector<8x32xf32>
    %581 = arith.mulf %572, %578 : vector<8x32xf32>
    %582 = arith.addf %580, %581 : vector<8x32xf32>
    %583 = math.tanh %582 : vector<8x32xf32>
    %584 = arith.mulf %579, %583 : vector<8x32xf32>
    %585 = arith.truncf %584 : vector<8x32xf32> to vector<8x32xbf16>
    %cst_106 = arith.constant dense<0.000000e+00> : vector<8x128xf32>
    %586 = tpu.matmul %585, %22, %cst_106 {dimension_numbers = #tpu.dot_dimension_numbers<[1], [0], [0], [1], [0, 0, 1, 1], [], []>} : vector<8x32xbf16>, vector<32x128xbf16>, vector<8x128xf32> -> vector<8x128xf32>
    %587 = vector.extract_strided_slice %563 {offsets = [0, 128], sizes = [8, 128], strides = [1, 1]} : vector<8x256xf32> to vector<8x128xf32>
    %588 = arith.addf %586, %587 : vector<8x128xf32>
    %589 = arith.addf %588, %15 : vector<8x128xf32>
    %590 = vector.extract_strided_slice %553 {offsets = [0, 32], sizes = [8, 32], strides = [1, 1]} : vector<8x64xf32> to vector<8x32xf32>
    %591 = arith.negf %589 : vector<8x128xf32>
    %592 = math.exp %591 : vector<8x128xf32>
    %cst_107 = arith.constant 1.000000e+00 : f32
    %593 = vector.broadcast %cst_107 : f32 to vector<8x128xf32>
    %594 = arith.addf %593, %592 : vector<8x128xf32>
    %595 = arith.divf %593, %594 : vector<8x128xf32>
    %596 = vector.extract_strided_slice %595 {offsets = [0, 0], sizes = [8, 32], strides = [1, 1]} : vector<8x128xf32> to vector<8x32xf32>
    %597 = vector.extract_strided_slice %595 {offsets = [0, 32], sizes = [8, 32], strides = [1, 1]} : vector<8x128xf32> to vector<8x32xf32>
    %598 = vector.extract_strided_slice %595 {offsets = [0, 64], sizes = [8, 32], strides = [1, 1]} : vector<8x128xf32> to vector<8x32xf32>
    %cst_108 = arith.constant 2.000000e+00 : f32
    %599 = vector.broadcast %cst_108 : f32 to vector<8x32xf32>
    %600 = arith.mulf %599, %598 : vector<8x32xf32>
    %cst_109 = arith.constant 1.000000e+00 : f32
    %601 = vector.broadcast %cst_109 : f32 to vector<8x32xf32>
    %602 = arith.subf %600, %601 : vector<8x32xf32>
    %603 = vector.extract_strided_slice %595 {offsets = [0, 96], sizes = [8, 32], strides = [1, 1]} : vector<8x128xf32> to vector<8x32xf32>
    %604 = arith.mulf %597, %590 : vector<8x32xf32>
    %605 = arith.mulf %596, %602 : vector<8x32xf32>
    %606 = arith.addf %604, %605 : vector<8x32xf32>
    %607 = math.tanh %606 : vector<8x32xf32>
    %608 = arith.mulf %603, %607 : vector<8x32xf32>
    %609 = tpu.concatenate %584, %608 in 1 : vector<8x32xf32>, vector<8x32xf32> -> vector<8x64xf32>
    %610 = tpu.concatenate %582, %606 in 1 : vector<8x32xf32>, vector<8x32xf32> -> vector<8x64xf32>
    %611 = arith.truncf %608 : vector<8x32xf32> to vector<8x32xbf16>
    %cst_110 = arith.constant dense<0.000000e+00> : vector<8x128xf32>
    %612 = tpu.matmul %611, %23, %cst_110 {dimension_numbers = #tpu.dot_dimension_numbers<[1], [0], [0], [1], [0, 0, 1, 1], [], []>} : vector<8x32xbf16>, vector<32x128xbf16>, vector<8x128xf32> -> vector<8x128xf32>
    %613 = arith.addf %612, %18 : vector<8x128xf32>
    %614 = arith.addf %560, %613 : vector<8x128xf32>
    %615 = arith.mulf %614, %9 : vector<8x128xf32>
    %616 = arith.addf %615, %6 : vector<8x128xf32>
    %c0_111 = arith.constant 0 : index
    %c0_112 = arith.constant 0 : index
    %c0_113 = arith.constant 0 : index
    %617 = vector.load %arg12[%c0_111, %c0_112, %c0_113] : memref<4x8x128xf32, #tpu.memory_space<vmem>>, vector<1x8x128xf32>
    %618 = vector.shape_cast %617 : vector<1x8x128xf32> to vector<8x128xf32>
    %619 = vector.shape_cast %616 : vector<8x128xf32> to vector<1x8x128xf32>
    tpu.vector_store %arg12[%c0_111, %c0_112, %c0_113], %619 {strides = array<i32>} : memref<4x8x128xf32, #tpu.memory_space<vmem>>, vector<1x8x128xf32>,
    %620 = tpu.concatenate %614, %609 in 1 : vector<8x128xf32>, vector<8x64xf32> -> vector<8x192xf32>
    %621 = arith.truncf %620 : vector<8x192xf32> to vector<8x192xbf16>
    %cst_114 = arith.constant dense<0.000000e+00> : vector<8x256xf32>
    %622 = tpu.matmul %621, %19, %cst_114 {dimension_numbers = #tpu.dot_dimension_numbers<[1], [0], [0], [1], [0, 0, 1, 1], [], []>} : vector<8x192xbf16>, vector<192x256xbf16>, vector<8x256xf32> -> vector<8x256xf32>
    %623 = vector.extract_strided_slice %622 {offsets = [0, 0], sizes = [8, 128], strides = [1, 1]} : vector<8x256xf32> to vector<8x128xf32>
    %624 = arith.addf %623, %12 : vector<8x128xf32>
    %625 = vector.extract_strided_slice %610 {offsets = [0, 0], sizes = [8, 32], strides = [1, 1]} : vector<8x64xf32> to vector<8x32xf32>
    %626 = arith.negf %624 : vector<8x128xf32>
    %627 = math.exp %626 : vector<8x128xf32>
    %cst_115 = arith.constant 1.000000e+00 : f32
    %628 = vector.broadcast %cst_115 : f32 to vector<8x128xf32>
    %629 = arith.addf %628, %627 : vector<8x128xf32>
    %630 = arith.divf %628, %629 : vector<8x128xf32>
    %631 = vector.extract_strided_slice %630 {offsets = [0, 0], sizes = [8, 32], strides = [1, 1]} : vector<8x128xf32> to vector<8x32xf32>
    %632 = vector.extract_strided_slice %630 {offsets = [0, 32], sizes = [8, 32], strides = [1, 1]} : vector<8x128xf32> to vector<8x32xf32>
    %633 = vector.extract_strided_slice %630 {offsets = [0, 64], sizes = [8, 32], strides = [1, 1]} : vector<8x128xf32> to vector<8x32xf32>
    %cst_116 = arith.constant 2.000000e+00 : f32
    %634 = vector.broadcast %cst_116 : f32 to vector<8x32xf32>
    %635 = arith.mulf %634, %633 : vector<8x32xf32>
    %cst_117 = arith.constant 1.000000e+00 : f32
    %636 = vector.broadcast %cst_117 : f32 to vector<8x32xf32>
    %637 = arith.subf %635, %636 : vector<8x32xf32>
    %638 = vector.extract_strided_slice %630 {offsets = [0, 96], sizes = [8, 32], strides = [1, 1]} : vector<8x128xf32> to vector<8x32xf32>
    %639 = arith.mulf %632, %625 : vector<8x32xf32>
    %640 = arith.mulf %631, %637 : vector<8x32xf32>
    %641 = arith.addf %639, %640 : vector<8x32xf32>
    %642 = math.tanh %641 : vector<8x32xf32>
    %643 = arith.mulf %638, %642 : vector<8x32xf32>
    %644 = arith.truncf %643 : vector<8x32xf32> to vector<8x32xbf16>
    %cst_118 = arith.constant dense<0.000000e+00> : vector<8x128xf32>
    %645 = tpu.matmul %644, %22, %cst_118 {dimension_numbers = #tpu.dot_dimension_numbers<[1], [0], [0], [1], [0, 0, 1, 1], [], []>} : vector<8x32xbf16>, vector<32x128xbf16>, vector<8x128xf32> -> vector<8x128xf32>
    %646 = vector.extract_strided_slice %622 {offsets = [0, 128], sizes = [8, 128], strides = [1, 1]} : vector<8x256xf32> to vector<8x128xf32>
    %647 = arith.addf %645, %646 : vector<8x128xf32>
    %648 = arith.addf %647, %15 : vector<8x128xf32>
    %649 = vector.extract_strided_slice %610 {offsets = [0, 32], sizes = [8, 32], strides = [1, 1]} : vector<8x64xf32> to vector<8x32xf32>
    %650 = arith.negf %648 : vector<8x128xf32>
    %651 = math.exp %650 : vector<8x128xf32>
    %cst_119 = arith.constant 1.000000e+00 : f32
    %652 = vector.broadcast %cst_119 : f32 to vector<8x128xf32>
    %653 = arith.addf %652, %651 : vector<8x128xf32>
    %654 = arith.divf %652, %653 : vector<8x128xf32>
    %655 = vector.extract_strided_slice %654 {offsets = [0, 0], sizes = [8, 32], strides = [1, 1]} : vector<8x128xf32> to vector<8x32xf32>
    %656 = vector.extract_strided_slice %654 {offsets = [0, 32], sizes = [8, 32], strides = [1, 1]} : vector<8x128xf32> to vector<8x32xf32>
    %657 = vector.extract_strided_slice %654 {offsets = [0, 64], sizes = [8, 32], strides = [1, 1]} : vector<8x128xf32> to vector<8x32xf32>
    %cst_120 = arith.constant 2.000000e+00 : f32
    %658 = vector.broadcast %cst_120 : f32 to vector<8x32xf32>
    %659 = arith.mulf %658, %657 : vector<8x32xf32>
    %cst_121 = arith.constant 1.000000e+00 : f32
    %660 = vector.broadcast %cst_121 : f32 to vector<8x32xf32>
    %661 = arith.subf %659, %660 : vector<8x32xf32>
    %662 = vector.extract_strided_slice %654 {offsets = [0, 96], sizes = [8, 32], strides = [1, 1]} : vector<8x128xf32> to vector<8x32xf32>
    %663 = arith.mulf %656, %649 : vector<8x32xf32>
    %664 = arith.mulf %655, %661 : vector<8x32xf32>
    %665 = arith.addf %663, %664 : vector<8x32xf32>
    %666 = math.tanh %665 : vector<8x32xf32>
    %667 = arith.mulf %662, %666 : vector<8x32xf32>
    %668 = tpu.concatenate %643, %667 in 1 : vector<8x32xf32>, vector<8x32xf32> -> vector<8x64xf32>
    %669 = tpu.concatenate %641, %665 in 1 : vector<8x32xf32>, vector<8x32xf32> -> vector<8x64xf32>
    %670 = arith.truncf %667 : vector<8x32xf32> to vector<8x32xbf16>
    %cst_122 = arith.constant dense<0.000000e+00> : vector<8x128xf32>
    %671 = tpu.matmul %670, %23, %cst_122 {dimension_numbers = #tpu.dot_dimension_numbers<[1], [0], [0], [1], [0, 0, 1, 1], [], []>} : vector<8x32xbf16>, vector<32x128xbf16>, vector<8x128xf32> -> vector<8x128xf32>
    %672 = arith.addf %671, %18 : vector<8x128xf32>
    %673 = arith.addf %614, %672 : vector<8x128xf32>
    %674 = arith.mulf %673, %9 : vector<8x128xf32>
    %675 = arith.addf %674, %6 : vector<8x128xf32>
    %c1 = arith.constant 1 : index
    %c0_123 = arith.constant 0 : index
    %c0_124 = arith.constant 0 : index
    %676 = vector.load %arg12[%c1, %c0_123, %c0_124] : memref<4x8x128xf32, #tpu.memory_space<vmem>>, vector<1x8x128xf32>
    %677 = vector.shape_cast %676 : vector<1x8x128xf32> to vector<8x128xf32>
    %678 = vector.shape_cast %675 : vector<8x128xf32> to vector<1x8x128xf32>
    tpu.vector_store %arg12[%c1, %c0_123, %c0_124], %678 {strides = array<i32>} : memref<4x8x128xf32, #tpu.memory_space<vmem>>, vector<1x8x128xf32>,
    %679 = tpu.concatenate %673, %668 in 1 : vector<8x128xf32>, vector<8x64xf32> -> vector<8x192xf32>
    %680 = arith.truncf %679 : vector<8x192xf32> to vector<8x192xbf16>
    %cst_125 = arith.constant dense<0.000000e+00> : vector<8x256xf32>
    %681 = tpu.matmul %680, %19, %cst_125 {dimension_numbers = #tpu.dot_dimension_numbers<[1], [0], [0], [1], [0, 0, 1, 1], [], []>} : vector<8x192xbf16>, vector<192x256xbf16>, vector<8x256xf32> -> vector<8x256xf32>
    %682 = vector.extract_strided_slice %681 {offsets = [0, 0], sizes = [8, 128], strides = [1, 1]} : vector<8x256xf32> to vector<8x128xf32>
    %683 = arith.addf %682, %12 : vector<8x128xf32>
    %684 = vector.extract_strided_slice %669 {offsets = [0, 0], sizes = [8, 32], strides = [1, 1]} : vector<8x64xf32> to vector<8x32xf32>
    %685 = arith.negf %683 : vector<8x128xf32>
    %686 = math.exp %685 : vector<8x128xf32>
    %cst_126 = arith.constant 1.000000e+00 : f32
    %687 = vector.broadcast %cst_126 : f32 to vector<8x128xf32>
    %688 = arith.addf %687, %686 : vector<8x128xf32>
    %689 = arith.divf %687, %688 : vector<8x128xf32>
    %690 = vector.extract_strided_slice %689 {offsets = [0, 0], sizes = [8, 32], strides = [1, 1]} : vector<8x128xf32> to vector<8x32xf32>
    %691 = vector.extract_strided_slice %689 {offsets = [0, 32], sizes = [8, 32], strides = [1, 1]} : vector<8x128xf32> to vector<8x32xf32>
    %692 = vector.extract_strided_slice %689 {offsets = [0, 64], sizes = [8, 32], strides = [1, 1]} : vector<8x128xf32> to vector<8x32xf32>
    %cst_127 = arith.constant 2.000000e+00 : f32
    %693 = vector.broadcast %cst_127 : f32 to vector<8x32xf32>
    %694 = arith.mulf %693, %692 : vector<8x32xf32>
    %cst_128 = arith.constant 1.000000e+00 : f32
    %695 = vector.broadcast %cst_128 : f32 to vector<8x32xf32>
    %696 = arith.subf %694, %695 : vector<8x32xf32>
    %697 = vector.extract_strided_slice %689 {offsets = [0, 96], sizes = [8, 32], strides = [1, 1]} : vector<8x128xf32> to vector<8x32xf32>
    %698 = arith.mulf %691, %684 : vector<8x32xf32>
    %699 = arith.mulf %690, %696 : vector<8x32xf32>
    %700 = arith.addf %698, %699 : vector<8x32xf32>
    %701 = math.tanh %700 : vector<8x32xf32>
    %702 = arith.mulf %697, %701 : vector<8x32xf32>
    %703 = arith.truncf %702 : vector<8x32xf32> to vector<8x32xbf16>
    %cst_129 = arith.constant dense<0.000000e+00> : vector<8x128xf32>
    %704 = tpu.matmul %703, %22, %cst_129 {dimension_numbers = #tpu.dot_dimension_numbers<[1], [0], [0], [1], [0, 0, 1, 1], [], []>} : vector<8x32xbf16>, vector<32x128xbf16>, vector<8x128xf32> -> vector<8x128xf32>
    %705 = vector.extract_strided_slice %681 {offsets = [0, 128], sizes = [8, 128], strides = [1, 1]} : vector<8x256xf32> to vector<8x128xf32>
    %706 = arith.addf %704, %705 : vector<8x128xf32>
    %707 = arith.addf %706, %15 : vector<8x128xf32>
    %708 = vector.extract_strided_slice %669 {offsets = [0, 32], sizes = [8, 32], strides = [1, 1]} : vector<8x64xf32> to vector<8x32xf32>
    %709 = arith.negf %707 : vector<8x128xf32>
    %710 = math.exp %709 : vector<8x128xf32>
    %cst_130 = arith.constant 1.000000e+00 : f32
    %711 = vector.broadcast %cst_130 : f32 to vector<8x128xf32>
    %712 = arith.addf %711, %710 : vector<8x128xf32>
    %713 = arith.divf %711, %712 : vector<8x128xf32>
    %714 = vector.extract_strided_slice %713 {offsets = [0, 0], sizes = [8, 32], strides = [1, 1]} : vector<8x128xf32> to vector<8x32xf32>
    %715 = vector.extract_strided_slice %713 {offsets = [0, 32], sizes = [8, 32], strides = [1, 1]} : vector<8x128xf32> to vector<8x32xf32>
    %716 = vector.extract_strided_slice %713 {offsets = [0, 64], sizes = [8, 32], strides = [1, 1]} : vector<8x128xf32> to vector<8x32xf32>
    %cst_131 = arith.constant 2.000000e+00 : f32
    %717 = vector.broadcast %cst_131 : f32 to vector<8x32xf32>
    %718 = arith.mulf %717, %716 : vector<8x32xf32>
    %cst_132 = arith.constant 1.000000e+00 : f32
    %719 = vector.broadcast %cst_132 : f32 to vector<8x32xf32>
    %720 = arith.subf %718, %719 : vector<8x32xf32>
    %721 = vector.extract_strided_slice %713 {offsets = [0, 96], sizes = [8, 32], strides = [1, 1]} : vector<8x128xf32> to vector<8x32xf32>
    %722 = arith.mulf %715, %708 : vector<8x32xf32>
    %723 = arith.mulf %714, %720 : vector<8x32xf32>
    %724 = arith.addf %722, %723 : vector<8x32xf32>
    %725 = math.tanh %724 : vector<8x32xf32>
    %726 = arith.mulf %721, %725 : vector<8x32xf32>
    %727 = tpu.concatenate %702, %726 in 1 : vector<8x32xf32>, vector<8x32xf32> -> vector<8x64xf32>
    %728 = tpu.concatenate %700, %724 in 1 : vector<8x32xf32>, vector<8x32xf32> -> vector<8x64xf32>
    %729 = arith.truncf %726 : vector<8x32xf32> to vector<8x32xbf16>
    %cst_133 = arith.constant dense<0.000000e+00> : vector<8x128xf32>
    %730 = tpu.matmul %729, %23, %cst_133 {dimension_numbers = #tpu.dot_dimension_numbers<[1], [0], [0], [1], [0, 0, 1, 1], [], []>} : vector<8x32xbf16>, vector<32x128xbf16>, vector<8x128xf32> -> vector<8x128xf32>
    %731 = arith.addf %730, %18 : vector<8x128xf32>
    %732 = arith.addf %673, %731 : vector<8x128xf32>
    %733 = arith.mulf %732, %9 : vector<8x128xf32>
    %734 = arith.addf %733, %6 : vector<8x128xf32>
    %c2 = arith.constant 2 : index
    %c0_134 = arith.constant 0 : index
    %c0_135 = arith.constant 0 : index
    %735 = vector.load %arg12[%c2, %c0_134, %c0_135] : memref<4x8x128xf32, #tpu.memory_space<vmem>>, vector<1x8x128xf32>
    %736 = vector.shape_cast %735 : vector<1x8x128xf32> to vector<8x128xf32>
    %737 = vector.shape_cast %734 : vector<8x128xf32> to vector<1x8x128xf32>
    tpu.vector_store %arg12[%c2, %c0_134, %c0_135], %737 {strides = array<i32>} : memref<4x8x128xf32, #tpu.memory_space<vmem>>, vector<1x8x128xf32>,
    %738 = tpu.concatenate %732, %727 in 1 : vector<8x128xf32>, vector<8x64xf32> -> vector<8x192xf32>
    %739 = arith.truncf %738 : vector<8x192xf32> to vector<8x192xbf16>
    %cst_136 = arith.constant dense<0.000000e+00> : vector<8x256xf32>
    %740 = tpu.matmul %739, %19, %cst_136 {dimension_numbers = #tpu.dot_dimension_numbers<[1], [0], [0], [1], [0, 0, 1, 1], [], []>} : vector<8x192xbf16>, vector<192x256xbf16>, vector<8x256xf32> -> vector<8x256xf32>
    %741 = vector.extract_strided_slice %740 {offsets = [0, 0], sizes = [8, 128], strides = [1, 1]} : vector<8x256xf32> to vector<8x128xf32>
    %742 = arith.addf %741, %12 : vector<8x128xf32>
    %743 = vector.extract_strided_slice %728 {offsets = [0, 0], sizes = [8, 32], strides = [1, 1]} : vector<8x64xf32> to vector<8x32xf32>
    %744 = arith.negf %742 : vector<8x128xf32>
    %745 = math.exp %744 : vector<8x128xf32>
    %cst_137 = arith.constant 1.000000e+00 : f32
    %746 = vector.broadcast %cst_137 : f32 to vector<8x128xf32>
    %747 = arith.addf %746, %745 : vector<8x128xf32>
    %748 = arith.divf %746, %747 : vector<8x128xf32>
    %749 = vector.extract_strided_slice %748 {offsets = [0, 0], sizes = [8, 32], strides = [1, 1]} : vector<8x128xf32> to vector<8x32xf32>
    %750 = vector.extract_strided_slice %748 {offsets = [0, 32], sizes = [8, 32], strides = [1, 1]} : vector<8x128xf32> to vector<8x32xf32>
    %751 = vector.extract_strided_slice %748 {offsets = [0, 64], sizes = [8, 32], strides = [1, 1]} : vector<8x128xf32> to vector<8x32xf32>
    %cst_138 = arith.constant 2.000000e+00 : f32
    %752 = vector.broadcast %cst_138 : f32 to vector<8x32xf32>
    %753 = arith.mulf %752, %751 : vector<8x32xf32>
    %cst_139 = arith.constant 1.000000e+00 : f32
    %754 = vector.broadcast %cst_139 : f32 to vector<8x32xf32>
    %755 = arith.subf %753, %754 : vector<8x32xf32>
    %756 = vector.extract_strided_slice %748 {offsets = [0, 96], sizes = [8, 32], strides = [1, 1]} : vector<8x128xf32> to vector<8x32xf32>
    %757 = arith.mulf %750, %743 : vector<8x32xf32>
    %758 = arith.mulf %749, %755 : vector<8x32xf32>
    %759 = arith.addf %757, %758 : vector<8x32xf32>
    %760 = math.tanh %759 : vector<8x32xf32>
    %761 = arith.mulf %756, %760 : vector<8x32xf32>
    %762 = arith.truncf %761 : vector<8x32xf32> to vector<8x32xbf16>
    %cst_140 = arith.constant dense<0.000000e+00> : vector<8x128xf32>
    %763 = tpu.matmul %762, %22, %cst_140 {dimension_numbers = #tpu.dot_dimension_numbers<[1], [0], [0], [1], [0, 0, 1, 1], [], []>} : vector<8x32xbf16>, vector<32x128xbf16>, vector<8x128xf32> -> vector<8x128xf32>
    %764 = vector.extract_strided_slice %740 {offsets = [0, 128], sizes = [8, 128], strides = [1, 1]} : vector<8x256xf32> to vector<8x128xf32>
    %765 = arith.addf %763, %764 : vector<8x128xf32>
    %766 = arith.addf %765, %15 : vector<8x128xf32>
    %767 = vector.extract_strided_slice %728 {offsets = [0, 32], sizes = [8, 32], strides = [1, 1]} : vector<8x64xf32> to vector<8x32xf32>
    %768 = arith.negf %766 : vector<8x128xf32>
    %769 = math.exp %768 : vector<8x128xf32>
    %cst_141 = arith.constant 1.000000e+00 : f32
    %770 = vector.broadcast %cst_141 : f32 to vector<8x128xf32>
    %771 = arith.addf %770, %769 : vector<8x128xf32>
    %772 = arith.divf %770, %771 : vector<8x128xf32>
    %773 = vector.extract_strided_slice %772 {offsets = [0, 0], sizes = [8, 32], strides = [1, 1]} : vector<8x128xf32> to vector<8x32xf32>
    %774 = vector.extract_strided_slice %772 {offsets = [0, 32], sizes = [8, 32], strides = [1, 1]} : vector<8x128xf32> to vector<8x32xf32>
    %775 = vector.extract_strided_slice %772 {offsets = [0, 64], sizes = [8, 32], strides = [1, 1]} : vector<8x128xf32> to vector<8x32xf32>
    %cst_142 = arith.constant 2.000000e+00 : f32
    %776 = vector.broadcast %cst_142 : f32 to vector<8x32xf32>
    %777 = arith.mulf %776, %775 : vector<8x32xf32>
    %cst_143 = arith.constant 1.000000e+00 : f32
    %778 = vector.broadcast %cst_143 : f32 to vector<8x32xf32>
    %779 = arith.subf %777, %778 : vector<8x32xf32>
    %780 = vector.extract_strided_slice %772 {offsets = [0, 96], sizes = [8, 32], strides = [1, 1]} : vector<8x128xf32> to vector<8x32xf32>
    %781 = arith.mulf %774, %767 : vector<8x32xf32>
    %782 = arith.mulf %773, %779 : vector<8x32xf32>
    %783 = arith.addf %781, %782 : vector<8x32xf32>
    %784 = math.tanh %783 : vector<8x32xf32>
    %785 = arith.mulf %780, %784 : vector<8x32xf32>
    %786 = arith.truncf %785 : vector<8x32xf32> to vector<8x32xbf16>
    %cst_144 = arith.constant dense<0.000000e+00> : vector<8x128xf32>
    %787 = tpu.matmul %786, %23, %cst_144 {dimension_numbers = #tpu.dot_dimension_numbers<[1], [0], [0], [1], [0, 0, 1, 1], [], []>} : vector<8x32xbf16>, vector<32x128xbf16>, vector<8x128xf32> -> vector<8x128xf32>
    %788 = arith.addf %787, %18 : vector<8x128xf32>
    %789 = arith.addf %732, %788 : vector<8x128xf32>
    %790 = arith.mulf %789, %9 : vector<8x128xf32>
    %791 = arith.addf %790, %6 : vector<8x128xf32>
    %c3 = arith.constant 3 : index
    %c0_145 = arith.constant 0 : index
    %c0_146 = arith.constant 0 : index
    %792 = vector.load %arg12[%c3, %c0_145, %c0_146] : memref<4x8x128xf32, #tpu.memory_space<vmem>>, vector<1x8x128xf32>
    %793 = vector.shape_cast %792 : vector<1x8x128xf32> to vector<8x128xf32>
    %794 = vector.shape_cast %791 : vector<8x128xf32> to vector<1x8x128xf32>
    tpu.vector_store %arg12[%c3, %c0_145, %c0_146], %794 {strides = array<i32>} : memref<4x8x128xf32, #tpu.memory_space<vmem>>, vector<1x8x128xf32>,
    return
  }
  func.func @transform_0(%arg0: i32) -> (i32, i32) {
    %c0_i32 = arith.constant 0 : i32
    %c0_i32_0 = arith.constant 0 : i32
    return %arg0, %c0_i32 : i32, i32
  }
  func.func @transform_1(%arg0: i32) -> (i32, i32, i32) {
    %c0_i32 = arith.constant 0 : i32
    %c0_i32_0 = arith.constant 0 : i32
    %c0_i32_1 = arith.constant 0 : i32
    return %c0_i32, %arg0, %c0_i32_0 : i32, i32, i32
  }
  func.func @transform_2(%arg0: i32) -> (i32, i32) {
    %c0_i32 = arith.constant 0 : i32
    %c0_i32_0 = arith.constant 0 : i32
    %c0_i32_1 = arith.constant 0 : i32
    return %c0_i32, %c0_i32_0 : i32, i32
  }
  func.func @transform_3(%arg0: i32) -> (i32, i32) {
    %c0_i32 = arith.constant 0 : i32
    %c0_i32_0 = arith.constant 0 : i32
    %c0_i32_1 = arith.constant 0 : i32
    return %c0_i32, %c0_i32_0 : i32, i32
  }
  func.func @transform_4(%arg0: i32) -> (i32, i32) {
    %c0_i32 = arith.constant 0 : i32
    %c0_i32_0 = arith.constant 0 : i32
    %c0_i32_1 = arith.constant 0 : i32
    return %c0_i32, %c0_i32_0 : i32, i32
  }
  func.func @transform_5(%arg0: i32) -> (i32, i32) {
    %c0_i32 = arith.constant 0 : i32
    %c0_i32_0 = arith.constant 0 : i32
    %c0_i32_1 = arith.constant 0 : i32
    return %c0_i32, %c0_i32_0 : i32, i32
  }
  func.func @transform_6(%arg0: i32) -> (i32, i32) {
    %c0_i32 = arith.constant 0 : i32
    %c0_i32_0 = arith.constant 0 : i32
    %c0_i32_1 = arith.constant 0 : i32
    return %c0_i32, %c0_i32_0 : i32, i32
  }
  func.func @transform_7(%arg0: i32) -> (i32, i32) {
    %c0_i32 = arith.constant 0 : i32
    %c0_i32_0 = arith.constant 0 : i32
    %c0_i32_1 = arith.constant 0 : i32
    return %c0_i32, %c0_i32_0 : i32, i32
  }
  func.func @transform_8(%arg0: i32) -> (i32, i32) {
    %c0_i32 = arith.constant 0 : i32
    %c0_i32_0 = arith.constant 0 : i32
    %c0_i32_1 = arith.constant 0 : i32
    return %c0_i32, %c0_i32_0 : i32, i32
  }
  func.func @transform_9(%arg0: i32) -> (i32, i32) {
    %c0_i32 = arith.constant 0 : i32
    %c0_i32_0 = arith.constant 0 : i32
    %c0_i32_1 = arith.constant 0 : i32
    return %c0_i32, %c0_i32_0 : i32, i32
  }
  func.func @transform_10(%arg0: i32) -> (i32, i32) {
    %c0_i32 = arith.constant 0 : i32
    %c0_i32_0 = arith.constant 0 : i32
    %c0_i32_1 = arith.constant 0 : i32
    return %c0_i32, %c0_i32_0 : i32, i32
  }
  func.func @transform_11(%arg0: i32) -> (i32, i32, i32) {
    %c0_i32 = arith.constant 0 : i32
    %c0_i32_0 = arith.constant 0 : i32
    %c0_i32_1 = arith.constant 0 : i32
    return %c0_i32, %arg0, %c0_i32_0 : i32, i32, i32
  }
}

</mosaic_0001>

<bundles_post_ra>
// kernel: tpu_custom_call.1
= control target key start
LH: loop header
LB: loop body
LE: loop exit
PB: predicated region body
PF: predicated region fallthrough
CT: control target
= control target key end

     0   :  { %16 = vsyncpa [#allocation3], 0  ;;  %s4326_s0 = inlined_call_operand.vmem [shape: s32[8,1], index: 0, kind: input, shape index: {}]   ;;  %s4327_s1 = inlined_call_operand.hbm [shape: f32[8,8,128], index: 1, kind: input, shape index: {}]   ;;  %s4328_s2 = inlined_call_operand.vmem [shape: f32[1,128], index: 2, kind: input, shape index: {}]   ;;  %s4329_s3 = inlined_call_operand.vmem [shape: f32[1,128], index: 3, kind: input, shape index: {}]   ;;  %s4330_s4 = inlined_call_operand.hbm [shape: f32[1,128], index: 4, kind: input, shape index: {}]   ;;  %s4331_s5 = inlined_call_operand.vmem [shape: bf16[32,128], index: 5, kind: input, shape index: {}]   ;;  %s4332_s6 = inlined_call_operand.hbm [shape: bf16[192,256], index: 6, kind: input, shape index: {}]   ;;  %s4333_s7 = inlined_call_operand.vmem [shape: f32[1,128], index: 7, kind: input, shape index: {}]   ;;  %s4334_s8 = inlined_call_operand.vmem [shape: f32[1,128], index: 8, kind: input, shape index: {}]   ;;  %s4335_s9 = inlined_call_operand.hbm [shape: bf16[32,128], index: 9, kind: input, shape index: {}]   ;;  %s4336_s10 = inlined_call_operand.vmem [shape: f32[1,128], index: 10, kind: input, shape index: {}]   ;;  %s4337_s11 = inlined_call_operand.hbm [shape: f32[4,8,128], index: 11, kind: output, shape index: {}]  }
   0x1   :  { %17 = vsyncpa [#allocation6], 0 }
   0x2   :  { %18 = vsyncpa [#allocation9], 0 }
   0x3   :  { %19 = vsyncpa [#allocation4], 0  ;;  %s3344_s17 = smov [#allocation5]   ;;  %s3345_s19 = smov [#allocation2]  }
   0x4   :  { %s44_s18 = sshll.u32 %s3344_s17, 4  ;;  %s27_s20 = sshll.u32 %s3345_s19, 4  ;;  %s45_s18 = int_to_ptr.vmem [resolvable:$true] %s44_s18  ;;  %s28_s20 = int_to_ptr.vmem [resolvable:$true] %s27_s20 }
   0x5   :  { %s3244_s21 = scalar_lea.vmem %s45_s18, 16  ;;  %s3248_s22 = scalar_lea.vmem %s45_s18, 32 }
   0x6   :  { %p3245_p0 = scmp.ne.s32.totalorder %s45_s18, %s3244_s21  ;;  %p3249_p1 = scmp.lt.s32.totalorder %s45_s18, %s45_s18 }
   0x7   :  { %p3250_p2 = scmp.lt.s32.totalorder %s3248_s22, %s3244_s21 }
   0x9   :  { %p3251_p3 = por %p3250_p2, %p3249_p1 }
   0xb   :  { %p3252_p4 = pnand %p3251_p3, %p3245_p0 }
   0xd   :  { %3255 = shalt.err (!%p3252_p4)
}
   0xe   :  { %47 = dma.hbm_to_vmem [thread:$0]  %s4330_s4, 16, %s45_s18, [#allocation6]  }
   0xf   :  { %s3264_s25 = scalar_lea.vmem %s28_s20, 1024  ;;  %p3269_p6 = scmp.lt.s32.totalorder %s28_s20, %s28_s20 }
  0x10   :  { %p3265_p5 = scmp.ne.s32.totalorder %s28_s20, %s3264_s25  ;;  %p3270_p7 = scmp.lt.s32.totalorder %s3264_s25, %s3264_s25 }
  0x12   :  { %p3271_p8 = por %p3270_p7, %p3269_p6 }
  0x14   :  { %p3272_p9 = pnand %p3271_p8, %p3265_p5 }
  0x16   :  { %3275 = shalt.err (!%p3272_p9)
}
  0x17   :  { %s3346_s26 = smov 128   ;;  %s3347_s27 = smov 8  }
  0x18   :  { %33 = dma.hbm_to_vmem [thread:$0]  %s4327_s1, 1024, %s28_s20, [#allocation3], %s3346_s26, %s3346_s26, %s3347_s27  }
  0x19   :  { %s3348_s30 = smov [#allocation7]   ;;  %s3349_s13 = smov [#allocation8]  }
  0x1a   :  { %s55_s12 = sshll.u32 %s3348_s30, 4  ;;  %s71_s4 = sshll.u32 %s3349_s13, 4  ;;  %s56_s12 = int_to_ptr.vmem [resolvable:$true] %s55_s12  ;;  %s72_s4 = int_to_ptr.vmem [resolvable:$true] %s71_s4 }
  0x1b   :  { %s3284_s14 = scalar_lea.vmem %s56_s12, 3072  ;;  %p3289_p11 = scmp.lt.s32.totalorder %s56_s12, %s56_s12 }
  0x1c   :  { %p3285_p10 = scmp.ne.s32.totalorder %s56_s12, %s3284_s14  ;;  %p3290_p12 = scmp.lt.s32.totalorder %s3284_s14, %s3284_s14 }
  0x1e   :  { %p3291_p13 = por %p3290_p12, %p3289_p11 }
  0x20   :  { %p3292_p0 = pnand %p3291_p13, %p3285_p10 }
  0x22   :  { %3295 = shalt.err (!%p3292_p0)
}
  0x23   :  { %61 = dma.hbm_to_vmem [thread:$0]  %s4332_s6, 3072, %s56_s12, [#allocation6], %s3346_s26, %s3346_s26, %s3347_s27  }
  0x24   :  { %s3304_s1 = scalar_lea.vmem %s72_s4, 256  ;;  %p3309_p2 = scmp.lt.s32.totalorder %s72_s4, %s72_s4 }
  0x25   :  { %p3305_p1 = scmp.ne.s32.totalorder %s72_s4, %s3304_s1  ;;  %p3310_p3 = scmp.lt.s32.totalorder %s3304_s1, %s3304_s1 }
  0x27   :  { %p3311_p4 = por %p3310_p3, %p3309_p2 }
  0x29   :  { %p3312_p5 = pnand %p3311_p4, %p3305_p1 }
  0x2b   :  { %3315 = shalt.err (!%p3312_p5)
}
  0x2c   :  { %s3350_s17 = smov 64   ;;  %s3351_s18 = smov 4  }
  0x2d   :  { %77 = dma.hbm_to_vmem [thread:$0]  %s4335_s9, 256, %s72_s4, [#allocation9], %s3350_s17, %s3350_s17, %s3351_s18  }
  0x2e   :  { %3336 = dma.done.wait [#allocation3], 1024  }
  0x2f   :  { %3337 = vsyncadd [#allocation3], 4294966272 }
  0x30   :  { %3338 = dma.done.wait [#allocation6], 3088  }
  0x31   :  { %3339 = vsyncadd [#allocation6], 4294964208 }
  0x32   :  { %3340 = dma.done.wait [#allocation9], 256  }
  0x33   :  { %3341 = vsyncadd [#allocation9], 4294967040  ;;  %v3352_v0 = vmov 0   ;;  %v3021_v1 = vld [vmem:[#allocation7 + $0x70] ss:$8 sps:$4 sm:$0xff]   ;;  %v163_v16 = vld [vmem:[#allocation2] sm:$0xff] }
  0x34   :  { %386 = vmatprep.mubr.bf16.mxu1 %v3352_v0  ;;  %3019 = vset.pattern.permute.xlu1 %v3352_v0  ;;  %v3023_v2 = vld [vmem:[#allocation7 + $0x60] ss:$8 sps:$4 sm:$0xff]   ;;  %v3025_v3 = vld [vmem:[#allocation7 + $0x50] ss:$8 sps:$4 sm:$0xff]   ;;  %v3441_v4 = vld [vmem:[#allocation7 + $0xb4] ss:$8 sps:$4 sm:$0xff]  }
  0x35   :  { %3020 = vset.pattern.permute.xlu0 %v3352_v0  ;;  %2853 = vmatprep.subr.bf16.mxu0 %v3021_v1  ;;  %v3443_v5 = vld [vmem:[#allocation7 + $0xb0] ss:$8 sps:$4 sm:$0xff]   ;;  %v3447_v6 = vld [vmem:[#allocation7 + $0xa4] ss:$8 sps:$4 sm:$0xff]   ;;  %v3449_v7 = vld [vmem:[#allocation7 + $0xa0] ss:$8 sps:$4 sm:$0xff]  }
  0x36   :  { %2854 = vmatpush3.bf16.msra.mxu0 %v3021_v1  ;;  %362 = vmatprep.subr.bf16.mxu1 %v3441_v4  ;;  %v3027_v8 = vld [vmem:[#allocation7 + $0x40] ss:$8 sps:$4 sm:$0xff]   ;;  %v3452_v9 = vld [vmem:[#allocation7 + $0x94] ss:$8 sps:$4 sm:$0xff]   ;;  %v3032_v10 = vld [vmem:[#allocation7 + $0x30] ss:$8 sps:$4 sm:$0xff]  }
  0x37   :  { %2855 = vmatprep.subr.bf16.mxu0 %v3023_v2  ;;  %363 = vmatpush1.bf16.msra.mxu1 %v3443_v5  ;;  %v3455_v11 = vld [vmem:[#allocation7 + $0x90] ss:$8 sps:$4 sm:$0xff]   ;;  %v3458_v12 = vld [vmem:[#allocation7 + $0x84] ss:$8 sps:$4 sm:$0xff]   ;;  %v3463_v13 = vld [vmem:[%s4328_s2] ss:$0 sm:$0xff] }
  0x38   :  { %364 = vmatprep.subr.bf16.mxu1 %v3447_v6  ;;  %v3037_v14 = vld [vmem:[#allocation7 + $0x20] ss:$8 sps:$4 sm:$0xff]   ;;  %v3465_v15 = vld [vmem:[#allocation5] ss:$0 sm:$0xff]  ;;  %v171_v19 = vsub.f32 %v163_v16, %v3463_v13  ;;  %v165_v24 = vld [vmem:[#allocation2 + $0x10] sm:$0xff]  ;;  %s3353_s23 = smov 32  }
  0x39   :  { %v164_v17 = vld [vmem:[#allocation2 + $0x8] sm:$0xff]  ;;  %v166_v25 = vld [vmem:[#allocation2 + $0x18] sm:$0xff]  ;;  %v173_v27 = vsub.f32 %v165_v24, %v3463_v13  ;;  %v3498_v38 = vld [vmem:[%s4333_s7] ss:$0 sm:$0xff]  ;;  %v3354_v54 = vmov 0.0   ;;  %vm3355_vm0 = vmmov 0  }
  0x3a   :  { %2856 = vmatpush3.bf16.msra.mxu0 %v3023_v2  ;;  %v3468_v18 = vld [vmem:[#allocation7 + $0x80] ss:$8 sps:$4 sm:$0xff]   ;;  %v172_v20 = vsub.f32 %v164_v17, %v3463_v13  ;;  %v3474_v21 = vmul.f32 %v3465_v15, %v171_v19  ;;  %v3042_v26 = vld [vmem:[#allocation7 + $0x10] ss:$8 sps:$4 sm:$0xff]   ;;  %v174_v28 = vsub.f32 %v166_v25, %v3463_v13  ;;  %vm437_vm1 = vcmask 261120  }
  0x3b   :  { %2857 = vmatprep.subr.bf16.mxu0 %v3025_v3  ;;  %365 = vmatpush1.bf16.msra.mxu1 %v3449_v7  ;;  %v3047_v29 = vld [vmem:[#allocation7] ss:$8 sps:$4 sm:$0xff]   ;;  %v3486_v30 = vmul.f32 %v3465_v15, %v173_v27  ;;  %v3543_v61 = vld [vmem:[%s4334_s8] ss:$0 sm:$0xff]  ;;  %vm350_vm4 = vcmask 523264  }
  0x3c   :  { %366 = vmatprep.subr.bf16.mxu1 %v3452_v9  ;;  %v3477_v22 = vmul.f32 %v3465_v15, %v172_v20  ;;  %v3489_v31 = vmul.f32 %v3465_v15, %v174_v28  ;;  %v3509_v53 = vld [vmem:[%s4331_s5 + $0x8] sm:$0xff]   ;;  %v3518_v55 = vld [vmem:[%s4331_s5] sm:$0xff]  }
  0x3e   :  { %2858 = vmatpush3.bf16.msra.mxu0 %v3025_v3  ;;  %v193_v23 = vpack.c.bf16 %v3477_v22, %v3474_v21  ;;  %v194_v32 = vpack.c.bf16 %v3489_v31, %v3486_v30 }
  0x3f   :  { %2859 = vmatprep.subr.bf16.mxu0 %v3027_v8  ;;  %367 = vmatpush1.bf16.msra.mxu1 %v3455_v11 }
  0x40   :  { %368 = vmatprep.subr.bf16.mxu1 %v3458_v12  ;;  %2869 = vmatprep.mubr.bf16.mxu0 %v193_v23  ;;  %v161_v23 = vld [vmem:[%s4326_s0] sm:$0xff]  ;;  %s3356_s0 = smov 96  }
  0x41   :  { %v3550_v24 = vadd.s32 4294967295, %v161_v23 }
  0x42   :  { %2860 = vmatpush3.bf16.msra.mxu0 %v3027_v8 }
  0x43   :  { %2861 = vmatprep.subr.bf16.mxu0 %v3032_v10  ;;  %369 = vmatpush1.bf16.msra.mxu1 %v3468_v18  ;;  %vm507_vm2 = vcmp.gt.s32.totalorder %v3550_v24, 0  ;;  %vm684_vm5 = vcmp.gt.s32.totalorder %v3550_v24, 1  ;;  %vm861_vm7 = vcmp.gt.s32.totalorder %v3550_v24, 2  ;;  %vm1038_vm9 = vcmp.gt.s32.totalorder %v3550_v24, 3 }
  0x44   :  { %2877 = vmatprep.subr.bf16.mxu1 %v3354_v54  ;;  %v517_v27 = vsel %vm507_vm2, 1, %v3352_v0  ;;  %vm1215_vm11 = vcmp.gt.s32.totalorder %v3550_v24, 4  ;;  %vm1392_vm13 = vcmp.gt.s32.totalorder %v3550_v24, 5  ;;  %vm1569_vm15 = vcmp.gt.s32.totalorder %v3550_v24, 6 }
  0x46   :  { %2862 = vmatpush3.bf16.msra.mxu0 %v3032_v10  ;;  %387 = vmatmul.mubr.bf16.vlgmr.msra.gmra.mxu1 %v3352_v0 }
  0x47   :  { %2863 = vmatprep.subr.bf16.mxu0 %v3037_v14  ;;  %2881 = vmatprep.mubr.msk.bf16.mxu1 %vm3355_vm0, %v3354_v54 }
  0x48   :  { %2878 = vmatpush3.bf16.msra.mxu1 %v3509_v53 }
  0x49   :  { %2879 = vmatprep.subr.bf16.mxu1 %v3354_v54 }
  0x4a   :  { %2864 = vmatpush3.bf16.msra.mxu0 %v3037_v14 }
  0x4b   :  { %2865 = vmatprep.subr.bf16.mxu0 %v3042_v26 }
  0x4c   :  { %2880 = vmatpush3.bf16.msra.mxu1 %v3518_v55 }
  0x4d   :  { %548 = vmatprep.subr.bf16.mxu1 %v3441_v4 }
  0x4e   :  { %2866 = vmatpush3.bf16.msra.mxu0 %v3042_v26 }
  0x4f   :  { %2867 = vmatprep.subr.bf16.mxu0 %v3047_v29 }
  0x52   :  { %2868 = vmatpush3.bf16.msra.mxu0 %v3047_v29 }
  0x53   :  { %2885 = vmatprep.subr.bf16.mxu0 %v3354_v54 }
  0x55   :  { %2870 = vmatmul.mubr.bf16.vlgmr.msra.gmra.mxu0 %v194_v32 }
  0x56   :  { %2886 = vmatpush3.bf16.msra.mxu0 %v3509_v53 }
  0x57   :  { %2887 = vmatprep.subr.bf16.mxu0 %v3354_v54 }
  0x5a   :  { %2888 = vmatpush3.bf16.msra.mxu0 %v3518_v55 }
  0x5b   :  { %2893 = vmatprep.subr.bf16.mxu0 %v3354_v54 }
 0x106   :  { %v388_v33 = vpop.f32.mrf.mxu1 }
 0x108   :  { %v390_v34 = vpop.f32.mrf.mxu1 }
 0x10a   :  { %v392_v35 = vpop.f32.mrf.mxu1 }
 0x10c   :  { %v393_v36 = vpop.f32.mrf.mxu1 }
 0x115   :  { %v3493_v37 = vpop.f32.mrf.mxu0 }
 0x117   :  { %v279_v39 = vpop.f32.mrf.mxu0 }
 0x118   :  { %v280_v40 = vadd.f32 %v3498_v38, %v279_v39 }
 0x11a   :  { %v395_v41 = vadd.f32 %v388_v33, %v280_v40 }
 0x11c   :  { %v2706_v42 = vmul.f32 -1.442695, %v395_v41 }
 0x11e   :  { %3061 = vpow2.f32 %v2706_v42 }
 0x12b   :  { %v3062_v43 = vpop.eup %3061 }
 0x12c   :  { %v399_v44 = vadd.f32 1.0, %v3062_v43 }
 0x12e   :  { %3063 = vrcp.f32 %v399_v44 }
 0x13b   :  { %v3064_v45 = vpop.eup %3063 }
 0x13c   :  { %v402_v46 = vmul.f32 2.0, %v3064_v45  ;;  %v404_v50 = vmul.f32 0.0, %v3064_v45 }
 0x13e   :  { %v2707_v47 = vadd.f32 -1.0, %v402_v46 }
 0x140   :  { %406 = vrot.lane.b32.xlu0 %v2707_v47, %s3350_s17  ;;  %v3580_v47 = vpop.f32.mrf.mxu0 }
 0x1b2   :  { %v407_v48 = vpop.permute.xlu0 %406 }
 0x1b3   :  { %v409_v49 = vmul.f32 %v3064_v45, %v407_v48  ;;  %v282_v48 = vpop.f32.mrf.mxu0 }
 0x1b5   :  { %411 = vrot.lane.b32.xlu0 %v409_v49, %s3353_s23  ;;  %v283_v49 = vadd.f32 %v3498_v38, %v282_v48 }
 0x227   :  { %v412_v51 = vpop.permute.xlu0 %411 }
 0x228   :  { %v3503_v52 = vadd.f32 %v412_v51, %v404_v50 }
 0x22a   :  { %3065 = vtanh.f32 %v3503_v52 }
 0x237   :  { %v3066_v56 = vpop.eup %3065 }
 0x238   :  { %417 = vrot.lane.b32.xlu1 %v3066_v56, %s3350_s17 }
 0x2aa   :  { %v418_v57 = vpop.permute.xlu1 %417 }
 0x2ab   :  { %v420_v58 = vmul.f32 %v3064_v45, %v418_v57 }
 0x2ad   :  { %v421_v59 = vpack.c.bf16 %v420_v58, %v420_v58 }
 0x2af   :  { %423 = vrot.lane.b32.xlu1 %v421_v59, %s3353_s23 }
 0x321   :  { %v424_v60 = vpop.permute.xlu1 %423 }
 0x322   :  { %2882 = vmatmul.mubr.msk.bf16.vlgmr.msra.gmra.mxu1 %vm437_vm1, %v424_v60 }
 0x323   :  { %549 = vmatpush1.bf16.msra.mxu1 %v3443_v5  ;;  %572 = vmatprep.mubr.bf16.mxu1 %v3352_v0 }
 0x324   :  { %550 = vmatprep.subr.bf16.mxu1 %v3447_v6 }
 0x327   :  { %551 = vmatpush1.bf16.msra.mxu1 %v3449_v7 }
 0x328   :  { %552 = vmatprep.subr.bf16.mxu1 %v3452_v9 }
 0x32b   :  { %553 = vmatpush1.bf16.msra.mxu1 %v3455_v11 }
 0x32c   :  { %554 = vmatprep.subr.bf16.mxu1 %v3458_v12 }
 0x32f   :  { %555 = vmatpush1.bf16.msra.mxu1 %v3468_v18 }
 0x330   :  { %725 = vmatprep.subr.bf16.mxu1 %v3441_v4 }
 0x3e2   :  { %v475_v62 = vpop.f32.mrf.mxu1 }
 0x3e3   :  { %v476_v63 = vadd.f32 %v475_v62, %v390_v34 }
 0x3e4   :  { %v2883_v1 = vpop.f32.mrf.mxu1 }
 0x3e5   :  { %v481_v2 = vadd.f32 %v3543_v61, %v476_v63 }
 0x3e6   :  { %v478_v3 = vpop.f32.mrf.mxu1 }
 0x3e7   :  { %v2711_v8 = vmul.f32 -1.442695, %v481_v2 }
 0x3e8   :  { %v2884_v10 = vpop.f32.mrf.mxu1 }
 0x3e9   :  { %3067 = vpow2.f32 %v2711_v8 }
 0x3f6   :  { %v3068_v14 = vpop.eup %3067 }
 0x3f7   :  { %v485_v16 = vadd.f32 1.0, %v3068_v14 }
 0x3f9   :  { %3069 = vrcp.f32 %v485_v16 }
 0x406   :  { %v3070_v17 = vpop.eup %3069 }
 0x407   :  { %v488_v19 = vmul.f32 2.0, %v3070_v17  ;;  %v490_v28 = vmul.f32 0.0, %v3070_v17 }
 0x409   :  { %v2712_v20 = vadd.f32 -1.0, %v488_v19  ;;  %v168_v19 = vld [vmem:[#allocation2 + $0x28] sm:$0xff] }
 0x40b   :  { %492 = vrot.lane.b32.xlu0 %v2712_v20, %s3350_s17  ;;  %v169_v20 = vld [vmem:[#allocation2 + $0x30] sm:$0xff] }
 0x47d   :  { %v493_v25 = vpop.permute.xlu0 %492 }
 0x47e   :  { %v495_v26 = vmul.f32 %v3070_v17, %v493_v25  ;;  %v176_v25 = vsub.f32 %v168_v19, %v3463_v13 }
 0x480   :  { %497 = vrot.lane.b32.xlu1 %v495_v26, %s3353_s23  ;;  %v170_v26 = vld [vmem:[#allocation2 + $0x38] sm:$0xff] }
 0x484   :  { %519 = vperm.xlu1 %3019, %v517_v27   ;;  %v177_v27 = vsub.f32 %v169_v20, %v3463_v13 }
 0x4f2   :  { %v498_v29 = vpop.permute.xlu1 %497 }
 0x4f3   :  { %v500_v32 = vadd.f32 %v498_v29, %v490_v28  ;;  %v178_v28 = vsub.f32 %v170_v26, %v3463_v13 }
 0x4f5   :  { %3071 = vtanh.f32 %v500_v32 }
 0x4ff   :  { %v520_v39 = vpop.permute.xlu1 %519 }
 0x500   :  { %vm521_vm3 = vcmp.eq.s32.totalorder %v520_v39, 1 }
 0x502   :  { %v3072_v33 = vpop.eup %3071 }
 0x503   :  { %503 = vrot.lane.b32.xlu0 %v3072_v33, %s3350_s17  ;;  %v3599_v33 = vmul.f32 %v3465_v15, %v177_v27 }
 0x507   :  { %509 = vrot.lane.b32.xlu0 %v420_v58, %s3353_s23 }
 0x50b   :  { %524 = vrot.lane.b32.xlu0 %v3503_v52, %s3356_s0 }
 0x575   :  { %v504_v34 = vpop.permute.xlu0 %503 }
 0x576   :  { %v506_v35 = vmul.f32 %v3070_v17, %v504_v34  ;;  %v167_v17 = vld [vmem:[#allocation2 + $0x20] sm:$0xff]  ;;  %v3602_v34 = vmul.f32 %v3465_v15, %v178_v28 }
 0x577   :  { %v175_v23 = vsub.f32 %v167_v17, %v3463_v13 }
 0x578   :  { %513 = vrot.lane.b32.xlu1 %v506_v35, %s3350_s17 }
 0x579   :  { %v510_v36 = vpop.permute.xlu0 %509  ;;  %v3593_v29 = vmul.f32 %v3465_v15, %v175_v23 }
 0x57d   :  { %v525_v40 = vpop.permute.xlu0 %524 }
 0x57e   :  { %v527_v41 = vsel %vm437_vm1, %v525_v40, %v500_v32  ;;  %v3596_v32 = vmul.f32 %v3465_v15, %v176_v25 }
 0x57f   :  { %v3561_v42 = vsel %vm521_vm3, %v527_v41, 0.0 }
 0x580   :  { %591 = vrot.lane.b32.xlu0 %v3561_v42, %s3353_s23  ;;  %v195_v35 = vpack.c.bf16 %v3596_v32, %v3593_v29 }
 0x582   :  { %2873 = vmatprep.mubr.bf16.mxu0 %v195_v35 }
 0x5ea   :  { %v514_v43 = vpop.permute.xlu1 %513 }
 0x5eb   :  { %v516_v44 = vsel %vm437_vm1, %v510_v36, %v514_v43  ;;  %v196_v36 = vpack.c.bf16 %v3602_v34, %v3599_v33 }
 0x5ec   :  { %v3566_v45 = vsel %vm521_vm3, %v516_v44, 0.0  ;;  %vm529_vm3 = vcmp.eq.s32.totalorder %v3550_v24, 0 }
 0x5ed   :  { %v536_v46 = vpack.c.bf16 %v3566_v45, %v3566_v45  ;;  %2874 = vmatmul.mubr.bf16.gmra.mxu0 %v196_v36 }
 0x5ee   :  { %2889 = vmatprep.mubr.msk.bf16.mxu0 %vm3355_vm0, %v3354_v54 }
 0x5ef   :  { %2713 = vmatmul.mubr.msk.bf16.vlgmr.msra.gmra.mxu1 %vm350_vm4, %v536_v46 }
 0x5f0   :  { %726 = vmatpush1.bf16.msra.mxu1 %v3443_v5  ;;  %749 = vmatprep.mubr.bf16.mxu1 %v3352_v0 }
 0x5f1   :  { %727 = vmatprep.subr.bf16.mxu1 %v3447_v6 }
 0x5f2   :  { %v592_v8 = vpop.permute.xlu0 %591 }
 0x5f4   :  { %728 = vmatpush1.bf16.msra.mxu1 %v3449_v7 }
 0x5f5   :  { %729 = vmatprep.subr.bf16.mxu1 %v3452_v9 }
 0x5f8   :  { %730 = vmatpush1.bf16.msra.mxu1 %v3455_v11 }
 0x5f9   :  { %731 = vmatprep.subr.bf16.mxu1 %v3458_v12 }
 0x5fc   :  { %732 = vmatpush1.bf16.msra.mxu1 %v3468_v18 }
 0x5fd   :  { %2901 = vmatprep.subr.bf16.mxu1 %v3354_v54 }
 0x6ad   :  { %v3619_v43 = vpop.f32.mrf.mxu0 }
 0x6af   :  { %v574_v50 = vpop.f32.mrf.mxu1  ;;  %v3621_v44 = vpop.f32.mrf.mxu0 }
 0x6b0   :  { %v581_v51 = vadd.f32 %v574_v50, %v283_v49 }
 0x6b1   :  { %v576_v52 = vpop.f32.mrf.mxu1  ;;  %v3623_v46 = vpop.f32.mrf.mxu0 }
 0x6b2   :  { %v2714_v56 = vmul.f32 -1.442695, %v581_v51 }
 0x6b3   :  { %v578_v57 = vpop.f32.mrf.mxu1  ;;  %v3625_v48 = vpop.f32.mrf.mxu0 }
 0x6b4   :  { %3073 = vpow2.f32 %v2714_v56 }
 0x6b5   :  { %v579_v58 = vpop.f32.mrf.mxu1 }
 0x6c1   :  { %v3074_v59 = vpop.eup %3073 }
 0x6c2   :  { %v585_v60 = vadd.f32 1.0, %v3074_v59 }
 0x6c4   :  { %3075 = vrcp.f32 %v585_v60 }
 0x6d1   :  { %v3076_v62 = vpop.eup %3075 }
 0x6d2   :  { %v588_v63 = vmul.f32 2.0, %v3076_v62  ;;  %v594_v10 = vmul.f32 %v3076_v62, %v592_v8 }
 0x6d4   :  { %v2715_v1 = vadd.f32 -1.0, %v588_v63 }
 0x6d6   :  { %596 = vrot.lane.b32.xlu1 %v2715_v1, %s3350_s17 }
 0x748   :  { %v597_v2 = vpop.permute.xlu1 %596 }
 0x749   :  { %v599_v3 = vmul.f32 %v3076_v62, %v597_v2 }
 0x74b   :  { %601 = vrot.lane.b32.xlu1 %v599_v3, %s3353_s23 }
 0x7bd   :  { %v602_v14 = vpop.permute.xlu1 %601 }
 0x7be   :  { %v3585_v16 = vadd.f32 %v602_v14, %v594_v10 }
 0x7c0   :  { %3077 = vtanh.f32 %v3585_v16 }
 0x7cd   :  { %v3078_v13 = vpop.eup %3077 }
 0x7ce   :  { %607 = vrot.lane.b32.xlu0 %v3078_v13, %s3350_s17 }
 0x840   :  { %v608_v39 = vpop.permute.xlu0 %607 }
 0x841   :  { %v610_v40 = vmul.f32 %v3076_v62, %v608_v39 }
 0x843   :  { %v611_v41 = vpack.c.bf16 %v610_v40, %v610_v40 }
 0x845   :  { %613 = vrot.lane.b32.xlu1 %v611_v41, %s3353_s23 }
 0x8b7   :  { %v614_v15 = vpop.permute.xlu1 %613 }
 0x8b8   :  { %2890 = vmatmul.mubr.msk.bf16.vlgmr.msra.gmra.mxu0 %vm437_vm1, %v614_v15 }
 0x8b9   :  { %2894 = vmatpush3.bf16.msra.mxu0 %v3509_v53  ;;  %2897 = vmatprep.mubr.msk.bf16.mxu0 %vm3355_vm0, %v3354_v54 }
 0x8ba   :  { %2895 = vmatprep.subr.bf16.mxu0 %v3354_v54 }
 0x8bd   :  { %2896 = vmatpush3.bf16.msra.mxu0 %v3518_v55 }
 0x8be   :  { %902 = vmatprep.subr.bf16.mxu0 %v3441_v4 }
 0x978   :  { %v652_v49 = vpop.f32.mrf.mxu0 }
 0x979   :  { %v653_v50 = vadd.f32 %v652_v49, %v576_v52  ;;  %v694_v52 = vsel %vm684_vm5, 1, %v3352_v0  ;;  %vm883_vm5 = vcmp.eq.s32.totalorder %v3550_v24, 2 }
 0x97a   :  { %v2891_v51 = vpop.f32.mrf.mxu0 }
 0x97b   :  { %v658_v56 = vadd.f32 %v3543_v61, %v653_v50 }
 0x97c   :  { %v655_v57 = vpop.f32.mrf.mxu0 }
 0x97d   :  { %v2717_v58 = vmul.f32 -1.442695, %v658_v56 }
 0x97e   :  { %v2892_v59 = vpop.f32.mrf.mxu0 }
 0x97f   :  { %3079 = vpow2.f32 %v2717_v58 }
 0x98c   :  { %v3080_v60 = vpop.eup %3079 }
 0x98d   :  { %v662_v62 = vadd.f32 1.0, %v3080_v60 }
 0x98f   :  { %3081 = vrcp.f32 %v662_v62 }
 0x99c   :  { %v3082_v63 = vpop.eup %3081 }
 0x99d   :  { %v665_v1 = vmul.f32 2.0, %v3082_v63  ;;  %v667_v10 = vmul.f32 %v3082_v63, %v3561_v42 }
 0x99f   :  { %v2718_v2 = vadd.f32 -1.0, %v665_v1 }
 0x9a1   :  { %669 = vrot.lane.b32.xlu0 %v2718_v2, %s3350_s17 }
 0xa13   :  { %v670_v3 = vpop.permute.xlu0 %669 }
 0xa14   :  { %v672_v8 = vmul.f32 %v3082_v63, %v670_v3 }
 0xa16   :  { %674 = vrot.lane.b32.xlu1 %v672_v8, %s3353_s23 }
 0xa1a   :  { %696 = vperm.xlu1 %3019, %v694_v52  }
 0xa88   :  { %v675_v14 = vpop.permute.xlu1 %674 }
 0xa89   :  { %v677_v17 = vadd.f32 %v675_v14, %v667_v10 }
 0xa8b   :  { %3083 = vtanh.f32 %v677_v17 }
 0xa95   :  { %v697_v26 = vpop.permute.xlu1 %696 }
 0xa96   :  { %vm698_vm6 = vcmp.eq.s32.totalorder %v697_v26, 1 }
 0xa98   :  { %v3084_v19 = vpop.eup %3083 }
 0xa99   :  { %680 = vrot.lane.b32.xlu0 %v3084_v19, %s3350_s17 }
 0xa9d   :  { %686 = vrot.lane.b32.xlu0 %v610_v40, %s3353_s23 }
 0xaa1   :  { %701 = vrot.lane.b32.xlu0 %v3585_v16, %s3356_s0 }
 0xb0b   :  { %v681_v20 = vpop.permute.xlu0 %680 }
 0xb0c   :  { %v683_v23 = vmul.f32 %v3082_v63, %v681_v20 }
 0xb0e   :  { %690 = vrot.lane.b32.xlu1 %v683_v23, %s3350_s17 }
 0xb0f   :  { %v687_v25 = vpop.permute.xlu0 %686 }
 0xb13   :  { %v702_v27 = vpop.permute.xlu0 %701 }
 0xb14   :  { %v704_v28 = vsel %vm437_vm1, %v702_v27, %v677_v17 }
 0xb15   :  { %v3640_v35 = vsel %vm698_vm6, %v704_v28, %v3561_v42  ;;  %v288_v42 = vadd.f32 %v3493_v37, %v3498_v38 }
 0xb16   :  { %768 = vrot.lane.b32.xlu0 %v3640_v35, %s3353_s23 }
 0xb80   :  { %v691_v36 = vpop.permute.xlu1 %690 }
 0xb81   :  { %v693_v13 = vsel %vm437_vm1, %v687_v25, %v691_v36 }
 0xb82   :  { %v3646_v16 = vsel %vm698_vm6, %v693_v13, %v3566_v45  ;;  %vm1060_vm6 = vcmp.eq.s32.totalorder %v3550_v24, 3 }
 0xb83   :  { %v713_v39 = vpack.c.bf16 %v3646_v16, %v3646_v16 }
 0xb85   :  { %2719 = vmatmul.mubr.msk.bf16.vlgmr.msra.gmra.mxu1 %vm350_vm4, %v713_v39 }
 0xb86   :  { %2902 = vmatpush3.bf16.msra.mxu1 %v3509_v53  ;;  %2905 = vmatprep.mubr.msk.bf16.mxu1 %vm3355_vm0, %v3354_v54 }
 0xb87   :  { %2903 = vmatprep.subr.bf16.mxu1 %v3354_v54 }
 0xb88   :  { %v769_v37 = vpop.permute.xlu0 %768 }
 0xb8a   :  { %2904 = vmatpush3.bf16.msra.mxu1 %v3518_v55 }
 0xb8b   :  { %1079 = vmatprep.subr.bf16.mxu1 %v3441_v4 }
 0xc45   :  { %v751_v45 = vpop.f32.mrf.mxu1 }
 0xc46   :  { %v758_v40 = vadd.f32 %v751_v45, %v288_v42 }
 0xc47   :  { %v753_v41 = vpop.f32.mrf.mxu1 }
 0xc48   :  { %v2720_v15 = vmul.f32 -1.442695, %v758_v40 }
 0xc49   :  { %v755_v49 = vpop.f32.mrf.mxu1 }
 0xc4a   :  { %3085 = vpow2.f32 %v2720_v15 }
 0xc4b   :  { %v756_v50 = vpop.f32.mrf.mxu1 }
 0xc57   :  { %v3086_v51 = vpop.eup %3085 }
 0xc58   :  { %v762_v56 = vadd.f32 1.0, %v3086_v51 }
 0xc5a   :  { %3087 = vrcp.f32 %v762_v56 }
 0xc67   :  { %v3088_v57 = vpop.eup %3087 }
 0xc68   :  { %v765_v58 = vmul.f32 2.0, %v3088_v57  ;;  %v771_v63 = vmul.f32 %v3088_v57, %v769_v37 }
 0xc6a   :  { %v2721_v59 = vadd.f32 -1.0, %v765_v58 }
 0xc6c   :  { %773 = vrot.lane.b32.xlu1 %v2721_v59, %s3350_s17 }
 0xcde   :  { %v774_v60 = vpop.permute.xlu1 %773 }
 0xcdf   :  { %v776_v62 = vmul.f32 %v3088_v57, %v774_v60 }
 0xce1   :  { %778 = vrot.lane.b32.xlu1 %v776_v62, %s3353_s23 }
 0xd53   :  { %v779_v1 = vpop.permute.xlu1 %778 }
 0xd54   :  { %v781_v2 = vadd.f32 %v779_v1, %v771_v63 }
 0xd56   :  { %3089 = vtanh.f32 %v781_v2 }
 0xd63   :  { %v3090_v3 = vpop.eup %3089 }
 0xd64   :  { %784 = vrot.lane.b32.xlu0 %v3090_v3, %s3350_s17 }
 0xdd6   :  { %v785_v8 = vpop.permute.xlu0 %784 }
 0xdd7   :  { %v787_v52 = vmul.f32 %v3088_v57, %v785_v8 }
 0xdd9   :  { %v788_v10 = vpack.c.bf16 %v787_v52, %v787_v52 }
 0xddb   :  { %790 = vrot.lane.b32.xlu1 %v788_v10, %s3353_s23 }
 0xe4d   :  { %v791_v14 = vpop.permute.xlu1 %790 }
 0xe4e   :  { %2898 = vmatmul.mubr.msk.bf16.vlgmr.msra.gmra.mxu0 %vm437_vm1, %v791_v14 }
 0xe4f   :  { %903 = vmatpush1.bf16.msra.mxu0 %v3443_v5  ;;  %926 = vmatprep.mubr.bf16.mxu0 %v3352_v0 }
 0xe50   :  { %904 = vmatprep.subr.bf16.mxu0 %v3447_v6 }
 0xe53   :  { %905 = vmatpush1.bf16.msra.mxu0 %v3449_v7 }
 0xe54   :  { %906 = vmatprep.subr.bf16.mxu0 %v3452_v9 }
 0xe57   :  { %907 = vmatpush1.bf16.msra.mxu0 %v3455_v11 }
 0xe58   :  { %908 = vmatprep.subr.bf16.mxu0 %v3458_v12 }
 0xe5b   :  { %909 = vmatpush1.bf16.msra.mxu0 %v3468_v18 }
 0xe5c   :  { %2909 = vmatprep.subr.bf16.mxu0 %v3354_v54 }
 0xf0e   :  { %v829_v17 = vpop.f32.mrf.mxu0 }
 0xf0f   :  { %v830_v19 = vadd.f32 %v829_v17, %v753_v41  ;;  %v871_v41 = vsel %vm861_vm7, 1, %v3352_v0  ;;  %vm1414_vm7 = vcmp.eq.s32.totalorder %v3550_v24, 5 }
 0xf10   :  { %v2899_v20 = vpop.f32.mrf.mxu0 }
 0xf11   :  { %v835_v23 = vadd.f32 %v3543_v61, %v830_v19 }
 0xf12   :  { %v832_v25 = vpop.f32.mrf.mxu0 }
 0xf13   :  { %v2723_v26 = vmul.f32 -1.442695, %v835_v23 }
 0xf14   :  { %v2900_v27 = vpop.f32.mrf.mxu0 }
 0xf15   :  { %3091 = vpow2.f32 %v2723_v26 }
 0xf22   :  { %v3092_v28 = vpop.eup %3091 }
 0xf23   :  { %v839_v36 = vadd.f32 1.0, %v3092_v28 }
 0xf25   :  { %3093 = vrcp.f32 %v839_v36 }
 0xf32   :  { %v3094_v13 = vpop.eup %3093 }
 0xf33   :  { %v842_v39 = vmul.f32 2.0, %v3094_v13  ;;  %v844_v15 = vmul.f32 %v3094_v13, %v3640_v35 }
 0xf35   :  { %v2724_v42 = vadd.f32 -1.0, %v842_v39 }
 0xf37   :  { %846 = vrot.lane.b32.xlu0 %v2724_v42, %s3350_s17 }
 0xfa9   :  { %v847_v45 = vpop.permute.xlu0 %846 }
 0xfaa   :  { %v849_v40 = vmul.f32 %v3094_v13, %v847_v45 }
 0xfac   :  { %851 = vrot.lane.b32.xlu1 %v849_v40, %s3353_s23 }
 0xfb0   :  { %873 = vperm.xlu1 %3019, %v871_v41  }
0x101e   :  { %v852_v49 = vpop.permute.xlu1 %851 }
0x101f   :  { %v854_v50 = vadd.f32 %v852_v49, %v844_v15 }
0x1021   :  { %3095 = vtanh.f32 %v854_v50 }
0x102b   :  { %v874_v59 = vpop.permute.xlu1 %873 }
0x102c   :  { %vm875_vm8 = vcmp.eq.s32.totalorder %v874_v59, 1 }
0x102e   :  { %v3096_v51 = vpop.eup %3095 }
0x102f   :  { %857 = vrot.lane.b32.xlu0 %v3096_v51, %s3350_s17 }
0x1033   :  { %863 = vrot.lane.b32.xlu0 %v787_v52, %s3353_s23 }
0x1037   :  { %878 = vrot.lane.b32.xlu0 %v781_v2, %s3356_s0 }
0x10a1   :  { %v858_v56 = vpop.permute.xlu0 %857 }
0x10a2   :  { %v860_v57 = vmul.f32 %v3094_v13, %v858_v56 }
0x10a4   :  { %867 = vrot.lane.b32.xlu1 %v860_v57, %s3350_s17 }
0x10a5   :  { %v864_v58 = vpop.permute.xlu0 %863 }
0x10a9   :  { %v879_v60 = vpop.permute.xlu0 %878 }
0x10aa   :  { %v881_v62 = vsel %vm437_vm1, %v879_v60, %v854_v50 }
0x10ab   :  { %v3685_v37 = vsel %vm875_vm8, %v881_v62, %v3640_v35  ;;  %v291_v35 = vadd.f32 %v3580_v47, %v3498_v38 }
0x10ac   :  { %945 = vrot.lane.b32.xlu0 %v3685_v37, %s3353_s23 }
0x1116   :  { %v868_v63 = vpop.permute.xlu1 %867 }
0x1117   :  { %v870_v1 = vsel %vm437_vm1, %v864_v58, %v868_v63 }
0x1118   :  { %v3691_v2 = vsel %vm875_vm8, %v870_v1, %v3646_v16  ;;  %vm1746_vm8 = vcmp.gt.s32.totalorder %v3550_v24, 7 }
0x1119   :  { %v890_v3 = vpack.c.bf16 %v3691_v2, %v3691_v2 }
0x111b   :  { %2725 = vmatmul.mubr.msk.bf16.vlgmr.msra.gmra.mxu0 %vm350_vm4, %v890_v3 }
0x111c   :  { %2910 = vmatpush3.bf16.msra.mxu0 %v3509_v53  ;;  %2913 = vmatprep.mubr.msk.bf16.mxu0 %vm3355_vm0, %v3354_v54 }
0x111d   :  { %2911 = vmatprep.subr.bf16.mxu0 %v3354_v54 }
0x111e   :  { %v946_v47 = vpop.permute.xlu0 %945 }
0x1120   :  { %2912 = vmatpush3.bf16.msra.mxu0 %v3518_v55 }
0x1121   :  { %1256 = vmatprep.subr.bf16.mxu0 %v3441_v4 }
0x11db   :  { %v928_v16 = vpop.f32.mrf.mxu0 }
0x11dc   :  { %v935_v8 = vadd.f32 %v928_v16, %v291_v35 }
0x11dd   :  { %v930_v52 = vpop.f32.mrf.mxu0 }
0x11de   :  { %v2726_v10 = vmul.f32 -1.442695, %v935_v8  ;;  %v1048_v8 = vsel %vm1038_vm9, 1, %v3352_v0  ;;  %vm706_vm9 = vcmp.eq.s32.totalorder %v3550_v24, 1 }
0x11df   :  { %v932_v14 = vpop.f32.mrf.mxu0 }
0x11e0   :  { %3097 = vpow2.f32 %v2726_v10 }
0x11e1   :  { %v933_v17 = vpop.f32.mrf.mxu0 }
0x11ed   :  { %v3098_v19 = vpop.eup %3097 }
0x11ee   :  { %v939_v20 = vadd.f32 1.0, %v3098_v19 }
0x11f0   :  { %3099 = vrcp.f32 %v939_v20 }
0x11fd   :  { %v3100_v23 = vpop.eup %3099 }
0x11fe   :  { %v942_v25 = vmul.f32 2.0, %v3100_v23  ;;  %v948_v36 = vmul.f32 %v3100_v23, %v946_v47 }
0x1200   :  { %v2727_v26 = vadd.f32 -1.0, %v942_v25 }
0x1202   :  { %950 = vrot.lane.b32.xlu1 %v2727_v26, %s3350_s17 }
0x1274   :  { %v951_v27 = vpop.permute.xlu1 %950 }
0x1275   :  { %v953_v28 = vmul.f32 %v3100_v23, %v951_v27 }
0x1277   :  { %955 = vrot.lane.b32.xlu1 %v953_v28, %s3353_s23 }
0x12e9   :  { %v956_v13 = vpop.permute.xlu1 %955 }
0x12ea   :  { %v958_v39 = vadd.f32 %v956_v13, %v948_v36 }
0x12ec   :  { %3101 = vtanh.f32 %v958_v39 }
0x12f9   :  { %v3102_v42 = vpop.eup %3101 }
0x12fa   :  { %961 = vrot.lane.b32.xlu0 %v3102_v42, %s3350_s17 }
0x136c   :  { %v962_v45 = vpop.permute.xlu0 %961 }
0x136d   :  { %v964_v40 = vmul.f32 %v3100_v23, %v962_v45 }
0x136f   :  { %v965_v41 = vpack.c.bf16 %v964_v40, %v964_v40 }
0x1371   :  { %967 = vrot.lane.b32.xlu1 %v965_v41, %s3353_s23 }
0x13e3   :  { %v968_v15 = vpop.permute.xlu1 %967 }
0x13e4   :  { %2906 = vmatmul.mubr.msk.bf16.vlgmr.msra.gmra.mxu1 %vm437_vm1, %v968_v15 }
0x13e5   :  { %1080 = vmatpush1.bf16.msra.mxu1 %v3443_v5  ;;  %1103 = vmatprep.mubr.bf16.mxu1 %v3352_v0 }
0x13e6   :  { %1081 = vmatprep.subr.bf16.mxu1 %v3447_v6 }
0x13e9   :  { %1082 = vmatpush1.bf16.msra.mxu1 %v3449_v7 }
0x13ea   :  { %1083 = vmatprep.subr.bf16.mxu1 %v3452_v9 }
0x13ed   :  { %1084 = vmatpush1.bf16.msra.mxu1 %v3455_v11 }
0x13ee   :  { %1085 = vmatprep.subr.bf16.mxu1 %v3458_v12 }
0x13f1   :  { %1086 = vmatpush1.bf16.msra.mxu1 %v3468_v18 }
0x13f2   :  { %2917 = vmatprep.subr.bf16.mxu1 %v3354_v54 }
0x14a4   :  { %v1006_v49 = vpop.f32.mrf.mxu1 }
0x14a5   :  { %v1007_v50 = vadd.f32 %v1006_v49, %v930_v52 }
0x14a6   :  { %v2907_v51 = vpop.f32.mrf.mxu1 }
0x14a7   :  { %v1012_v56 = vadd.f32 %v3543_v61, %v1007_v50 }
0x14a8   :  { %v1009_v57 = vpop.f32.mrf.mxu1 }
0x14a9   :  { %v2729_v58 = vmul.f32 -1.442695, %v1012_v56 }
0x14aa   :  { %v2908_v59 = vpop.f32.mrf.mxu1 }
0x14ab   :  { %3103 = vpow2.f32 %v2729_v58 }
0x14b8   :  { %v3104_v60 = vpop.eup %3103 }
0x14b9   :  { %v1016_v62 = vadd.f32 1.0, %v3104_v60 }
0x14bb   :  { %3105 = vrcp.f32 %v1016_v62 }
0x14c8   :  { %v3106_v63 = vpop.eup %3105 }
0x14c9   :  { %v1019_v1 = vmul.f32 2.0, %v3106_v63  ;;  %v1021_v52 = vmul.f32 %v3106_v63, %v3685_v37 }
0x14cb   :  { %v2730_v3 = vadd.f32 -1.0, %v1019_v1 }
0x14cd   :  { %1023 = vrot.lane.b32.xlu0 %v2730_v3, %s3350_s17 }
0x153f   :  { %v1024_v35 = vpop.permute.xlu0 %1023 }
0x1540   :  { %v1026_v16 = vmul.f32 %v3106_v63, %v1024_v35 }
0x1542   :  { %1028 = vrot.lane.b32.xlu1 %v1026_v16, %s3353_s23 }
0x1546   :  { %1050 = vperm.xlu1 %3019, %v1048_v8  }
0x15b4   :  { %v1029_v10 = vpop.permute.xlu1 %1028 }
0x15b5   :  { %v1031_v14 = vadd.f32 %v1029_v10, %v1021_v52 }
0x15b7   :  { %3107 = vtanh.f32 %v1031_v14 }
0x15c1   :  { %v1051_v25 = vpop.permute.xlu1 %1050 }
0x15c2   :  { %vm1052_vm10 = vcmp.eq.s32.totalorder %v1051_v25, 1 }
0x15c4   :  { %v3108_v17 = vpop.eup %3107 }
0x15c5   :  { %1034 = vrot.lane.b32.xlu0 %v3108_v17, %s3350_s17 }
0x15c9   :  { %1040 = vrot.lane.b32.xlu0 %v964_v40, %s3353_s23 }
0x15cd   :  { %1055 = vrot.lane.b32.xlu0 %v958_v39, %s3356_s0 }
0x1637   :  { %v1035_v19 = vpop.permute.xlu0 %1034 }
0x1638   :  { %v1037_v20 = vmul.f32 %v3106_v63, %v1035_v19 }
0x163a   :  { %1044 = vrot.lane.b32.xlu1 %v1037_v20, %s3350_s17 }
0x163b   :  { %v1041_v23 = vpop.permute.xlu0 %1040 }
0x163f   :  { %v1056_v26 = vpop.permute.xlu0 %1055 }
0x1640   :  { %v1058_v27 = vsel %vm437_vm1, %v1056_v26, %v1031_v14 }
0x1641   :  { %v3730_v28 = vsel %vm1052_vm10, %v1058_v27, %v3685_v37  ;;  %v296_v37 = vadd.f32 %v3498_v38, %v3621_v44 }
0x1642   :  { %1122 = vrot.lane.b32.xlu0 %v3730_v28, %s3353_s23 }
0x16ac   :  { %v1045_v47 = vpop.permute.xlu1 %1044 }
0x16ad   :  { %v1047_v36 = vsel %vm437_vm1, %v1041_v23, %v1045_v47  ;;  %v1225_v23 = vsel %vm1215_vm11, 1, %v3352_v0  ;;  %vm1591_vm11 = vcmp.eq.s32.totalorder %v3550_v24, 6 }
0x16ae   :  { %v3736_v13 = vsel %vm1052_vm10, %v1047_v36, %v3691_v2  ;;  %vm1237_vm10 = vcmp.eq.s32.totalorder %v3550_v24, 4 }
0x16af   :  { %v1067_v39 = vpack.c.bf16 %v3736_v13, %v3736_v13 }
0x16b1   :  { %2731 = vmatmul.mubr.msk.bf16.vlgmr.msra.gmra.mxu1 %vm350_vm4, %v1067_v39 }
0x16b2   :  { %2918 = vmatpush3.bf16.msra.mxu1 %v3509_v53  ;;  %2921 = vmatprep.mubr.msk.bf16.mxu1 %vm3355_vm0, %v3354_v54 }
0x16b3   :  { %2919 = vmatprep.subr.bf16.mxu1 %v3354_v54 }
0x16b4   :  { %v1123_v44 = vpop.permute.xlu0 %1122 }
0x16b6   :  { %2920 = vmatpush3.bf16.msra.mxu1 %v3518_v55 }
0x16b7   :  { %1433 = vmatprep.subr.bf16.mxu1 %v3441_v4 }
0x1771   :  { %v1105_v2 = vpop.f32.mrf.mxu1 }
0x1772   :  { %v1112_v42 = vadd.f32 %v1105_v2, %v296_v37 }
0x1773   :  { %v1107_v45 = vpop.f32.mrf.mxu1 }
0x1774   :  { %v2732_v40 = vmul.f32 -1.442695, %v1112_v42 }
0x1775   :  { %v1109_v41 = vpop.f32.mrf.mxu1 }
0x1776   :  { %3109 = vpow2.f32 %v2732_v40 }
0x1777   :  { %v1110_v15 = vpop.f32.mrf.mxu1 }
0x1783   :  { %v3110_v49 = vpop.eup %3109 }
0x1784   :  { %v1116_v50 = vadd.f32 1.0, %v3110_v49 }
0x1786   :  { %3111 = vrcp.f32 %v1116_v50 }
0x1793   :  { %v3112_v51 = vpop.eup %3111 }
0x1794   :  { %v1119_v56 = vmul.f32 2.0, %v3112_v51  ;;  %v1125_v59 = vmul.f32 %v3112_v51, %v1123_v44 }
0x1796   :  { %v2733_v57 = vadd.f32 -1.0, %v1119_v56 }
0x1798   :  { %1127 = vrot.lane.b32.xlu1 %v2733_v57, %s3350_s17 }
0x180a   :  { %v1128_v58 = vpop.permute.xlu1 %1127 }
0x180b   :  { %v1130_v4 = vmul.f32 %v3112_v51, %v1128_v58 }
0x180d   :  { %1132 = vrot.lane.b32.xlu1 %v1130_v4, %s3353_s23 }
0x187f   :  { %v1133_v60 = vpop.permute.xlu1 %1132 }
0x1880   :  { %v1135_v62 = vadd.f32 %v1133_v60, %v1125_v59 }
0x1882   :  { %3113 = vtanh.f32 %v1135_v62 }
0x188f   :  { %v3114_v63 = vpop.eup %3113 }
0x1890   :  { %1138 = vrot.lane.b32.xlu0 %v3114_v63, %s3350_s17 }
0x1902   :  { %v1139_v1 = vpop.permute.xlu0 %1138 }
0x1903   :  { %v1141_v3 = vmul.f32 %v3112_v51, %v1139_v1 }
0x1905   :  { %v1142_v35 = vpack.c.bf16 %v1141_v3, %v1141_v3 }
0x1907   :  { %1144 = vrot.lane.b32.xlu1 %v1142_v35, %s3353_s23 }
0x1979   :  { %v1145_v16 = vpop.permute.xlu1 %1144 }
0x197a   :  { %2914 = vmatmul.mubr.msk.bf16.vlgmr.msra.gmra.mxu0 %vm437_vm1, %v1145_v16 }
0x197b   :  { %1257 = vmatpush1.bf16.msra.mxu0 %v3443_v5  ;;  %1280 = vmatprep.mubr.bf16.mxu0 %v3352_v0 }
0x197c   :  { %1258 = vmatprep.subr.bf16.mxu0 %v3447_v6 }
0x197f   :  { %1259 = vmatpush1.bf16.msra.mxu0 %v3449_v7 }
0x1980   :  { %1260 = vmatprep.subr.bf16.mxu0 %v3452_v9 }
0x1983   :  { %1261 = vmatpush1.bf16.msra.mxu0 %v3455_v11 }
0x1984   :  { %1262 = vmatprep.subr.bf16.mxu0 %v3458_v12 }
0x1987   :  { %1263 = vmatpush1.bf16.msra.mxu0 %v3468_v18 }
0x1988   :  { %2925 = vmatprep.subr.bf16.mxu0 %v3354_v54 }
0x1a3a   :  { %v1183_v8 = vpop.f32.mrf.mxu0 }
0x1a3b   :  { %v1184_v52 = vadd.f32 %v1183_v8, %v1107_v45 }
0x1a3c   :  { %v2915_v10 = vpop.f32.mrf.mxu0 }
0x1a3d   :  { %v1189_v5 = vadd.f32 %v3543_v61, %v1184_v52 }
0x1a3e   :  { %v1186_v14 = vpop.f32.mrf.mxu0 }
0x1a3f   :  { %v2735_v17 = vmul.f32 -1.442695, %v1189_v5  ;;  %v3801_v14 = vld [vmem:[#allocation7 + $0xb0] ss:$8 sps:$4 sm:$0xff]  }
0x1a40   :  { %v2916_v6 = vpop.f32.mrf.mxu0 }
0x1a41   :  { %3115 = vpow2.f32 %v2735_v17  ;;  %v3805_v17 = vld [vmem:[#allocation7 + $0xa4] ss:$8 sps:$4 sm:$0xff]   ;;  %v3808_v6 = vld [vmem:[#allocation7 + $0xa0] ss:$8 sps:$4 sm:$0xff]  }
0x1a4e   :  { %v3116_v7 = vpop.eup %3115 }
0x1a4f   :  { %v1193_v19 = vadd.f32 1.0, %v3116_v7  ;;  %v3811_v7 = vld [vmem:[#allocation7 + $0x94] ss:$8 sps:$4 sm:$0xff]  }
0x1a51   :  { %3117 = vrcp.f32 %v1193_v19  ;;  %v3814_v19 = vld [vmem:[#allocation7 + $0x90] ss:$8 sps:$4 sm:$0xff]  }
0x1a5e   :  { %v3118_v9 = vpop.eup %3117 }
0x1a5f   :  { %v1196_v11 = vmul.f32 2.0, %v3118_v9  ;;  %v1198_v25 = vmul.f32 %v3118_v9, %v3730_v28 }
0x1a61   :  { %v2736_v20 = vadd.f32 -1.0, %v1196_v11  ;;  %v3820_v11 = vld [vmem:[#allocation7 + $0x80] ss:$8 sps:$4 sm:$0xff]  }
0x1a63   :  { %1200 = vrot.lane.b32.xlu0 %v2736_v20, %s3350_s17 }
0x1ad5   :  { %v1201_v12 = vpop.permute.xlu0 %1200 }
0x1ad6   :  { %v1203_v18 = vmul.f32 %v3118_v9, %v1201_v12 }
0x1ad8   :  { %1205 = vrot.lane.b32.xlu1 %v1203_v18, %s3353_s23 }
0x1adc   :  { %1227 = vperm.xlu1 %3019, %v1225_v23  }
0x1b4a   :  { %v1206_v26 = vpop.permute.xlu1 %1205 }
0x1b4b   :  { %v1208_v27 = vadd.f32 %v1206_v26, %v1198_v25 }
0x1b4d   :  { %3119 = vtanh.f32 %v1208_v27 }
0x1b57   :  { %v1228_v2 = vpop.permute.xlu1 %1227 }
0x1b58   :  { %vm1229_vm12 = vcmp.eq.s32.totalorder %v1228_v2, 1 }
0x1b5a   :  { %v3120_v47 = vpop.eup %3119 }
0x1b5b   :  { %1211 = vrot.lane.b32.xlu0 %v3120_v47, %s3350_s17 }
0x1b5f   :  { %1217 = vrot.lane.b32.xlu0 %v1141_v3, %s3353_s23 }
0x1b63   :  { %1232 = vrot.lane.b32.xlu0 %v1135_v62, %s3356_s0 }
0x1bcd   :  { %v1212_v36 = vpop.permute.xlu0 %1211 }
0x1bce   :  { %v1214_v39 = vmul.f32 %v3118_v9, %v1212_v36  ;;  %v3817_v9 = vld [vmem:[#allocation7 + $0x84] ss:$8 sps:$4 sm:$0xff]  }
0x1bd0   :  { %1221 = vrot.lane.b32.xlu1 %v1214_v39, %s3350_s17 }
0x1bd1   :  { %v1218_v37 = vpop.permute.xlu0 %1217 }
0x1bd5   :  { %v1233_v42 = vpop.permute.xlu0 %1232 }
0x1bd6   :  { %v1235_v45 = vsel %vm437_vm1, %v1233_v42, %v1208_v27 }
0x1bd7   :  { %v3775_v40 = vsel %vm1229_vm12, %v1235_v45, %v3730_v28  ;;  %v3791_v28 = vld [vmem:[#allocation7 + $0xb4] ss:$8 sps:$4 sm:$0xff]  }
0x1bd8   :  { %1299 = vrot.lane.b32.xlu0 %v3775_v40, %s3353_s23 }
0x1c42   :  { %v1222_v41 = vpop.permute.xlu1 %1221 }
0x1c43   :  { %v1224_v15 = vsel %vm437_vm1, %v1218_v37, %v1222_v41 }
0x1c44   :  { %v3781_v49 = vsel %vm1229_vm12, %v1224_v15, %v3736_v13  ;;  %v299_v13 = vadd.f32 %v3498_v38, %v3625_v48  ;;  %vm1768_vm12 = vcmp.eq.s32.totalorder %v3550_v24, 7  ;;  %v3975_v24 = vld [vmem:[#allocation7 + $0x54] ss:$8 sps:$4 sm:$0xff]  }
0x1c45   :  { %v1244_v50 = vpack.c.bf16 %v3781_v49, %v3781_v49 }
0x1c47   :  { %2737 = vmatmul.mubr.msk.bf16.vlgmr.msra.gmra.mxu0 %vm350_vm4, %v1244_v50 }
0x1c48   :  { %2926 = vmatpush3.bf16.msra.mxu0 %v3509_v53  ;;  %2929 = vmatprep.mubr.msk.bf16.mxu0 %vm3355_vm0, %v3354_v54 }
0x1c49   :  { %2927 = vmatprep.subr.bf16.mxu0 %v3354_v54 }
0x1c4a   :  { %v1300_v38 = vpop.permute.xlu0 %1299 }
0x1c4c   :  { %2928 = vmatpush3.bf16.msra.mxu0 %v3518_v55 }
0x1c4d   :  { %1610 = vmatprep.subr.bf16.mxu0 %v3791_v28 }
0x1d07   :  { %v1282_v51 = vpop.f32.mrf.mxu0 }
0x1d08   :  { %v1289_v56 = vadd.f32 %v1282_v51, %v299_v13 }
0x1d09   :  { %v1284_v57 = vpop.f32.mrf.mxu0 }
0x1d0a   :  { %v2738_v58 = vmul.f32 -1.442695, %v1289_v56 }
0x1d0b   :  { %v1286_v4 = vpop.f32.mrf.mxu0 }
0x1d0c   :  { %3121 = vpow2.f32 %v2738_v58 }
0x1d0d   :  { %v1287_v53 = vpop.f32.mrf.mxu0 }
0x1d19   :  { %v3122_v44 = vpop.eup %3121 }
0x1d1a   :  { %v1293_v59 = vadd.f32 1.0, %v3122_v44 }
0x1d1c   :  { %3123 = vrcp.f32 %v1293_v59 }
0x1d29   :  { %v3124_v60 = vpop.eup %3123 }
0x1d2a   :  { %v1296_v62 = vmul.f32 2.0, %v3124_v60  ;;  %v1302_v48 = vmul.f32 %v3124_v60, %v1300_v38 }
0x1d2c   :  { %v2739_v55 = vadd.f32 -1.0, %v1296_v62 }
0x1d2e   :  { %1304 = vrot.lane.b32.xlu1 %v2739_v55, %s3350_s17 }
0x1da0   :  { %v1305_v63 = vpop.permute.xlu1 %1304 }
0x1da1   :  { %v1307_v1 = vmul.f32 %v3124_v60, %v1305_v63  ;;  %v3850_v63 = vld [vmem:[%s4331_s5 + $0x8] sm:$0xff]  }
0x1da3   :  { %1309 = vrot.lane.b32.xlu1 %v1307_v1, %s3353_s23 }
0x1e15   :  { %v1310_v3 = vpop.permute.xlu1 %1309 }
0x1e16   :  { %v1312_v35 = vadd.f32 %v1310_v3, %v1302_v48 }
0x1e18   :  { %3125 = vtanh.f32 %v1312_v35 }
0x1e25   :  { %v3126_v16 = vpop.eup %3125 }
0x1e26   :  { %1315 = vrot.lane.b32.xlu0 %v3126_v16, %s3350_s17 }
0x1e98   :  { %v1316_v8 = vpop.permute.xlu0 %1315 }
0x1e99   :  { %v1318_v52 = vmul.f32 %v3124_v60, %v1316_v8 }
0x1e9b   :  { %v1319_v10 = vpack.c.bf16 %v1318_v52, %v1318_v52 }
0x1e9d   :  { %1321 = vrot.lane.b32.xlu1 %v1319_v10, %s3353_s23 }
0x1f0f   :  { %v1322_v5 = vpop.permute.xlu1 %1321 }
0x1f10   :  { %2922 = vmatmul.mubr.msk.bf16.vlgmr.msra.gmra.mxu1 %vm437_vm1, %v1322_v5 }
0x1f11   :  { %1434 = vmatpush1.bf16.msra.mxu1 %v3801_v14  ;;  %1457 = vmatprep.mubr.bf16.mxu1 %v3352_v0 }
0x1f12   :  { %1435 = vmatprep.subr.bf16.mxu1 %v3805_v17 }
0x1f15   :  { %1436 = vmatpush1.bf16.msra.mxu1 %v3808_v6 }
0x1f16   :  { %1437 = vmatprep.subr.bf16.mxu1 %v3811_v7 }
0x1f19   :  { %1438 = vmatpush1.bf16.msra.mxu1 %v3814_v19 }
0x1f1a   :  { %1439 = vmatprep.subr.bf16.mxu1 %v3817_v9 }
0x1f1d   :  { %1440 = vmatpush1.bf16.msra.mxu1 %v3820_v11 }
0x1f1e   :  { %2933 = vmatprep.subr.bf16.mxu1 %v3354_v54 }
0x1fd0   :  { %v1360_v20 = vpop.f32.mrf.mxu1 }
0x1fd1   :  { %v1361_v12 = vadd.f32 %v1360_v20, %v1284_v57 }
0x1fd2   :  { %v2923_v18 = vpop.f32.mrf.mxu1 }
0x1fd3   :  { %v1366_v23 = vadd.f32 %v3543_v61, %v1361_v12  ;;  %v1402_v61 = vsel %vm1392_vm13, 1, %v3352_v0 }
0x1fd4   :  { %v1363_v25 = vpop.f32.mrf.mxu1 }
0x1fd5   :  { %v2741_v26 = vmul.f32 -1.442695, %v1366_v23 }
0x1fd6   :  { %v2924_v27 = vpop.f32.mrf.mxu1 }
0x1fd7   :  { %3127 = vpow2.f32 %v2741_v26 }
0x1fe4   :  { %v3128_v47 = vpop.eup %3127 }
0x1fe5   :  { %v1370_v36 = vadd.f32 1.0, %v3128_v47 }
0x1fe7   :  { %3129 = vrcp.f32 %v1370_v36 }
0x1ff4   :  { %v3130_v39 = vpop.eup %3129 }
0x1ff5   :  { %v1373_v37 = vmul.f32 2.0, %v3130_v39  ;;  %v1375_v41 = vmul.f32 %v3130_v39, %v3775_v40 }
0x1ff7   :  { %v2742_v2 = vadd.f32 -1.0, %v1373_v37 }
0x1ff9   :  { %1377 = vrot.lane.b32.xlu0 %v2742_v2, %s3350_s17 }
0x206b   :  { %v1378_v42 = vpop.permute.xlu0 %1377 }
0x206c   :  { %v1380_v45 = vmul.f32 %v3130_v39, %v1378_v42 }
0x206e   :  { %1382 = vrot.lane.b32.xlu1 %v1380_v45, %s3353_s23 }
0x2072   :  { %1404 = vperm.xlu1 %3019, %v1402_v61  }
0x20e0   :  { %v1383_v15 = vpop.permute.xlu1 %1382 }
0x20e1   :  { %v1385_v50 = vadd.f32 %v1383_v15, %v1375_v41  ;;  %v3886_v41 = vld [vmem:[%s4334_s8] ss:$0 sm:$0xff] }
0x20e3   :  { %3131 = vtanh.f32 %v1385_v50 }
0x20ed   :  { %v1405_v58 = vpop.permute.xlu1 %1404 }
0x20ee   :  { %vm1406_vm14 = vcmp.eq.s32.totalorder %v1405_v58, 1 }
0x20f0   :  { %v3132_v13 = vpop.eup %3131 }
0x20f1   :  { %1388 = vrot.lane.b32.xlu0 %v3132_v13, %s3350_s17 }
0x20f5   :  { %1394 = vrot.lane.b32.xlu0 %v1318_v52, %s3353_s23 }
0x20f9   :  { %1409 = vrot.lane.b32.xlu0 %v1312_v35, %s3356_s0 }
0x2163   :  { %v1389_v51 = vpop.permute.xlu0 %1388 }
0x2164   :  { %v1391_v56 = vmul.f32 %v3130_v39, %v1389_v51 }
0x2166   :  { %1398 = vrot.lane.b32.xlu1 %v1391_v56, %s3350_s17 }
0x2167   :  { %v1395_v57 = vpop.permute.xlu0 %1394 }
0x216b   :  { %v1410_v4 = vpop.permute.xlu0 %1409 }
0x216c   :  { %v1412_v53 = vsel %vm437_vm1, %v1410_v4, %v1385_v50 }
0x216d   :  { %v3836_v44 = vsel %vm1406_vm14, %v1412_v53, %v3775_v40  ;;  %v3859_v40 = vld [vmem:[%s4331_s5] sm:$0xff]  }
0x216e   :  { %1476 = vrot.lane.b32.xlu0 %v3836_v44, %s3353_s23 }
0x21d8   :  { %v1399_v59 = vpop.permute.xlu1 %1398 }
0x21d9   :  { %v1401_v60 = vsel %vm437_vm1, %v1395_v57, %v1399_v59 }
0x21da   :  { %v3842_v62 = vsel %vm1406_vm14, %v1401_v60, %v3781_v49  ;;  %v3865_v49 = vld [vmem:[%s4333_s7] ss:$0 sm:$0xff] }
0x21db   :  { %v1421_v55 = vpack.c.bf16 %v3842_v62, %v3842_v62  ;;  %v304_v1 = vadd.f32 %v3865_v49, %v3619_v43 }
0x21dd   :  { %2743 = vmatmul.mubr.msk.bf16.vlgmr.msra.gmra.mxu1 %vm350_vm4, %v1421_v55  ;;  %v1579_v55 = vsel %vm1569_vm15, 1, %v3352_v0 }
0x21de   :  { %2934 = vmatpush3.bf16.msra.mxu1 %v3850_v63  ;;  %2937 = vmatprep.mubr.msk.bf16.mxu1 %vm3355_vm0, %v3354_v54 }
0x21df   :  { %2935 = vmatprep.subr.bf16.mxu1 %v3354_v54 }
0x21e0   :  { %v1477_v43 = vpop.permute.xlu0 %1476 }
0x21e2   :  { %2936 = vmatpush3.bf16.msra.mxu1 %v3859_v40 }
0x229d   :  { %v1459_v38 = vpop.f32.mrf.mxu1 }
0x229e   :  { %v1466_v48 = vadd.f32 %v1459_v38, %v304_v1 }
0x229f   :  { %v1461_v3 = vpop.f32.mrf.mxu1 }
0x22a0   :  { %v2744_v35 = vmul.f32 -1.442695, %v1466_v48 }
0x22a1   :  { %v1463_v16 = vpop.f32.mrf.mxu1 }
0x22a2   :  { %3133 = vpow2.f32 %v2744_v35 }
0x22a3   :  { %v1464_v8 = vpop.f32.mrf.mxu1 }
0x22af   :  { %v3134_v52 = vpop.eup %3133 }
0x22b0   :  { %v1470_v10 = vadd.f32 1.0, %v3134_v52 }
0x22b2   :  { %3135 = vrcp.f32 %v1470_v10 }
0x22bf   :  { %v3136_v5 = vpop.eup %3135 }
0x22c0   :  { %v1473_v20 = vmul.f32 2.0, %v3136_v5  ;;  %v1479_v25 = vmul.f32 %v3136_v5, %v1477_v43 }
0x22c2   :  { %v2745_v12 = vadd.f32 -1.0, %v1473_v20 }
0x22c4   :  { %1481 = vrot.lane.b32.xlu1 %v2745_v12, %s3350_s17 }
0x2336   :  { %v1482_v18 = vpop.permute.xlu1 %1481 }
0x2337   :  { %v1484_v23 = vmul.f32 %v3136_v5, %v1482_v18 }
0x2339   :  { %1486 = vrot.lane.b32.xlu1 %v1484_v23, %s3353_s23 }
0x23ab   :  { %v1487_v26 = vpop.permute.xlu1 %1486 }
0x23ac   :  { %v1489_v27 = vadd.f32 %v1487_v26, %v1479_v25 }
0x23ae   :  { %3137 = vtanh.f32 %v1489_v27 }
0x23bb   :  { %v3138_v47 = vpop.eup %3137 }
0x23bc   :  { %1492 = vrot.lane.b32.xlu0 %v3138_v47, %s3350_s17 }
0x242e   :  { %v1493_v36 = vpop.permute.xlu0 %1492 }
0x242f   :  { %v1495_v39 = vmul.f32 %v3136_v5, %v1493_v36 }
0x2431   :  { %v1496_v37 = vpack.c.bf16 %v1495_v39, %v1495_v39 }
0x2433   :  { %1498 = vrot.lane.b32.xlu1 %v1496_v37, %s3353_s23 }
0x24a5   :  { %v1499_v2 = vpop.permute.xlu1 %1498 }
0x24a6   :  { %2930 = vmatmul.mubr.msk.bf16.vlgmr.msra.gmra.mxu0 %vm437_vm1, %v1499_v2 }
0x24a7   :  { %1611 = vmatpush1.bf16.msra.mxu0 %v3801_v14  ;;  %1634 = vmatprep.mubr.bf16.mxu0 %v3352_v0 }
0x24a8   :  { %1612 = vmatprep.subr.bf16.mxu0 %v3805_v17 }
0x24ab   :  { %1613 = vmatpush1.bf16.msra.mxu0 %v3808_v6 }
0x24ac   :  { %1614 = vmatprep.subr.bf16.mxu0 %v3811_v7 }
0x24af   :  { %1615 = vmatpush1.bf16.msra.mxu0 %v3814_v19 }
0x24b0   :  { %1616 = vmatprep.subr.bf16.mxu0 %v3817_v9 }
0x24b3   :  { %1617 = vmatpush1.bf16.msra.mxu0 %v3820_v11 }
0x24b4   :  { %2941 = vmatprep.subr.bf16.mxu0 %v3354_v54 }
0x2566   :  { %v1537_v42 = vpop.f32.mrf.mxu0 }
0x2567   :  { %v1538_v45 = vadd.f32 %v1537_v42, %v1461_v3 }
0x2568   :  { %v2931_v61 = vpop.f32.mrf.mxu0 }
0x2569   :  { %v1543_v15 = vadd.f32 %v3886_v41, %v1538_v45 }
0x256a   :  { %v1540_v50 = vpop.f32.mrf.mxu0 }
0x256b   :  { %v2747_v13 = vmul.f32 -1.442695, %v1543_v15 }
0x256c   :  { %v2932_v51 = vpop.f32.mrf.mxu0 }
0x256d   :  { %3139 = vpow2.f32 %v2747_v13 }
0x257a   :  { %v3140_v56 = vpop.eup %3139 }
0x257b   :  { %v1547_v57 = vadd.f32 1.0, %v3140_v56 }
0x257d   :  { %3141 = vrcp.f32 %v1547_v57 }
0x258a   :  { %v3142_v58 = vpop.eup %3141 }
0x258b   :  { %v1550_v4 = vmul.f32 2.0, %v3142_v58  ;;  %v1552_v1 = vmul.f32 %v3142_v58, %v3836_v44 }
0x258d   :  { %v2748_v53 = vadd.f32 -1.0, %v1550_v4 }
0x258f   :  { %1554 = vrot.lane.b32.xlu0 %v2748_v53, %s3350_s17 }
0x2601   :  { %v1555_v59 = vpop.permute.xlu0 %1554 }
0x2602   :  { %v1557_v60 = vmul.f32 %v3142_v58, %v1555_v59 }
0x2604   :  { %1559 = vrot.lane.b32.xlu1 %v1557_v60, %s3353_s23 }
0x2608   :  { %1581 = vperm.xlu1 %3019, %v1579_v55  }
0x2676   :  { %v1560_v38 = vpop.permute.xlu1 %1559 }
0x2677   :  { %v1562_v48 = vadd.f32 %v1560_v38, %v1552_v1 }
0x2679   :  { %3143 = vtanh.f32 %v1562_v48 }
0x2683   :  { %v1582_v52 = vpop.permute.xlu1 %1581 }
0x2684   :  { %vm1583_vm2 = vcmp.eq.s32.totalorder %v1582_v52, 1 }
0x2686   :  { %v3144_v3 = vpop.eup %3143 }
0x2687   :  { %1565 = vrot.lane.b32.xlu0 %v3144_v3, %s3350_s17 }
0x268b   :  { %1571 = vrot.lane.b32.xlu0 %v1495_v39, %s3353_s23 }
0x268f   :  { %1586 = vrot.lane.b32.xlu0 %v1489_v27, %s3356_s0 }
0x26f9   :  { %v1566_v35 = vpop.permute.xlu0 %1565 }
0x26fa   :  { %v1568_v16 = vmul.f32 %v3142_v58, %v1566_v35 }
0x26fc   :  { %1575 = vrot.lane.b32.xlu1 %v1568_v16, %s3350_s17 }
0x26fd   :  { %v1572_v8 = vpop.permute.xlu0 %1571 }
0x2701   :  { %v1587_v10 = vpop.permute.xlu0 %1586 }
0x2702   :  { %v1589_v5 = vsel %vm437_vm1, %v1587_v10, %v1562_v48 }
0x2703   :  { %v3900_v20 = vsel %vm1583_vm2, %v1589_v5, %v3836_v44  ;;  %v307_v44 = vadd.f32 %v3865_v49, %v3623_v46 }
0x2704   :  { %1653 = vrot.lane.b32.xlu0 %v3900_v20, %s3353_s23 }
0x276e   :  { %v1576_v12 = vpop.permute.xlu1 %1575 }
0x276f   :  { %v1578_v18 = vsel %vm437_vm1, %v1572_v8, %v1576_v12 }
0x2770   :  { %v3906_v23 = vsel %vm1583_vm2, %v1578_v18, %v3842_v62  ;;  %v530_v18 = vsel %vm529_vm3, 1, %v3352_v0 }
0x2771   :  { %v1598_v43 = vpack.c.bf16 %v3906_v23, %v3906_v23 }
0x2773   :  { %2749 = vmatmul.mubr.msk.bf16.vlgmr.msra.gmra.mxu0 %vm350_vm4, %v1598_v43  ;;  %v884_v43 = vsel %vm883_vm5, 1, %v3352_v0 }
0x2774   :  { %2942 = vmatpush3.bf16.msra.mxu0 %v3850_v63  ;;  %2945 = vmatprep.mubr.msk.bf16.mxu0 %vm3355_vm0, %v3354_v54 }
0x2775   :  { %2943 = vmatprep.subr.bf16.mxu0 %v3354_v54 }
0x2776   :  { %v1654_v46 = vpop.permute.xlu0 %1653 }
0x2778   :  { %2944 = vmatpush3.bf16.msra.mxu0 %v3859_v40 }
0x2779   :  { %2949 = vmatprep.subr.bf16.mxu0 %v3354_v54 }
0x2833   :  { %v1636_v62 = vpop.f32.mrf.mxu0 }
0x2834   :  { %v1643_v25 = vadd.f32 %v1636_v62, %v307_v44  ;;  %v1061_v44 = vsel %vm1060_vm6, 1, %v3352_v0  ;;  %v1415_v62 = vsel %vm1414_vm7, 1, %v3352_v0 }
0x2835   :  { %v1638_v26 = vpop.f32.mrf.mxu0 }
0x2836   :  { %v2750_v27 = vmul.f32 -1.442695, %v1643_v25  ;;  %v1756_v25 = vsel %vm1746_vm8, 1, %v3352_v0 }
0x2837   :  { %v1640_v47 = vpop.f32.mrf.mxu0 }
0x2838   :  { %3145 = vpow2.f32 %v2750_v27 }
0x2839   :  { %v1641_v36 = vpop.f32.mrf.mxu0 }
0x2845   :  { %v3146_v39 = vpop.eup %3145 }
0x2846   :  { %v1647_v37 = vadd.f32 1.0, %v3146_v39 }
0x2848   :  { %3147 = vrcp.f32 %v1647_v37 }
0x2855   :  { %v3148_v2 = vpop.eup %3147 }
0x2856   :  { %v1650_v42 = vmul.f32 2.0, %v3148_v2  ;;  %v1656_v50 = vmul.f32 %v3148_v2, %v1654_v46 }
0x2858   :  { %v2751_v45 = vadd.f32 -1.0, %v1650_v42 }
0x285a   :  { %1658 = vrot.lane.b32.xlu1 %v2751_v45, %s3350_s17  ;;  %v1238_v45 = vsel %vm1237_vm10, 1, %v3352_v0 }
0x28cc   :  { %v1659_v61 = vpop.permute.xlu1 %1658 }
0x28cd   :  { %v1661_v15 = vmul.f32 %v3148_v2, %v1659_v61 }
0x28cf   :  { %1663 = vrot.lane.b32.xlu1 %v1661_v15, %s3353_s23  ;;  %v1592_v15 = vsel %vm1591_vm11, 1, %v3352_v0 }
0x2941   :  { %v1664_v13 = vpop.permute.xlu1 %1663 }
0x2942   :  { %v1666_v51 = vadd.f32 %v1664_v13, %v1656_v50  ;;  %v1769_v50 = vsel %vm1768_vm12, 1, %v3352_v0  ;;  %v3964_v13 = vld [vmem:[#allocation7 + $0x74] ss:$8 sps:$4 sm:$0xff]  }
0x2943   :  { %1812 = vmatprep.subr.bf16.mxu1 %v3964_v13 }
0x2944   :  { %3149 = vtanh.f32 %v1666_v51 }
0x2951   :  { %v3150_v56 = vpop.eup %3149 }
0x2952   :  { %1669 = vrot.lane.b32.xlu0 %v3150_v56, %s3350_s17 }
0x29c4   :  { %v1670_v57 = vpop.permute.xlu0 %1669 }
0x29c5   :  { %v1672_v58 = vmul.f32 %v3148_v2, %v1670_v57  ;;  %v707_v2 = vsel %vm706_vm9, 1, %v3352_v0  ;;  %v3971_v57 = vld [vmem:[#allocation7 + $0x70] ss:$8 sps:$4 sm:$0xff]  }
0x29c7   :  { %v1673_v4 = vpack.c.bf16 %v1672_v58, %v1672_v58 }
0x29c9   :  { %1675 = vrot.lane.b32.xlu1 %v1673_v4, %s3353_s23  ;;  %v3979_v4 = vld [vmem:[#allocation7 + $0x60] ss:$8 sps:$4 sm:$0xff]  }
0x2a3b   :  { %v1676_v53 = vpop.permute.xlu1 %1675 }
0x2a3c   :  { %2938 = vmatmul.mubr.msk.bf16.vlgmr.msra.gmra.mxu1 %vm437_vm1, %v1676_v53 }
0x2a3d   :  { %1813 = vmatpush1.bf16.msra.mxu1 %v3971_v57 }
0x2afc   :  { %v1714_v59 = vpop.f32.mrf.mxu1 }
0x2afd   :  { %v1715_v60 = vadd.f32 %v1714_v59, %v1638_v26  ;;  %v3988_v59 = vld [vmem:[#allocation7 + $0x44] ss:$8 sps:$4 sm:$0xff]  }
0x2afe   :  { %v2939_v55 = vpop.f32.mrf.mxu1 }
0x2aff   :  { %v1720_v1 = vadd.f32 %v3886_v41, %v1715_v60  ;;  %v3992_v60 = vld [vmem:[#allocation7 + $0x50] ss:$8 sps:$4 sm:$0xff]   ;;  %v3996_v55 = vld [vmem:[#allocation7 + $0x34] ss:$8 sps:$4 sm:$0xff]  }
0x2b00   :  { %v1717_v38 = vpop.f32.mrf.mxu1 }
0x2b01   :  { %v2753_v48 = vmul.f32 -1.442695, %v1720_v1  ;;  %v3998_v1 = vld [vmem:[#allocation7 + $0x40] ss:$8 sps:$4 sm:$0xff]   ;;  %v4004_v38 = vld [vmem:[#allocation7 + $0x30] ss:$8 sps:$4 sm:$0xff]  }
0x2b02   :  { %v2940_v3 = vpop.f32.mrf.mxu1 }
0x2b03   :  { %3151 = vpow2.f32 %v2753_v48  ;;  %v4008_v48 = vld [vmem:[#allocation7 + $0x14] ss:$8 sps:$4 sm:$0xff]   ;;  %v4010_v3 = vld [vmem:[#allocation7 + $0x20] ss:$8 sps:$4 sm:$0xff]  }
0x2b10   :  { %v3152_v35 = vpop.eup %3151 }
0x2b11   :  { %v1724_v16 = vadd.f32 1.0, %v3152_v35  ;;  %v4014_v35 = vld [vmem:[#allocation7 + $0x4] ss:$8 sps:$4 sm:$0xff]  }
0x2b13   :  { %3153 = vrcp.f32 %v1724_v16  ;;  %v4016_v16 = vld [vmem:[#allocation7 + $0x10] ss:$8 sps:$4 sm:$0xff]  }
0x2b20   :  { %v3925_v8 = vpop.eup %3153 }
0x2b21   :  { %v1727_v52 = vmul.f32 2.0, %v3925_v8  ;;  %v1729_v26 = vmul.f32 %v3925_v8, %v3900_v20 }
0x2b23   :  { %v2754_v10 = vadd.f32 -1.0, %v1727_v52  ;;  %v4020_v52 = vld [vmem:[#allocation7] ss:$8 sps:$4 sm:$0xff]  }
0x2b25   :  { %1731 = vrot.lane.b32.xlu0 %v2754_v10, %s3350_s17 }
0x2b97   :  { %v1732_v5 = vpop.permute.xlu0 %1731 }
0x2b98   :  { %v1734_v12 = vmul.f32 %v3925_v8, %v1732_v5 }
0x2b9a   :  { %1736 = vrot.lane.b32.xlu1 %v1734_v12, %s3353_s23 }
0x2b9e   :  { %532 = vperm.xlu1 %3019, %v530_v18  }
0x2ba2   :  { %886 = vperm.xlu1 %3019, %v884_v43  }
0x2ba6   :  { %1063 = vperm.xlu1 %3019, %v1061_v44  }
0x2baa   :  { %1417 = vperm.xlu1 %3019, %v1415_v62  }
0x2bae   :  { %1758 = vperm.xlu1 %3019, %v1756_v25  }
0x2bb2   :  { %1748 = vrot.lane.b32.xlu1 %v1672_v58, %s3353_s23 }
0x2bb6   :  { %1763 = vrot.lane.b32.xlu1 %v1666_v51, %s3356_s0  ;;  %v3966_v51 = vld [vmem:[#allocation7 + $0x64] ss:$8 sps:$4 sm:$0xff]  }
0x2bb7   :  { %1814 = vmatprep.subr.bf16.mxu1 %v3966_v51 }
0x2bb8   :  { %1815 = vmatpush1.bf16.msra.mxu1 %v3979_v4 }
0x2bb9   :  { %1816 = vmatprep.subr.bf16.mxu1 %v3975_v24 }
0x2bbc   :  { %1817 = vmatpush1.bf16.msra.mxu1 %v3992_v60 }
0x2bbd   :  { %1818 = vmatprep.subr.bf16.mxu1 %v3988_v59 }
0x2bc0   :  { %1819 = vmatpush1.bf16.msra.mxu1 %v3998_v1 }
0x2bc1   :  { %1820 = vmatprep.subr.bf16.mxu1 %v3996_v55 }
0x2bc4   :  { %1821 = vmatpush1.bf16.msra.mxu1 %v4004_v38 }
0x2c0c   :  { %v1737_v27 = vpop.permute.xlu1 %1736 }
0x2c0d   :  { %v1739_v47 = vadd.f32 %v1737_v27, %v1729_v26 }
0x2c0f   :  { %3155 = vtanh.f32 %v1739_v47 }
0x2c19   :  { %v3945_v36 = vpop.permute.xlu1 %532 }
0x2c1a   :  { %vm534_vm14 = vcmp.eq.s32.totalorder %v3945_v36, 1 }
0x2c1b   :  { %v535_v18 = vsel %vm534_vm14, %v3474_v21, 0.0 }
0x2c1c   :  { %v3156_v39 = vpop.eup %3155 }
0x2c1d   :  { %1742 = vrot.lane.b32.xlu0 %v3156_v39, %s3350_s17  ;;  %v3949_v37 = vpop.permute.xlu1 %886 }
0x2c1e   :  { %vm888_vm2 = vcmp.eq.s32.totalorder %v3949_v37, 1 }
0x2c21   :  { %709 = vperm.xlu0 %3020, %v707_v2   ;;  %v3953_v42 = vpop.permute.xlu1 %1063 }
0x2c22   :  { %vm1065_vm3 = vcmp.eq.s32.totalorder %v3953_v42, 1 }
0x2c25   :  { %1240 = vperm.xlu0 %3020, %v1238_v45   ;;  %v3957_v61 = vpop.permute.xlu1 %1417 }
0x2c26   :  { %vm1419_vm6 = vcmp.eq.s32.totalorder %v3957_v61, 1 }
0x2c29   :  { %1594 = vperm.xlu0 %3020, %v1592_v15   ;;  %v3961_v46 = vpop.permute.xlu1 %1758 }
0x2c2a   :  { %vm1760_vm13 = vcmp.eq.s32.totalorder %v3961_v46, 1 }
0x2c2d   :  { %1771 = vperm.xlu0 %3020, %v1769_v50   ;;  %v3968_v56 = vpop.permute.xlu1 %1748 }
0x2c31   :  { %v1764_v58 = vpop.permute.xlu1 %1763 }
0x2c32   :  { %v1766_v0 = vsel %vm437_vm1, %v1764_v58, %v1739_v47 }
0x2c33   :  { %v3985_v53 = vsel %vm1760_vm13, %v1766_v0, %v3900_v20  ;;  %v4002_v20 = vld [vmem:[#allocation7 + $0x24] ss:$8 sps:$4 sm:$0xff]  }
0x2c34   :  { %1863 = vrot.lane.b32.xlu1 %v3985_v53, %s3353_s23  ;;  %1822 = vmatprep.subr.bf16.mxu1 %v4002_v20 }
0x2c35   :  { %1823 = vmatpush1.bf16.msra.mxu1 %v4010_v3 }
0x2c36   :  { %1824 = vmatprep.subr.bf16.mxu1 %v4008_v48 }
0x2c39   :  { %1825 = vmatpush1.bf16.msra.mxu1 %v4016_v16 }
0x2c3a   :  { %1826 = vmatprep.subr.bf16.mxu1 %v4014_v35 }
0x2c3d   :  { %1827 = vmatpush1.bf16.msra.mxu1 %v4020_v52 }
0x2c3e   :  { %1836 = vmatprep.subr.bf16.mxu1 %v3791_v28 }
0x2c41   :  { %1837 = vmatpush2.bf16.msra.mxu1 %v3801_v14 }
0x2c42   :  { %1838 = vmatprep.subr.bf16.mxu1 %v3805_v17 }
0x2c45   :  { %1839 = vmatpush2.bf16.msra.mxu1 %v3808_v6 }
0x2c46   :  { %1840 = vmatprep.subr.bf16.mxu1 %v3811_v7 }
0x2c49   :  { %1841 = vmatpush2.bf16.msra.mxu1 %v3814_v19 }
0x2c4a   :  { %1842 = vmatprep.subr.bf16.mxu1 %v3817_v9 }
0x2c4d   :  { %1843 = vmatpush2.bf16.msra.mxu1 %v3820_v11 }
0x2c4e   :  { %2957 = vmatprep.subr.bf16.mxu1 %v3354_v54 }
0x2c8f   :  { %v1743_v10 = vpop.permute.xlu0 %1742 }
0x2c90   :  { %v1745_v5 = vmul.f32 %v3925_v8, %v1743_v10 }
0x2c92   :  { %1752 = vrot.lane.b32.xlu0 %v1745_v5, %s3350_s17 }
0x2c9c   :  { %v710_v12 = vpop.permute.xlu0 %709 }
0x2c9d   :  { %vm711_vm15 = vcmp.eq.s32.totalorder %v710_v12, 1 }
0x2c9e   :  { %v712_v43 = vsel %vm711_vm15, %v3477_v22, %v535_v18 }
0x2c9f   :  { %v889_v44 = vsel %vm888_vm2, %v3486_v30, %v712_v43 }
0x2ca0   :  { %v1241_v62 = vpop.permute.xlu0 %1240  ;;  %v1066_v25 = vsel %vm1065_vm3, %v3489_v31, %v889_v44 }
0x2ca1   :  { %vm1242_vm5 = vcmp.eq.s32.totalorder %v1241_v62, 1 }
0x2ca2   :  { %v1243_v8 = vsel %vm1242_vm5, %v3593_v29, %v1066_v25 }
0x2ca3   :  { %v1420_v26 = vsel %vm1419_vm6, %v3596_v32, %v1243_v8 }
0x2ca4   :  { %v1595_v21 = vpop.permute.xlu0 %1594 }
0x2ca5   :  { %vm1596_vm7 = vcmp.eq.s32.totalorder %v1595_v21, 1 }
0x2ca6   :  { %v1597_v22 = vsel %vm1596_vm7, %v3599_v33, %v1420_v26  ;;  %v1864_v58 = vpop.permute.xlu1 %1863 }
0x2ca8   :  { %v1772_v27 = vpop.permute.xlu0 %1771 }
0x2ca9   :  { %vm1773_vm8 = vcmp.eq.s32.totalorder %v1772_v27, 1 }
0x2caa   :  { %v4046_v36 = vsel %vm1773_vm8, %v3602_v34, %v1597_v22 }
0x2cab   :  { %v1775_v32 = vpack.c.bf16 %v4046_v36, %v4046_v36 }
0x2d04   :  { %v1753_v47 = vpop.permute.xlu0 %1752 }
0x2d05   :  { %v1755_v30 = vsel %vm437_vm1, %v3968_v56, %v1753_v47 }
0x2d06   :  { %v1761_v31 = vsel %vm1760_vm13, %v1755_v30, %v3906_v23 }
0x2d07   :  { %v1776_v29 = vpack.c.bf16 %v1761_v31, %v1761_v31 }
0x2d09   :  { %2763 = vmatprep.mubr.msk.bf16.mxu1 %vm350_vm4, %v1776_v29 }
0x2d0a   :  { %1845 = vmatmul.mubr.bf16.vlgmr.msra.gmra.mxu1 %v1775_v32 }
0x2d0b   :  { %2958 = vmatpush3.bf16.msra.mxu1 %v3850_v63  ;;  %2961 = vmatprep.mubr.msk.bf16.mxu1 %vm3355_vm0, %v3354_v54 }
0x2d0c   :  { %2959 = vmatprep.subr.bf16.mxu1 %v3354_v54 }
0x2d0f   :  { %2960 = vmatpush3.bf16.msra.mxu1 %v3859_v40 }
0x2d10   :  { %2965 = vmatprep.subr.bf16.mxu1 %v3354_v54 }
0x2dca   :  { %v1846_v33 = vpop.f32.mrf.mxu1 }
0x2dcb   :  { %v1853_v34 = vadd.f32 %v3865_v49, %v1846_v33 }
0x2dcc   :  { %v1848_v23 = vpop.f32.mrf.mxu1 }
0x2dcd   :  { %v2764_v39 = vmul.f32 -1.442695, %v1853_v34 }
0x2dce   :  { %v1850_v37 = vpop.f32.mrf.mxu1 }
0x2dcf   :  { %3157 = vpow2.f32 %v2764_v39 }
0x2dd0   :  { %v1851_v2 = vpop.f32.mrf.mxu1 }
0x2ddc   :  { %v3158_v42 = vpop.eup %3157 }
0x2ddd   :  { %v1857_v45 = vadd.f32 1.0, %v3158_v42  ;;  %v4074_v42 = vld [vmem:[#allocation8 + $0x8] sm:$0xff]  }
0x2ddf   :  { %3159 = vrcp.f32 %v1857_v45  ;;  %v4077_v45 = vld [vmem:[#allocation8] sm:$0xff]  }
0x2dec   :  { %v3160_v61 = vpop.eup %3159 }
0x2ded   :  { %v1860_v15 = vmul.f32 2.0, %v3160_v61  ;;  %v1866_v0 = vmul.f32 %v3160_v61, %v1864_v58 }
0x2def   :  { %v2765_v46 = vadd.f32 -1.0, %v1860_v15 }
0x2df1   :  { %1868 = vrot.lane.b32.xlu0 %v2765_v46, %s3350_s17 }
0x2e63   :  { %v1869_v50 = vpop.permute.xlu0 %1868 }
0x2e64   :  { %v1871_v56 = vmul.f32 %v3160_v61, %v1869_v50 }
0x2e66   :  { %1873 = vrot.lane.b32.xlu0 %v1871_v56, %s3353_s23 }
0x2ed8   :  { %v1874_v10 = vpop.permute.xlu0 %1873 }
0x2ed9   :  { %v1876_v5 = vadd.f32 %v1874_v10, %v1866_v0 }
0x2edb   :  { %3161 = vtanh.f32 %v1876_v5 }
0x2ee8   :  { %v3162_v12 = vpop.eup %3161 }
0x2ee9   :  { %1879 = vrot.lane.b32.xlu1 %v3162_v12, %s3350_s17 }
0x2f5b   :  { %v1880_v18 = vpop.permute.xlu1 %1879 }
0x2f5c   :  { %v1882_v43 = vmul.f32 %v3160_v61, %v1880_v18 }
0x2f5e   :  { %v1883_v44 = vpack.c.bf16 %v1882_v43, %v1882_v43 }
0x2f60   :  { %1885 = vrot.lane.b32.xlu0 %v1883_v44, %s3353_s23  ;;  %v4140_v44 = vld [vmem:[%s4328_s2] ss:$0 sm:$0xff] }
0x2fd2   :  { %v1886_v62 = vpop.permute.xlu0 %1885 }
0x2fd3   :  { %2946 = vmatmul.mubr.msk.bf16.vlgmr.msra.gmra.mxu0 %vm437_vm1, %v1886_v62 }
0x2fd4   :  { %2953 = vmatprep.mubr.msk.bf16.mxu0 %vm3355_vm0, %v3354_v54  ;;  %2950 = vmatpush3.bf16.msra.mxu0 %v4074_v42 }
0x2fd5   :  { %2951 = vmatprep.subr.bf16.mxu0 %v3354_v54 }
0x2fd8   :  { %2952 = vmatpush3.bf16.msra.mxu0 %v4077_v45 }
0x2fd9   :  { %2038 = vmatprep.subr.bf16.mxu0 %v3964_v13 }
0x3093   :  { %v1924_v25 = vpop.f32.mrf.mxu0 }
0x3094   :  { %v1925_v8 = vadd.f32 %v1924_v25, %v1848_v23 }
0x3095   :  { %v2947_v26 = vpop.f32.mrf.mxu0 }
0x3096   :  { %v1930_v21 = vadd.f32 %v3886_v41, %v1925_v8 }
0x3097   :  { %v1927_v27 = vpop.f32.mrf.mxu0 }
0x3098   :  { %v2767_v22 = vmul.f32 -1.442695, %v1930_v21 }
0x3099   :  { %v2948_v47 = vpop.f32.mrf.mxu0 }
0x309a   :  { %3163 = vpow2.f32 %v2767_v22 }
0x30a7   :  { %v3164_v30 = vpop.eup %3163 }
0x30a8   :  { %v1934_v31 = vadd.f32 1.0, %v3164_v30 }
0x30aa   :  { %3165 = vrcp.f32 %v1934_v31 }
0x30b7   :  { %v3166_v29 = vpop.eup %3165 }
0x30b8   :  { %v1937_v32 = vmul.f32 2.0, %v3166_v29  ;;  %v1939_v23 = vmul.f32 %v3166_v29, %v3985_v53 }
0x30ba   :  { %v2768_v33 = vadd.f32 -1.0, %v1937_v32 }
0x30bc   :  { %1941 = vrot.lane.b32.xlu1 %v2768_v33, %s3350_s17 }
0x312e   :  { %v1942_v34 = vpop.permute.xlu1 %1941 }
0x312f   :  { %v1944_v39 = vmul.f32 %v3166_v29, %v1942_v34 }
0x3131   :  { %1946 = vrot.lane.b32.xlu0 %v1944_v39, %s3353_s23 }
0x31a3   :  { %v1947_v37 = vpop.permute.xlu0 %1946 }
0x31a4   :  { %v1949_v2 = vadd.f32 %v1947_v37, %v1939_v23 }
0x31a6   :  { %3167 = vtanh.f32 %v1949_v2 }
0x31b3   :  { %v3168_v61 = vpop.eup %3167 }
0x31b4   :  { %1952 = vrot.lane.b32.xlu1 %v3168_v61, %s3350_s17 }
0x31b8   :  { %1957 = vrot.lane.b32.xlu1 %v1882_v43, %s3353_s23 }
0x31bc   :  { %1966 = vrot.lane.b32.xlu1 %v1876_v5, %s3356_s0 }
0x3226   :  { %v1953_v53 = vpop.permute.xlu1 %1952 }
0x3227   :  { %v1955_v15 = vmul.f32 %v3166_v29, %v1953_v53 }
0x3229   :  { %v1970_v46 = vpack.c.bf16 %v1955_v15, %v1955_v15 }
0x322a   :  { %v1958_v50 = vpop.permute.xlu1 %1957 }
0x322b   :  { %1972 = vrot.lane.b32.xlu0 %v1970_v46, %s3353_s23 }
0x322e   :  { %v1967_v56 = vpop.permute.xlu1 %1966 }
0x322f   :  { %v4087_v58 = vsel %vm437_vm1, %v1967_v56, %v1949_v2  ;;  %1961 = vrot.lane.b32.xlu0 %v1955_v15, %s3350_s17 }
0x3230   :  { %2089 = vrot.lane.b32.xlu1 %v4087_v58, %s3353_s23 }
0x329d   :  { %v1973_v0 = vpop.permute.xlu0 %1972 }
0x329e   :  { %2954 = vmatmul.mubr.msk.bf16.vlgmr.msra.gmra.mxu0 %vm437_vm1, %v1973_v0 }
0x329f   :  { %2039 = vmatpush1.bf16.msra.mxu0 %v3971_v57 }
0x32a0   :  { %2040 = vmatprep.subr.bf16.mxu0 %v3966_v51 }
0x32a1   :  { %v1962_v10 = vpop.permute.xlu0 %1961 }
0x32a2   :  { %v1964_v5 = vsel %vm437_vm1, %v1958_v50, %v1962_v10  ;;  %v2090_v34 = vpop.permute.xlu1 %2089 }
0x32a3   :  { %v2034_v12 = vpack.c.bf16 %v1964_v5, %v1964_v5  ;;  %2041 = vmatpush1.bf16.msra.mxu0 %v3979_v4 }
0x32a4   :  { %2042 = vmatprep.subr.bf16.mxu0 %v3975_v24 }
0x32a5   :  { %2772 = vmatprep.mubr.msk.bf16.mxu0 %vm350_vm4, %v2034_v12 }
0x32a7   :  { %2043 = vmatpush1.bf16.msra.mxu0 %v3992_v60 }
0x32a8   :  { %2044 = vmatprep.subr.bf16.mxu0 %v3988_v59 }
0x32ab   :  { %2045 = vmatpush1.bf16.msra.mxu0 %v3998_v1 }
0x32ac   :  { %2046 = vmatprep.subr.bf16.mxu0 %v3996_v55 }
0x32af   :  { %2047 = vmatpush1.bf16.msra.mxu0 %v4004_v38 }
0x32b0   :  { %2048 = vmatprep.subr.bf16.mxu0 %v4002_v20 }
0x32b3   :  { %2049 = vmatpush1.bf16.msra.mxu0 %v4010_v3 }
0x32b4   :  { %2050 = vmatprep.subr.bf16.mxu0 %v4008_v48 }
0x32b7   :  { %2051 = vmatpush1.bf16.msra.mxu0 %v4016_v16 }
0x32b8   :  { %2052 = vmatprep.subr.bf16.mxu0 %v4014_v35 }
0x32bb   :  { %2053 = vmatpush1.bf16.msra.mxu0 %v4020_v52 }
0x32bc   :  { %2062 = vmatprep.subr.bf16.mxu0 %v3791_v28  ;;  %v4122_v28 = vld [vmem:[%s4336_s10] ss:$0 sm:$0xff] }
0x32bf   :  { %2063 = vmatpush2.bf16.msra.mxu0 %v3801_v14 }
0x32c0   :  { %2064 = vmatprep.subr.bf16.mxu0 %v3805_v17 }
0x32c3   :  { %2065 = vmatpush2.bf16.msra.mxu0 %v3808_v6  ;;  %v4128_v6 = vld [vmem:[%s4329_s3] ss:$0 sm:$0xff] }
0x32c4   :  { %2066 = vmatprep.subr.bf16.mxu0 %v3811_v7 }
0x32c7   :  { %2067 = vmatpush2.bf16.msra.mxu0 %v3814_v19 }
0x32c8   :  { %2068 = vmatprep.subr.bf16.mxu0 %v3817_v9 }
0x32cb   :  { %2069 = vmatpush2.bf16.msra.mxu0 %v3820_v11 }
0x32cc   :  { %2973 = vmatprep.subr.bf16.mxu0 %v3354_v54 }
0x335e   :  { %v2023_v14 = vpop.f32.mrf.mxu0 }
0x335f   :  { %v2024_v17 = vadd.f32 %v4122_v28, %v2023_v14 }
0x3360   :  { %v2955_v7 = vpop.f32.mrf.mxu0 }
0x3361   :  { %v4131_v19 = vadd.f32 %v2024_v17, %v4046_v36 }
0x3362   :  { %v2026_v9 = vpop.f32.mrf.mxu0 }
0x3363   :  { %v2030_v11 = vmul.f32 %v4128_v6, %v4131_v19  ;;  %v2033_v18 = vpack.c.bf16 %v4131_v19, %v4131_v19 }
0x3364   :  { %v2956_v43 = vpop.f32.mrf.mxu0 }
0x3365   :  { %v2031_v62 = vadd.f32 %v4140_v44, %v2030_v11  ;;  %2071 = vmatmul.mubr.bf16.vlgmr.msra.gmra.mxu0 %v2033_v18 }
0x3366   :  { %2974 = vmatpush3.bf16.msra.mxu0 %v3850_v63  ;;  %2977 = vmatprep.mubr.msk.bf16.mxu0 %vm3355_vm0, %v3354_v54 }
0x3367   :  { %2032 = vst [vmem:[#allocation10] sm:$0xff] %v2031_v62  ;;  %2975 = vmatprep.subr.bf16.mxu0 %v3354_v54 }
0x336a   :  { %2976 = vmatpush3.bf16.msra.mxu0 %v3859_v40 }
0x336b   :  { %2981 = vmatprep.subr.bf16.mxu0 %v3354_v54 }
0x3425   :  { %v2072_v36 = vpop.f32.mrf.mxu0 }
0x3426   :  { %v2079_v25 = vadd.f32 %v3865_v49, %v2072_v36 }
0x3427   :  { %v2074_v8 = vpop.f32.mrf.mxu0 }
0x3428   :  { %v2773_v26 = vmul.f32 -1.442695, %v2079_v25 }
0x3429   :  { %v2076_v21 = vpop.f32.mrf.mxu0 }
0x342a   :  { %3169 = vpow2.f32 %v2773_v26 }
0x342b   :  { %v2077_v27 = vpop.f32.mrf.mxu0 }
0x3437   :  { %v3170_v22 = vpop.eup %3169 }
0x3438   :  { %v2083_v47 = vadd.f32 1.0, %v3170_v22 }
0x343a   :  { %3171 = vrcp.f32 %v2083_v47 }
0x3447   :  { %v3172_v30 = vpop.eup %3171 }
0x3448   :  { %v2086_v31 = vmul.f32 2.0, %v3172_v30  ;;  %v2092_v39 = vmul.f32 %v3172_v30, %v2090_v34  ;;  %v4193_v34 = vld [vmem:[#allocation7 + $0xb4] ss:$8 sps:$4 sm:$0xff]  }
0x344a   :  { %v2774_v29 = vadd.f32 -1.0, %v2086_v31 }
0x344c   :  { %2094 = vrot.lane.b32.xlu0 %v2774_v29, %s3350_s17 }
0x34be   :  { %v2095_v32 = vpop.permute.xlu0 %2094 }
0x34bf   :  { %v2097_v33 = vmul.f32 %v3172_v30, %v2095_v32 }
0x34c1   :  { %2099 = vrot.lane.b32.xlu0 %v2097_v33, %s3353_s23 }
0x3533   :  { %v2100_v23 = vpop.permute.xlu0 %2099 }
0x3534   :  { %v2102_v37 = vadd.f32 %v2100_v23, %v2092_v39  ;;  %v4196_v39 = vld [vmem:[#allocation7 + $0xb0] ss:$8 sps:$4 sm:$0xff]   ;;  %v4199_v23 = vld [vmem:[#allocation7 + $0xa4] ss:$8 sps:$4 sm:$0xff]  }
0x3536   :  { %3173 = vtanh.f32 %v2102_v37 }
0x3543   :  { %v3174_v2 = vpop.eup %3173 }
0x3544   :  { %2105 = vrot.lane.b32.xlu1 %v3174_v2, %s3350_s17  ;;  %v4205_v2 = vld [vmem:[#allocation7 + $0x94] ss:$8 sps:$4 sm:$0xff]  }
0x35b6   :  { %v2106_v61 = vpop.permute.xlu1 %2105 }
0x35b7   :  { %v2108_v53 = vmul.f32 %v3172_v30, %v2106_v61  ;;  %v4208_v61 = vld [vmem:[#allocation7 + $0x90] ss:$8 sps:$4 sm:$0xff]  }
0x35b9   :  { %v2109_v15 = vpack.c.bf16 %v2108_v53, %v2108_v53 }
0x35bb   :  { %2111 = vrot.lane.b32.xlu0 %v2109_v15, %s3353_s23  ;;  %v4214_v15 = vld [vmem:[#allocation7 + $0x80] ss:$8 sps:$4 sm:$0xff]  }
0x362d   :  { %v2112_v46 = vpop.permute.xlu0 %2111 }
0x362e   :  { %2962 = vmatmul.mubr.msk.bf16.vlgmr.msra.gmra.mxu1 %vm437_vm1, %v2112_v46 }
0x362f   :  { %2966 = vmatpush3.bf16.msra.mxu1 %v4074_v42  ;;  %2969 = vmatprep.mubr.msk.bf16.mxu1 %vm3355_vm0, %v3354_v54 }
0x3630   :  { %2967 = vmatprep.subr.bf16.mxu1 %v3354_v54 }
0x3633   :  { %2968 = vmatpush3.bf16.msra.mxu1 %v4077_v45 }
0x3634   :  { %2253 = vmatprep.subr.bf16.mxu1 %v3964_v13 }
0x36ee   :  { %v2150_v50 = vpop.f32.mrf.mxu1 }
0x36ef   :  { %v2151_v56 = vadd.f32 %v2150_v50, %v2074_v8 }
0x36f0   :  { %v2963_v0 = vpop.f32.mrf.mxu1 }
0x36f1   :  { %v2156_v10 = vadd.f32 %v3886_v41, %v2151_v56 }
0x36f2   :  { %v2153_v5 = vpop.f32.mrf.mxu1 }
0x36f3   :  { %v2776_v12 = vmul.f32 -1.442695, %v2156_v10 }
0x36f4   :  { %v2964_v14 = vpop.f32.mrf.mxu1 }
0x36f5   :  { %3175 = vpow2.f32 %v2776_v12 }
0x3702   :  { %v3176_v17 = vpop.eup %3175 }
0x3703   :  { %v2160_v7 = vadd.f32 1.0, %v3176_v17 }
0x3705   :  { %3177 = vrcp.f32 %v2160_v7 }
0x3712   :  { %v3178_v9 = vpop.eup %3177 }
0x3713   :  { %v2163_v11 = vmul.f32 2.0, %v3178_v9  ;;  %v2165_v36 = vmul.f32 %v3178_v9, %v4087_v58 }
0x3715   :  { %v2777_v18 = vadd.f32 -1.0, %v2163_v11 }
0x3717   :  { %2167 = vrot.lane.b32.xlu1 %v2777_v18, %s3350_s17 }
0x3789   :  { %v2168_v43 = vpop.permute.xlu1 %2167 }
0x378a   :  { %v2170_v62 = vmul.f32 %v3178_v9, %v2168_v43 }
0x378c   :  { %2172 = vrot.lane.b32.xlu0 %v2170_v62, %s3353_s23 }
0x37fe   :  { %v2173_v25 = vpop.permute.xlu0 %2172 }
0x37ff   :  { %v2175_v8 = vadd.f32 %v2173_v25, %v2165_v36 }
0x3801   :  { %3179 = vtanh.f32 %v2175_v8 }
0x380e   :  { %v3180_v26 = vpop.eup %3179 }
0x380f   :  { %2178 = vrot.lane.b32.xlu1 %v3180_v26, %s3350_s17 }
0x3813   :  { %2183 = vrot.lane.b32.xlu1 %v2108_v53, %s3353_s23  ;;  %v4211_v53 = vld [vmem:[#allocation7 + $0x84] ss:$8 sps:$4 sm:$0xff]  }
0x3817   :  { %2192 = vrot.lane.b32.xlu1 %v2102_v37, %s3356_s0  ;;  %v4202_v37 = vld [vmem:[#allocation7 + $0xa0] ss:$8 sps:$4 sm:$0xff]  }
0x3881   :  { %v2179_v21 = vpop.permute.xlu1 %2178 }
0x3882   :  { %v2181_v27 = vmul.f32 %v3178_v9, %v2179_v21 }
0x3884   :  { %v2196_v22 = vpack.c.bf16 %v2181_v27, %v2181_v27 }
0x3885   :  { %v2184_v47 = vpop.permute.xlu1 %2183 }
0x3886   :  { %2198 = vrot.lane.b32.xlu0 %v2196_v22, %s3353_s23 }
0x3889   :  { %v2193_v30 = vpop.permute.xlu1 %2192 }
0x388a   :  { %v4170_v31 = vsel %vm437_vm1, %v2193_v30, %v2175_v8  ;;  %2187 = vrot.lane.b32.xlu0 %v2181_v27, %s3350_s17 }
0x388b   :  { %2304 = vrot.lane.b32.xlu1 %v4170_v31, %s3353_s23 }
0x38f8   :  { %v2199_v58 = vpop.permute.xlu0 %2198 }
0x38f9   :  { %2970 = vmatmul.mubr.msk.bf16.vlgmr.msra.gmra.mxu1 %vm437_vm1, %v2199_v58 }
0x38fa   :  { %2254 = vmatpush1.bf16.msra.mxu1 %v3971_v57 }
0x38fb   :  { %2255 = vmatprep.subr.bf16.mxu1 %v3966_v51 }
0x38fc   :  { %v2188_v29 = vpop.permute.xlu0 %2187 }
0x38fd   :  { %v2190_v32 = vsel %vm437_vm1, %v2184_v47, %v2188_v29  ;;  %v2305_v21 = vpop.permute.xlu1 %2304 }
0x38fe   :  { %v2249_v33 = vpack.c.bf16 %v2190_v32, %v2190_v32  ;;  %2256 = vmatpush1.bf16.msra.mxu1 %v3979_v4 }
0x38ff   :  { %2257 = vmatprep.subr.bf16.mxu1 %v3975_v24 }
0x3900   :  { %2779 = vmatprep.mubr.msk.bf16.mxu1 %vm350_vm4, %v2249_v33 }
0x3902   :  { %2258 = vmatpush1.bf16.msra.mxu1 %v3992_v60 }
0x3903   :  { %2259 = vmatprep.subr.bf16.mxu1 %v3988_v59 }
0x3906   :  { %2260 = vmatpush1.bf16.msra.mxu1 %v3998_v1 }
0x3907   :  { %2261 = vmatprep.subr.bf16.mxu1 %v3996_v55 }
0x390a   :  { %2262 = vmatpush1.bf16.msra.mxu1 %v4004_v38 }
0x390b   :  { %2263 = vmatprep.subr.bf16.mxu1 %v4002_v20 }
0x390e   :  { %2264 = vmatpush1.bf16.msra.mxu1 %v4010_v3 }
0x390f   :  { %2265 = vmatprep.subr.bf16.mxu1 %v4008_v48 }
0x3912   :  { %2266 = vmatpush1.bf16.msra.mxu1 %v4016_v16 }
0x3913   :  { %2267 = vmatprep.subr.bf16.mxu1 %v4014_v35 }
0x3916   :  { %2268 = vmatpush1.bf16.msra.mxu1 %v4020_v52 }
0x3917   :  { %2277 = vmatprep.subr.bf16.mxu1 %v4193_v34 }
0x391a   :  { %2278 = vmatpush2.bf16.msra.mxu1 %v4196_v39 }
0x391b   :  { %2279 = vmatprep.subr.bf16.mxu1 %v4199_v23 }
0x391e   :  { %2280 = vmatpush2.bf16.msra.mxu1 %v4202_v37 }
0x391f   :  { %2281 = vmatprep.subr.bf16.mxu1 %v4205_v2 }
0x3922   :  { %2282 = vmatpush2.bf16.msra.mxu1 %v4208_v61 }
0x3923   :  { %2283 = vmatprep.subr.bf16.mxu1 %v4211_v53 }
0x3926   :  { %2284 = vmatpush2.bf16.msra.mxu1 %v4214_v15 }
0x3927   :  { %2989 = vmatprep.subr.bf16.mxu1 %v3354_v54 }
0x39b9   :  { %v2237_v46 = vpop.f32.mrf.mxu1 }
0x39ba   :  { %v2238_v50 = vadd.f32 %v4122_v28, %v2237_v46 }
0x39bb   :  { %v2971_v56 = vpop.f32.mrf.mxu1 }
0x39bc   :  { %v4220_v0 = vadd.f32 %v2238_v50, %v4131_v19 }
0x39bd   :  { %v2240_v10 = vpop.f32.mrf.mxu1 }
0x39be   :  { %v2244_v5 = vmul.f32 %v4128_v6, %v4220_v0  ;;  %v2248_v12 = vpack.c.bf16 %v4220_v0, %v4220_v0 }
0x39bf   :  { %v2972_v14 = vpop.f32.mrf.mxu1 }
0x39c0   :  { %v2245_v17 = vadd.f32 %v4140_v44, %v2244_v5  ;;  %2286 = vmatmul.mubr.bf16.vlgmr.msra.gmra.mxu1 %v2248_v12 }
0x39c1   :  { %2990 = vmatpush3.bf16.msra.mxu1 %v3850_v63  ;;  %2993 = vmatprep.mubr.msk.bf16.mxu1 %vm3355_vm0, %v3354_v54 }
0x39c2   :  { %2247 = vst [vmem:[#allocation10 + $0x8] sm:$0xff] %v2245_v17  ;;  %2991 = vmatprep.subr.bf16.mxu1 %v3354_v54 }
0x39c5   :  { %2992 = vmatpush3.bf16.msra.mxu1 %v3859_v40 }
0x39c6   :  { %2997 = vmatprep.subr.bf16.mxu1 %v3354_v54 }
0x3a80   :  { %v2287_v19 = vpop.f32.mrf.mxu1 }
0x3a81   :  { %v2294_v7 = vadd.f32 %v3865_v49, %v2287_v19 }
0x3a82   :  { %v2289_v9 = vpop.f32.mrf.mxu1 }
0x3a83   :  { %v2780_v11 = vmul.f32 -1.442695, %v2294_v7 }
0x3a84   :  { %v2291_v18 = vpop.f32.mrf.mxu1 }
0x3a85   :  { %3181 = vpow2.f32 %v2780_v11 }
0x3a86   :  { %v2292_v43 = vpop.f32.mrf.mxu1 }
0x3a92   :  { %v3182_v62 = vpop.eup %3181 }
0x3a93   :  { %v2298_v63 = vadd.f32 1.0, %v3182_v62 }
0x3a95   :  { %3183 = vrcp.f32 %v2298_v63 }
0x3aa2   :  { %v3184_v36 = vpop.eup %3183 }
0x3aa3   :  { %v2301_v25 = vmul.f32 2.0, %v3184_v36  ;;  %v2307_v27 = vmul.f32 %v3184_v36, %v2305_v21 }
0x3aa5   :  { %v2781_v8 = vadd.f32 -1.0, %v2301_v25 }
0x3aa7   :  { %2309 = vrot.lane.b32.xlu0 %v2781_v8, %s3350_s17 }
0x3b19   :  { %v2310_v26 = vpop.permute.xlu0 %2309 }
0x3b1a   :  { %v2312_v40 = vmul.f32 %v3184_v36, %v2310_v26 }
0x3b1c   :  { %2314 = vrot.lane.b32.xlu0 %v2312_v40, %s3353_s23 }
0x3b8e   :  { %v2315_v49 = vpop.permute.xlu0 %2314 }
0x3b8f   :  { %v2317_v22 = vadd.f32 %v2315_v49, %v2307_v27 }
0x3b91   :  { %3185 = vtanh.f32 %v2317_v22 }
0x3b9e   :  { %v3186_v47 = vpop.eup %3185 }
0x3b9f   :  { %2320 = vrot.lane.b32.xlu1 %v3186_v47, %s3350_s17 }
0x3c11   :  { %v2321_v30 = vpop.permute.xlu1 %2320 }
0x3c12   :  { %v2323_v58 = vmul.f32 %v3184_v36, %v2321_v30 }
0x3c14   :  { %v2324_v29 = vpack.c.bf16 %v2323_v58, %v2323_v58 }
0x3c16   :  { %2326 = vrot.lane.b32.xlu0 %v2324_v29, %s3353_s23 }
0x3c88   :  { %v2327_v32 = vpop.permute.xlu0 %2326 }
0x3c89   :  { %2978 = vmatmul.mubr.msk.bf16.vlgmr.msra.gmra.mxu0 %vm437_vm1, %v2327_v32 }
0x3c8a   :  { %2982 = vmatpush3.bf16.msra.mxu0 %v4074_v42  ;;  %2985 = vmatprep.mubr.msk.bf16.mxu0 %vm3355_vm0, %v3354_v54 }
0x3c8b   :  { %2983 = vmatprep.subr.bf16.mxu0 %v3354_v54 }
0x3c8e   :  { %2984 = vmatpush3.bf16.msra.mxu0 %v4077_v45 }
0x3c8f   :  { %2468 = vmatprep.subr.bf16.mxu0 %v3964_v13 }
0x3d49   :  { %v2365_v33 = vpop.f32.mrf.mxu0 }
0x3d4a   :  { %v2366_v46 = vadd.f32 %v2365_v33, %v2289_v9 }
0x3d4b   :  { %v2979_v50 = vpop.f32.mrf.mxu0 }
0x3d4c   :  { %v2371_v56 = vadd.f32 %v3886_v41, %v2366_v46 }
0x3d4d   :  { %v2368_v10 = vpop.f32.mrf.mxu0 }
0x3d4e   :  { %v2783_v5 = vmul.f32 -1.442695, %v2371_v56 }
0x3d4f   :  { %v2980_v12 = vpop.f32.mrf.mxu0 }
0x3d50   :  { %3187 = vpow2.f32 %v2783_v5  ;;  %v3235_v5 = vld [vmem:[%s4334_s8] ss:$0 sm:$0xff]  ;;  %s3357_s8 = smov [#allocation10]  }
0x3d51   :  { %s2669_s28 = sshll.u32 %s3357_s8, 4  ;;  %s2670_s28 = int_to_ptr.vmem [resolvable:$true] %s2669_s28 }
0x3d52   :  { %p3321_p7 = scmp.lt.s32.totalorder %s2670_s28, %s2670_s28 }
0x3d5d   :  { %v3188_v14 = vpop.eup %3187 }
0x3d5e   :  { %v2375_v17 = vadd.f32 1.0, %v3188_v14 }
0x3d60   :  { %3189 = vrcp.f32 %v2375_v17 }
0x3d6d   :  { %v3190_v19 = vpop.eup %3189 }
0x3d6e   :  { %v2378_v7 = vmul.f32 2.0, %v3190_v19  ;;  %v2380_v13 = vmul.f32 %v3190_v19, %v4170_v31 }
0x3d70   :  { %v2784_v11 = vadd.f32 -1.0, %v2378_v7 }
0x3d72   :  { %2382 = vrot.lane.b32.xlu1 %v2784_v11, %s3350_s17 }
0x3de4   :  { %v2383_v18 = vpop.permute.xlu1 %2382 }
0x3de5   :  { %v2385_v43 = vmul.f32 %v3190_v19, %v2383_v18 }
0x3de7   :  { %2387 = vrot.lane.b32.xlu0 %v2385_v43, %s3353_s23 }
0x3e59   :  { %v2388_v9 = vpop.permute.xlu0 %2387 }
0x3e5a   :  { %v2390_v41 = vadd.f32 %v2388_v9, %v2380_v13 }
0x3e5c   :  { %3191 = vtanh.f32 %v2390_v41 }
0x3e69   :  { %v3192_v62 = vpop.eup %3191 }
0x3e6a   :  { %2393 = vrot.lane.b32.xlu1 %v3192_v62, %s3350_s17 }
0x3e6e   :  { %2398 = vrot.lane.b32.xlu1 %v2323_v58, %s3353_s23 }
0x3e72   :  { %2407 = vrot.lane.b32.xlu1 %v2317_v22, %s3356_s0 }
0x3edc   :  { %v2394_v63 = vpop.permute.xlu1 %2393 }
0x3edd   :  { %v2396_v36 = vmul.f32 %v3190_v19, %v2394_v63 }
0x3edf   :  { %v2411_v25 = vpack.c.bf16 %v2396_v36, %v2396_v36 }
0x3ee0   :  { %v2399_v8 = vpop.permute.xlu1 %2398 }
0x3ee1   :  { %2413 = vrot.lane.b32.xlu0 %v2411_v25, %s3353_s23 }
0x3ee4   :  { %v2408_v26 = vpop.permute.xlu1 %2407 }
0x3ee5   :  { %v4254_v40 = vsel %vm437_vm1, %v2408_v26, %v2390_v41  ;;  %2402 = vrot.lane.b32.xlu0 %v2396_v36, %s3350_s17 }
0x3ee6   :  { %2519 = vrot.lane.b32.xlu1 %v4254_v40, %s3353_s23 }
0x3f53   :  { %v2414_v31 = vpop.permute.xlu0 %2413 }
0x3f54   :  { %2986 = vmatmul.mubr.msk.bf16.vlgmr.msra.gmra.mxu0 %vm437_vm1, %v2414_v31 }
0x3f55   :  { %2469 = vmatpush1.bf16.msra.mxu0 %v3971_v57 }
0x3f56   :  { %2470 = vmatprep.subr.bf16.mxu0 %v3966_v51 }
0x3f57   :  { %v2403_v21 = vpop.permute.xlu0 %2402 }
0x3f58   :  { %v2405_v27 = vsel %vm437_vm1, %v2399_v8, %v2403_v21 }
0x3f59   :  { %v2464_v49 = vpack.c.bf16 %v2405_v27, %v2405_v27  ;;  %2471 = vmatpush1.bf16.msra.mxu0 %v3979_v4 }
0x3f5a   :  { %2472 = vmatprep.subr.bf16.mxu0 %v3975_v24 }
0x3f5b   :  { %2786 = vmatprep.mubr.msk.bf16.mxu0 %vm350_vm4, %v2464_v49 }
0x3f5d   :  { %2473 = vmatpush1.bf16.msra.mxu0 %v3992_v60 }
0x3f5e   :  { %2474 = vmatprep.subr.bf16.mxu0 %v3988_v59 }
0x3f61   :  { %2475 = vmatpush1.bf16.msra.mxu0 %v3998_v1 }
0x3f62   :  { %2476 = vmatprep.subr.bf16.mxu0 %v3996_v55 }
0x3f65   :  { %2477 = vmatpush1.bf16.msra.mxu0 %v4004_v38 }
0x3f66   :  { %2478 = vmatprep.subr.bf16.mxu0 %v4002_v20 }
0x3f69   :  { %2479 = vmatpush1.bf16.msra.mxu0 %v4010_v3 }
0x3f6a   :  { %2480 = vmatprep.subr.bf16.mxu0 %v4008_v48  ;;  %v3234_v48 = vld [vmem:[%s4333_s7] ss:$0 sm:$0xff] }
0x3f6d   :  { %2481 = vmatpush1.bf16.msra.mxu0 %v4016_v16 }
0x3f6e   :  { %2482 = vmatprep.subr.bf16.mxu0 %v4014_v35 }
0x3f71   :  { %2483 = vmatpush1.bf16.msra.mxu0 %v4020_v52 }
0x3f72   :  { %2492 = vmatprep.subr.bf16.mxu0 %v4193_v34 }
0x3f75   :  { %2493 = vmatpush2.bf16.msra.mxu0 %v4196_v39 }
0x3f76   :  { %2494 = vmatprep.subr.bf16.mxu0 %v4199_v23 }
0x3f79   :  { %2495 = vmatpush2.bf16.msra.mxu0 %v4202_v37 }
0x3f7a   :  { %2496 = vmatprep.subr.bf16.mxu0 %v4205_v2 }
0x3f7d   :  { %2497 = vmatpush2.bf16.msra.mxu0 %v4208_v61 }
0x3f7e   :  { %2498 = vmatprep.subr.bf16.mxu0 %v4211_v53 }
0x3f81   :  { %2499 = vmatpush2.bf16.msra.mxu0 %v4214_v15 }
0x4014   :  { %v2452_v51 = vpop.f32.mrf.mxu0 }
0x4015   :  { %v2453_v57 = vadd.f32 %v4122_v28, %v2452_v51 }
0x4016   :  { %v2987_v24 = vpop.f32.mrf.mxu0 }
0x4017   :  { %v4287_v4 = vadd.f32 %v2453_v57, %v4220_v0  ;;  %v2520_v0 = vpop.permute.xlu1 %2519 }
0x4018   :  { %v2455_v59 = vpop.f32.mrf.mxu0 }
0x4019   :  { %v2459_v60 = vmul.f32 %v4128_v6, %v4287_v4  ;;  %v2463_v55 = vpack.c.bf16 %v4287_v4, %v4287_v4 }
0x401a   :  { %v2988_v1 = vpop.f32.mrf.mxu0 }
0x401b   :  { %v2460_v20 = vadd.f32 %v4140_v44, %v2459_v60  ;;  %2501 = vmatmul.mubr.bf16.vlgmr.msra.gmra.mxu0 %v2463_v55 }
0x401d   :  { %2462 = vst [vmem:[#allocation10 + $0x10] sm:$0xff] %v2460_v20 }
0x40db   :  { %v2502_v38 = vpop.f32.mrf.mxu0 }
0x40dc   :  { %v2509_v3 = vadd.f32 %v3234_v48, %v2502_v38 }
0x40dd   :  { %v2504_v35 = vpop.f32.mrf.mxu0 }
0x40de   :  { %v2787_v16 = vmul.f32 -1.442695, %v2509_v3 }
0x40df   :  { %v2506_v52 = vpop.f32.mrf.mxu0 }
0x40e0   :  { %3193 = vpow2.f32 %v2787_v16 }
0x40e1   :  { %v2507_v34 = vpop.f32.mrf.mxu0 }
0x40ed   :  { %v3194_v39 = vpop.eup %3193 }
0x40ee   :  { %v2513_v23 = vadd.f32 1.0, %v3194_v39 }
0x40f0   :  { %3195 = vrcp.f32 %v2513_v23 }
0x40fd   :  { %v3196_v37 = vpop.eup %3195 }
0x40fe   :  { %v2516_v2 = vmul.f32 2.0, %v3196_v37  ;;  %v2522_v22 = vmul.f32 %v3196_v37, %v2520_v0 }
0x4100   :  { %v2788_v61 = vadd.f32 -1.0, %v2516_v2 }
0x4102   :  { %2524 = vrot.lane.b32.xlu0 %v2788_v61, %s3350_s17 }
0x4174   :  { %v2525_v53 = vpop.permute.xlu0 %2524 }
0x4175   :  { %v2527_v15 = vmul.f32 %v3196_v37, %v2525_v53 }
0x4177   :  { %2529 = vrot.lane.b32.xlu0 %v2527_v15, %s3353_s23 }
0x41e9   :  { %v2530_v47 = vpop.permute.xlu0 %2529 }
0x41ea   :  { %v2532_v30 = vadd.f32 %v2530_v47, %v2522_v22 }
0x41ec   :  { %3197 = vtanh.f32 %v2532_v30 }
0x41f9   :  { %v3198_v58 = vpop.eup %3197 }
0x41fa   :  { %2535 = vrot.lane.b32.xlu1 %v3198_v58, %s3350_s17 }
0x426c   :  { %v2536_v29 = vpop.permute.xlu1 %2535 }
0x426d   :  { %v2538_v32 = vmul.f32 %v3196_v37, %v2536_v29 }
0x426f   :  { %v2539_v33 = vpack.c.bf16 %v2538_v32, %v2538_v32 }
0x4271   :  { %2541 = vrot.lane.b32.xlu0 %v2539_v33, %s3353_s23 }
0x42e3   :  { %v2542_v46 = vpop.permute.xlu0 %2541 }
0x42e4   :  { %2994 = vmatmul.mubr.msk.bf16.vlgmr.msra.gmra.mxu1 %vm437_vm1, %v2542_v46 }
0x42e5   :  { %2998 = vmatpush3.bf16.msra.mxu1 %v4074_v42  ;;  %3001 = vmatprep.mubr.msk.bf16.mxu1 %vm3355_vm0, %v3354_v54 }
0x42e6   :  { %2999 = vmatprep.subr.bf16.mxu1 %v3354_v54 }
0x42e9   :  { %3000 = vmatpush3.bf16.msra.mxu1 %v4077_v45 }
0x43a4   :  { %v2580_v50 = vpop.f32.mrf.mxu1 }
0x43a5   :  { %v2581_v56 = vadd.f32 %v2580_v50, %v2504_v35 }
0x43a6   :  { %v2995_v10 = vpop.f32.mrf.mxu1 }
0x43a7   :  { %v2586_v12 = vadd.f32 %v3235_v5, %v2581_v56 }
0x43a8   :  { %v2583_v14 = vpop.f32.mrf.mxu1 }
0x43a9   :  { %v2790_v17 = vmul.f32 -1.442695, %v2586_v12 }
0x43aa   :  { %v2996_v19 = vpop.f32.mrf.mxu1 }
0x43ab   :  { %3199 = vpow2.f32 %v2790_v17 }
0x43b8   :  { %v3200_v42 = vpop.eup %3199 }
0x43b9   :  { %v2590_v7 = vadd.f32 1.0, %v3200_v42 }
0x43bb   :  { %3201 = vrcp.f32 %v2590_v7 }
0x43c8   :  { %v3202_v11 = vpop.eup %3201 }
0x43c9   :  { %v2593_v18 = vmul.f32 2.0, %v3202_v11  ;;  %v2595_v13 = vmul.f32 %v3202_v11, %v4254_v40 }
0x43cb   :  { %v2791_v54 = vadd.f32 -1.0, %v2593_v18 }
0x43cd   :  { %2597 = vrot.lane.b32.xlu1 %v2791_v54, %s3350_s17 }
0x443f   :  { %v2598_v45 = vpop.permute.xlu1 %2597 }
0x4440   :  { %v2600_v43 = vmul.f32 %v3202_v11, %v2598_v45 }
0x4442   :  { %2602 = vrot.lane.b32.xlu0 %v2600_v43, %s3353_s23 }
0x44b4   :  { %v2603_v9 = vpop.permute.xlu0 %2602 }
0x44b5   :  { %v2605_v41 = vadd.f32 %v2603_v9, %v2595_v13 }
0x44b7   :  { %3203 = vtanh.f32 %v2605_v41 }
0x44c4   :  { %v3204_v62 = vpop.eup %3203 }
0x44c5   :  { %2608 = vrot.lane.b32.xlu1 %v3204_v62, %s3350_s17  ;;  %s3316_s17 = scalar_lea.vmem %s2670_s28, 512 }
0x44c6   :  { %p3317_p6 = scmp.ne.s32.totalorder %s2670_s28, %s3316_s17  ;;  %p3322_p8 = scmp.lt.s32.totalorder %s3316_s17, %s3316_s17 }
0x44c8   :  { %p3323_p9 = por %p3322_p8, %p3321_p7 }
0x44ca   :  { %p3324_p10 = pnand %p3323_p9, %p3317_p6 }
0x4537   :  { %v2609_v63 = vpop.permute.xlu1 %2608 }
0x4538   :  { %v2611_v36 = vmul.f32 %v3202_v11, %v2609_v63 }
0x453a   :  { %v2612_v25 = vpack.c.bf16 %v2611_v36, %v2611_v36 }
0x453c   :  { %2614 = vrot.lane.b32.xlu0 %v2612_v25, %s3353_s23 }
0x45ae   :  { %v2615_v8 = vpop.permute.xlu0 %2614 }
0x45af   :  { %3002 = vmatmul.mubr.msk.bf16.vlgmr.msra.gmra.mxu1 %vm437_vm1, %v2615_v8 }
0x466f   :  { %v2653_v26 = vpop.f32.mrf.mxu1 }
0x4670   :  { %v2654_v31 = vadd.f32 %v4122_v28, %v2653_v26 }
0x4671   :  { %v3003_v21 = vpop.f32.mrf.mxu1 }
0x4672   :  { %v2659_v40 = vadd.f32 %v2654_v31, %v4287_v4 }
0x4673   :  { %v2656_v27 = vpop.f32.mrf.mxu1 }
0x4674   :  { %v2660_v49 = vmul.f32 %v4128_v6, %v2659_v40 }
0x4675   :  { %v3004_v51 = vpop.f32.mrf.mxu1 }
0x4676   :  { %v2661_v57 = vadd.f32 %v4140_v44, %v2660_v49 }
0x4678   :  { %2663 = vst [vmem:[#allocation10 + $0x18] sm:$0xff] %v2661_v57 }
0x4679   :  { %3327 = shalt.err (!%p3324_p10)
}
0x467a   :  { %2675 = dma.vmem_to_hbm [thread:$0]  %s2670_s28, 512, %s4337_s11, [#allocation4], %s3346_s26, %s3346_s26, %s3347_s27  }
0x467b   :  { %3342 = dma.done.wait [#allocation4], 512  }
0x467c   :  { %3343 = vsyncadd [#allocation4], 4294966784 }
0x467d   :  { %2679 = vsyncpa [#allocation3], 1 }
0x467e   :  { %2680 = vsyncpa [#allocation6], 1 }
0x467f   :  { %2681 = vsyncpa [#allocation9], 1 }
0x4680   :  { %2682 = vsyncpa [#allocation4], 1 }

</bundles_post_ra>
